<compile_context>
chip_gen: v5e
topology: v5e:2x2
jax: 0.10.0
libtpu: 0.0.40
codegen_flags: <defaults>
</compile_context>

<pallas_src>
import jax
import jax.numpy as jnp
from jax import lax
from jax.experimental import pallas as pl
from jax.experimental.pallas import tpu as pltpu

# ---------------- config (small synthetic shapes) ----------------
B = 2
IMG_H = IMG_W = 32
PATCH = 4
FH, FW = IMG_H // PATCH, IMG_W // PATCH          # 8, 8 feature map
NFEAT = FH * FW                                  # 64
PDIM = PATCH * PATCH * 3                         # 48 patch dim
C = 32                                           # backbone channels
Q = 8                                            # object queries
NUM_CLASSES = 5                                  # thing+stuff classes
K1 = NUM_CLASSES + 1                             # +1 "no object"
HW_FULL = IMG_H * IMG_W                          # 1024 (lane-dense: 8*128)
LABEL_DIVISOR = 1000
PIXEL_MEAN = (123.675, 116.28, 103.53)
PIXEL_STD = (58.395, 57.12, 57.375)


# ---------------- constant bilinear-upsample matrix (align_corners=False) ----------------
def _bilinear_matrix_1d(in_size, out_size):
    # PyTorch F.interpolate(mode='bilinear', align_corners=False) source coords.
    scale = in_size / out_size
    o = jnp.arange(out_size, dtype=jnp.float32)
    src = jnp.maximum((o + 0.5) * scale - 0.5, 0.0)
    i0 = jnp.minimum(jnp.floor(src).astype(jnp.int32), in_size - 1)
    i1 = jnp.minimum(i0 + 1, in_size - 1)
    w1 = src - i0.astype(jnp.float32)
    w0 = 1.0 - w1
    cols = jnp.arange(out_size)
    m = jnp.zeros((in_size, out_size), jnp.float32)
    m = m.at[i0, cols].add(w0)
    m = m.at[i1, cols].add(w1)
    return m


def build_upsample_matrix():
    uh = _bilinear_matrix_1d(FH, IMG_H)          # (8, 32)
    uw = _bilinear_matrix_1d(FW, IMG_W)          # (8, 32)
    # U[fh*FW+fw, oh*IMG_W+ow] = uh[fh,oh] * uw[fw,ow]
    u = jnp.einsum("ho,wp->hwop", uh, uw).reshape(NFEAT, HW_FULL)
    # Weights are products of multiples of 1/8 (k/64, k<=64) -> exact in bf16.
    return u.astype(jnp.bfloat16)                # (64, 1024) bf16


# ---------------- fused kernel: backbone + head + upsample + panoptic ----------------
def rtknet_fused_kernel(patch_ref, w_ref, b_ref, q_ref, wc_ref, bc_ref, up_hbm,
                        mask_ref, logit_ref, pan_ref, up_vmem, up_sem):
    # patch_ref: (B*NFEAT, PDIM)  w_ref: (PDIM, C)  b_ref: (1, C)
    # q_ref: (Q, C)  wc_ref: (C, K1)  bc_ref: (1, K1)
    # up_hbm: (NFEAT, HW_FULL) bf16, raw HBM ref (memory_space=pl.ANY)
    # mask_ref: (B*Q, HW_FULL)  logit_ref: (B*Q, K1)  pan_ref: (B, HW_FULL)
    # up_vmem: (NFEAT, HW_FULL) bf16 VMEM scratch   up_sem: DMA semaphore

    # Kick off the 128 KB upsample-constant DMA; it hides behind the backbone
    # and head matmuls and is only waited on right before the upsample matmul.
    up_copy = pltpu.make_async_copy(up_hbm, up_vmem, up_sem)
    up_copy.start()

    # --- backbone: 4x4/stride-4 "conv" (pixel norm folded into weights) + ReLU ---
    f = jnp.maximum(
        jnp.dot(patch_ref[...], w_ref[...], preferred_element_type=jnp.float32)
        + b_ref[...],
        0.0,
    )                                                               # (B*NFEAT, C) = (128, 32)

    # --- sem_seg_head: per-pixel query dot product + class logits (unrolled over B) ---
    q = q_ref[...]                                                  # (Q, C)
    masks_low_parts = []
    logits_parts = []
    for bi in range(B):
        f_b = f[bi * NFEAT:(bi + 1) * NFEAT, :]                     # (NFEAT, C), static sublane slice
        masks_low_parts.append(
            lax.dot_general(q, f_b, (((1,), (1,)), ((), ())),       # contract over C, no f.T copy
                            preferred_element_type=jnp.float32))    # (Q, NFEAT)
        pooled = jnp.mean(f_b, axis=0, keepdims=True)               # (1, C)
        logits_parts.append(
            jnp.dot(q + pooled, wc_ref[...], preferred_element_type=jnp.float32)
            + bc_ref[...])                                          # (Q, K1)
    masks_low = jnp.concatenate(masks_low_parts, axis=0)            # (B*Q, NFEAT) = (16, 64)
    logits = jnp.concatenate(logits_parts, axis=0)                  # (B*Q, K1)   = (16, 6)
    logit_ref[...] = logits

    # --- F.interpolate(bilinear, align_corners=False) as constant-matrix bf16 matmul ---
    up_copy.wait()
    masks_up = jnp.dot(masks_low.astype(jnp.bfloat16), up_vmem[...],
                       preferred_element_type=jnp.float32)          # (B*Q, HW_FULL) f32
    mask_ref[...] = masks_up

    # --- panoptic inference (get_prediction, simplified), f32 VPU/EUP math ---
    q_iota = lax.broadcasted_iota(jnp.int32, (Q, 1), 0)             # (Q, 1)
    pan_rows = []
    for bi in range(B):
        logits_b = logits[bi * Q:(bi + 1) * Q, :]                   # (Q, K1)
        probs = jax.nn.softmax(logits_b, axis=-1)
        cls_probs = probs[:, :NUM_CLASSES]                          # drop "no object"
        scores = jnp.max(cls_probs, axis=-1, keepdims=True)         # (Q, 1)
        labels = jnp.argmax(cls_probs, axis=-1, keepdims=True).astype(jnp.int32)  # (Q, 1)
        pan_ids = labels * LABEL_DIVISOR + q_iota                   # (Q, 1) panoptic id per query
        weighted = scores * jax.nn.sigmoid(masks_up[bi * Q:(bi + 1) * Q, :])       # (Q, HW)

        # Running-max scan over Q (unrolled, pure VPU). Strict '>' preserves
        # argmax first-index-wins tie-breaking. Only two carries live: score + id.
        best_score = weighted[0:1, :]                               # (1, HW)
        best_id = jnp.broadcast_to(pan_ids[0:1, :], (1, HW_FULL))   # (1, HW) int32
        for qi in range(1, Q):
            cur = weighted[qi:qi + 1, :]
            better = cur > best_score
            best_score = jnp.where(better, cur, best_score)
            best_id = jnp.where(better, pan_ids[qi:qi + 1, :], best_id)
        pan_rows.append(best_id)

    # TODO(synk): real get_prediction also applies instance_score_threshold /
    # overlap_threshold and thing-vs-stuff id merging; simplified panoptic id here.
    pan_ref[...] = jnp.concatenate(pan_rows, axis=0)                # one full (B, HW) store


def run_rtknet_fused(patches_flat, w_fold, b_fold, queries, w_cls, b_cls, up_mat_bf16):
    return pl.pallas_call(
        rtknet_fused_kernel,
        out_shape=(
            jax.ShapeDtypeStruct((B * Q, HW_FULL), jnp.float32),   # pred_masks (full res, flat)
            jax.ShapeDtypeStruct((B * Q, K1), jnp.float32),        # pred_logits (flat)
            jax.ShapeDtypeStruct((B, HW_FULL), jnp.int32),         # panoptic ids (flat)
        ),
        grid=(1,),                                                  # whole batch in one step
        in_specs=[
            pl.BlockSpec((B * NFEAT, PDIM), lambda i: (0, 0)),
            pl.BlockSpec((PDIM, C), lambda i: (0, 0)),
            pl.BlockSpec((1, C), lambda i: (0, 0)),
            pl.BlockSpec((Q, C), lambda i: (0, 0)),
            pl.BlockSpec((C, K1), lambda i: (0, 0)),
            pl.BlockSpec((1, K1), lambda i: (0, 0)),
            pl.BlockSpec(memory_space=pl.ANY),                      # up_mat stays in HBM, manual DMA
        ],
        out_specs=(
            pl.BlockSpec((B * Q, HW_FULL), lambda i: (0, 0)),
            pl.BlockSpec((B * Q, K1), lambda i: (0, 0)),
            pl.BlockSpec((B, HW_FULL), lambda i: (0, 0)),
        ),
        scratch_shapes=[
            pltpu.VMEM((NFEAT, HW_FULL), jnp.bfloat16),             # upsample constant landing buffer
            pltpu.SemaphoreType.DMA(()),
        ],
        compiler_params=pltpu.CompilerParams(
            dimension_semantics=("arbitrary",),
            vmem_limit_bytes=8 * 1024 * 1024,                       # everything here is KB-scale
        ),
    )(patches_flat, w_fold, b_fold, queries, w_cls, b_cls, up_mat_bf16)


# ---------------- full forward (inference path of RTKNet.forward) ----------------
def rtknet_forward(images_nchw, params):
    # NCHW -> NHWC, patchify 4x4 stride 4 (column order inside a patch = (dy, dx, c)),
    # then fold the batch into the M dimension: (B*NFEAT, PDIM) = (128, 48).
    x = jnp.transpose(images_nchw, (0, 2, 3, 1)).astype(jnp.float32)     # (B, H, W, 3)
    x = x.reshape(B, FH, PATCH, FW, PATCH, 3)
    patches = jnp.transpose(x, (0, 1, 3, 2, 4, 5)).reshape(B * NFEAT, PDIM)

    # Fold (img - mean) / std into the conv weights (accuracy-neutral).
    mean_col = jnp.tile(jnp.asarray(PIXEL_MEAN, jnp.float32), PATCH * PATCH)   # (48,)
    std_col = jnp.tile(jnp.asarray(PIXEL_STD, jnp.float32), PATCH * PATCH)     # (48,)
    w_fold = params["w_patch"] / std_col[:, None]                              # (48, C)
    b_fold = params["b_patch"] - (mean_col / std_col)[None, :] @ params["w_patch"]

    up_mat = build_upsample_matrix()                                           # (64, 1024) bf16

    masks_up_flat, logits_flat, pan_flat = run_rtknet_fused(
        patches, w_fold, b_fold,
        params["queries"], params["w_cls"], params["b_cls"], up_mat,
    )

    masks_up = masks_up_flat.reshape(B, Q, IMG_H, IMG_W)
    pred_logits = logits_flat.reshape(B, Q, K1)
    pan = pan_flat.reshape(B, IMG_H, IMG_W)
    # Note: the final F.interpolate(mode='nearest') to (height, width) is an identity
    # here (requested size == padded image size) and is deliberately omitted.
    return {"panoptic_seg": pan, "pred_logits": pred_logits, "pred_masks": masks_up}


def init_params(key):
    k1, k2, k3, k4 = jax.random.split(key, 4)
    return {
        "w_patch": jax.random.normal(k1, (PDIM, C), jnp.float32) * 0.05,
        "b_patch": jnp.zeros((1, C), jnp.float32),
        "queries": jax.random.normal(k2, (Q, C), jnp.float32) * 0.5,
        "w_cls": jax.random.normal(k3, (C, K1), jnp.float32) * 0.2,
        "b_cls": jax.random.normal(k4, (1, K1), jnp.float32) * 0.1,
    }


if __name__ == "__main__":
    key = jax.random.PRNGKey(0)
    k_img, k_par = jax.random.split(key)
    # uint8-like image values, NCHW as in PyTorch batched_inputs
    images = jax.random.uniform(k_img, (B, 3, IMG_H, IMG_W), jnp.float32) * 255.0
    params = init_params(k_par)

    fwd = jax.jit(rtknet_forward)
    out = fwd(images, params)
    jax.block_until_ready(out)

    assert out["panoptic_seg"].shape == (B, IMG_H, IMG_W)
    assert out["panoptic_seg"].dtype == jnp.int32
    assert out["pred_logits"].shape == (B, Q, K1)
    assert out["pred_masks"].shape == (B, Q, IMG_H, IMG_W)
    print("KERNEL_OK")
</pallas_src>

<mosaic_0001>
module attributes {stable_mosaic.version = 11 : i64} {
  func.func @rtknet_fused_kernel(%arg0: i32, %arg1: memref<128x48xf32, #tpu.memory_space<vmem>>, %arg2: memref<48x32xf32, #tpu.memory_space<vmem>>, %arg3: memref<1x32xf32, #tpu.memory_space<vmem>>, %arg4: memref<8x32xf32, #tpu.memory_space<vmem>>, %arg5: memref<32x6xf32, #tpu.memory_space<vmem>>, %arg6: memref<1x6xf32, #tpu.memory_space<vmem>>, %arg7: memref<64x1024xbf16, #tpu.memory_space<any>>, %arg8: memref<16x1024xf32, #tpu.memory_space<vmem>>, %arg9: memref<16x6xf32, #tpu.memory_space<vmem>>, %arg10: memref<2x1024xi32, #tpu.memory_space<vmem>>, %arg11: memref<64x1024xbf16, #tpu.memory_space<vmem>>, %arg12: memref<!tpu.dma_semaphore, #tpu.memory_space<semaphore_mem>>) attributes {dimension_semantics = [#tpu.dimension_semantics<arbitrary>], iteration_bounds = array<i64: 1>, scalar_prefetch = 0 : i64, scratch_operands = 2 : i64, tpu.core_type = #tpu.core_type<tc>, window_params = [{pipeline_mode = #tpu.pipeline_mode<synchronous>, transform_indices = @transform_0, window_bounds = array<i64: 128, 48>}, {pipeline_mode = #tpu.pipeline_mode<synchronous>, transform_indices = @transform_1, window_bounds = array<i64: 48, 32>}, {pipeline_mode = #tpu.pipeline_mode<synchronous>, transform_indices = @transform_2, window_bounds = array<i64: 1, 32>}, {pipeline_mode = #tpu.pipeline_mode<synchronous>, transform_indices = @transform_3, window_bounds = array<i64: 8, 32>}, {pipeline_mode = #tpu.pipeline_mode<synchronous>, transform_indices = @transform_4, window_bounds = array<i64: 32, 6>}, {pipeline_mode = #tpu.pipeline_mode<synchronous>, transform_indices = @transform_5, window_bounds = array<i64: 1, 6>}, {}, {pipeline_mode = #tpu.pipeline_mode<synchronous>, transform_indices = @transform_7, window_bounds = array<i64: 16, 1024>}, {pipeline_mode = #tpu.pipeline_mode<synchronous>, transform_indices = @transform_8, window_bounds = array<i64: 16, 6>}, {pipeline_mode = #tpu.pipeline_mode<synchronous>, transform_indices = @transform_9, window_bounds = array<i64: 2, 1024>}]} {
    tpu.enqueue_dma source(%arg7 : memref<64x1024xbf16, #tpu.memory_space<any>>) target(%arg11 : memref<64x1024xbf16, #tpu.memory_space<vmem>>) target_semaphore(%arg12 : memref<!tpu.dma_semaphore, #tpu.memory_space<semaphore_mem>>)
    %c0 = arith.constant 0 : index
    %c0_0 = arith.constant 0 : index
    %0 = vector.load %arg1[%c0, %c0_0] : memref<128x48xf32, #tpu.memory_space<vmem>>, vector<128x48xf32>
    %c0_1 = arith.constant 0 : index
    %c0_2 = arith.constant 0 : index
    %1 = vector.load %arg2[%c0_1, %c0_2] : memref<48x32xf32, #tpu.memory_space<vmem>>, vector<48x32xf32>
    %cst = arith.constant dense<0.000000e+00> : vector<128x32xf32>
    %2 = tpu.matmul %0, %1, %cst {dimension_numbers = #tpu.dot_dimension_numbers<[1], [0], [0], [1], [0, 0, 1, 1], [], []>} : vector<128x48xf32>, vector<48x32xf32>, vector<128x32xf32> -> vector<128x32xf32>
    %c0_3 = arith.constant 0 : index
    %c0_4 = arith.constant 0 : index
    %3 = vector.load %arg3[%c0_3, %c0_4] : memref<1x32xf32, #tpu.memory_space<vmem>>, vector<1x32xf32>
    %4 = vector.broadcast %3 : vector<1x32xf32> to vector<128x32xf32>
    %5 = arith.addf %2, %4 : vector<128x32xf32>
    %cst_5 = arith.constant 0.000000e+00 : f32
    %6 = vector.broadcast %cst_5 : f32 to vector<128x32xf32>
    %7 = arith.maximumf %5, %6 : vector<128x32xf32>
    %c0_6 = arith.constant 0 : index
    %c0_7 = arith.constant 0 : index
    %8 = vector.load %arg4[%c0_6, %c0_7] : memref<8x32xf32, #tpu.memory_space<vmem>>, vector<8x32xf32>
    %9 = vector.extract_strided_slice %7 {offsets = [0, 0], sizes = [64, 32], strides = [1, 1]} : vector<128x32xf32> to vector<64x32xf32>
    %cst_8 = arith.constant dense<0.000000e+00> : vector<8x64xf32>
    %10 = tpu.matmul %8, %9, %cst_8 {dimension_numbers = #tpu.dot_dimension_numbers<[1], [1], [0], [0], [0, 0, 1, 0], [], []>} : vector<8x32xf32>, vector<64x32xf32>, vector<8x64xf32> -> vector<8x64xf32>
    %cst_9 = arith.constant dense<0.000000e+00> : vector<32xf32>
    %11 = vector.multi_reduction <add>, %9, %cst_9 [0] : vector<64x32xf32> to vector<32xf32>
    %12 = vector.shape_cast %11 : vector<32xf32> to vector<1x32xf32>
    %cst_10 = arith.constant 6.400000e+01 : f32
    %13 = vector.broadcast %cst_10 : f32 to vector<1x32xf32>
    %14 = arith.divf %12, %13 : vector<1x32xf32>
    %15 = vector.broadcast %14 : vector<1x32xf32> to vector<8x32xf32>
    %16 = arith.addf %8, %15 : vector<8x32xf32>
    %c0_11 = arith.constant 0 : index
    %c0_12 = arith.constant 0 : index
    %17 = vector.load %arg5[%c0_11, %c0_12] : memref<32x6xf32, #tpu.memory_space<vmem>>, vector<32x6xf32>
    %cst_13 = arith.constant dense<0.000000e+00> : vector<8x6xf32>
    %18 = tpu.matmul %16, %17, %cst_13 {dimension_numbers = #tpu.dot_dimension_numbers<[1], [0], [0], [1], [0, 0, 1, 1], [], []>} : vector<8x32xf32>, vector<32x6xf32>, vector<8x6xf32> -> vector<8x6xf32>
    %c0_14 = arith.constant 0 : index
    %c0_15 = arith.constant 0 : index
    %19 = vector.load %arg6[%c0_14, %c0_15] : memref<1x6xf32, #tpu.memory_space<vmem>>, vector<1x6xf32>
    %20 = vector.broadcast %19 : vector<1x6xf32> to vector<8x6xf32>
    %21 = arith.addf %18, %20 : vector<8x6xf32>
    %22 = vector.extract_strided_slice %7 {offsets = [64, 0], sizes = [64, 32], strides = [1, 1]} : vector<128x32xf32> to vector<64x32xf32>
    %cst_16 = arith.constant dense<0.000000e+00> : vector<8x64xf32>
    %23 = tpu.matmul %8, %22, %cst_16 {dimension_numbers = #tpu.dot_dimension_numbers<[1], [1], [0], [0], [0, 0, 1, 0], [], []>} : vector<8x32xf32>, vector<64x32xf32>, vector<8x64xf32> -> vector<8x64xf32>
    %cst_17 = arith.constant dense<0.000000e+00> : vector<32xf32>
    %24 = vector.multi_reduction <add>, %22, %cst_17 [0] : vector<64x32xf32> to vector<32xf32>
    %25 = vector.shape_cast %24 : vector<32xf32> to vector<1x32xf32>
    %cst_18 = arith.constant 6.400000e+01 : f32
    %26 = vector.broadcast %cst_18 : f32 to vector<1x32xf32>
    %27 = arith.divf %25, %26 : vector<1x32xf32>
    %28 = vector.broadcast %27 : vector<1x32xf32> to vector<8x32xf32>
    %29 = arith.addf %8, %28 : vector<8x32xf32>
    %c0_19 = arith.constant 0 : index
    %c0_20 = arith.constant 0 : index
    %30 = vector.load %arg5[%c0_19, %c0_20] : memref<32x6xf32, #tpu.memory_space<vmem>>, vector<32x6xf32>
    %cst_21 = arith.constant dense<0.000000e+00> : vector<8x6xf32>
    %31 = tpu.matmul %29, %30, %cst_21 {dimension_numbers = #tpu.dot_dimension_numbers<[1], [0], [0], [1], [0, 0, 1, 1], [], []>} : vector<8x32xf32>, vector<32x6xf32>, vector<8x6xf32> -> vector<8x6xf32>
    %c0_22 = arith.constant 0 : index
    %c0_23 = arith.constant 0 : index
    %32 = vector.load %arg6[%c0_22, %c0_23] : memref<1x6xf32, #tpu.memory_space<vmem>>, vector<1x6xf32>
    %33 = vector.broadcast %32 : vector<1x6xf32> to vector<8x6xf32>
    %34 = arith.addf %31, %33 : vector<8x6xf32>
    %35 = tpu.concatenate %10, %23 in 0 : vector<8x64xf32>, vector<8x64xf32> -> vector<16x64xf32>
    %36 = tpu.concatenate %21, %34 in 0 : vector<8x6xf32>, vector<8x6xf32> -> vector<16x6xf32>
    %c0_24 = arith.constant 0 : index
    %c0_25 = arith.constant 0 : index
    %37 = vector.load %arg9[%c0_24, %c0_25] : memref<16x6xf32, #tpu.memory_space<vmem>>, vector<16x6xf32>
    tpu.vector_store %arg9[%c0_24, %c0_25], %36 {strides = array<i32>} : memref<16x6xf32, #tpu.memory_space<vmem>>, vector<16x6xf32>,
    tpu.wait_dma2 semaphore(%arg12 : memref<!tpu.dma_semaphore, #tpu.memory_space<semaphore_mem>>) src(%arg7 : memref<64x1024xbf16, #tpu.memory_space<any>>) dst(%arg11 : memref<64x1024xbf16, #tpu.memory_space<vmem>>)
    %38 = arith.truncf %35 : vector<16x64xf32> to vector<16x64xbf16>
    %c0_26 = arith.constant 0 : index
    %c0_27 = arith.constant 0 : index
    %39 = vector.load %arg11[%c0_26, %c0_27] : memref<64x1024xbf16, #tpu.memory_space<vmem>>, vector<64x1024xbf16>
    %cst_28 = arith.constant dense<0.000000e+00> : vector<16x1024xf32>
    %40 = tpu.matmul %38, %39, %cst_28 {dimension_numbers = #tpu.dot_dimension_numbers<[1], [0], [0], [1], [0, 0, 1, 1], [], []>} : vector<16x64xbf16>, vector<64x1024xbf16>, vector<16x1024xf32> -> vector<16x1024xf32>
    %c0_29 = arith.constant 0 : index
    %c0_30 = arith.constant 0 : index
    %41 = vector.load %arg8[%c0_29, %c0_30] : memref<16x1024xf32, #tpu.memory_space<vmem>>, vector<16x1024xf32>
    tpu.vector_store %arg8[%c0_29, %c0_30], %40 {strides = array<i32>} : memref<16x1024xf32, #tpu.memory_space<vmem>>, vector<16x1024xf32>,
    %42 = tpu.iota {dimensions = array<i32: 0>} : vector<8x1xi32>
    %43 = vector.extract_strided_slice %36 {offsets = [0, 0], sizes = [8, 6], strides = [1, 1]} : vector<16x6xf32> to vector<8x6xf32>
    %cst_31 = arith.constant dense<0xFF800000> : vector<8xf32>
    %44 = vector.multi_reduction <maximumf>, %43, %cst_31 [1] : vector<8x6xf32> to vector<8xf32>
    %cst_32 = arith.constant 0xFF800000 : f32
    %45 = vector.broadcast %cst_32 : f32 to vector<8xf32>
    %46 = arith.maximumf %45, %44 : vector<8xf32>
    %47 = vector.shape_cast %46 : vector<8xf32> to vector<8x1xf32>
    %48 = vector.broadcast %47 : vector<8x1xf32> to vector<8x6xf32>
    %49 = arith.subf %43, %48 : vector<8x6xf32>
    %50 = math.exp %49 : vector<8x6xf32>
    %cst_33 = arith.constant dense<0.000000e+00> : vector<8xf32>
    %51 = vector.multi_reduction <add>, %50, %cst_33 [1] : vector<8x6xf32> to vector<8xf32>
    %52 = vector.shape_cast %51 : vector<8xf32> to vector<8x1xf32>
    %53 = vector.broadcast %52 : vector<8x1xf32> to vector<8x6xf32>
    %54 = arith.divf %50, %53 : vector<8x6xf32>
    %55 = vector.extract_strided_slice %54 {offsets = [0, 0], sizes = [8, 5], strides = [1, 1]} : vector<8x6xf32> to vector<8x5xf32>
    %cst_34 = arith.constant dense<0xFF800000> : vector<8xf32>
    %56 = vector.multi_reduction <maximumf>, %55, %cst_34 [1] : vector<8x5xf32> to vector<8xf32>
    %57 = vector.shape_cast %56 : vector<8xf32> to vector<8x1xf32>
    %58 = tpu.reduce_index %55 {axis = 1 : i32, kind = #tpu.reduction_kind<arg_max>} : vector<8x5xf32> -> vector<8xi32>
    %59 = vector.shape_cast %58 : vector<8xi32> to vector<8x1xi32>
    %c1000_i32 = arith.constant 1000 : i32
    %60 = vector.broadcast %c1000_i32 : i32 to vector<8x1xi32>
    %61 = arith.muli %59, %60 : vector<8x1xi32>
    %62 = arith.addi %61, %42 : vector<8x1xi32>
    %63 = vector.extract_strided_slice %40 {offsets = [0, 0], sizes = [8, 1024], strides = [1, 1]} : vector<16x1024xf32> to vector<8x1024xf32>
    %64 = arith.negf %63 : vector<8x1024xf32>
    %65 = math.exp %64 : vector<8x1024xf32>
    %cst_35 = arith.constant 1.000000e+00 : f32
    %66 = vector.broadcast %cst_35 : f32 to vector<8x1024xf32>
    %67 = arith.addf %66, %65 : vector<8x1024xf32>
    %68 = arith.divf %66, %67 : vector<8x1024xf32>
    %69 = vector.broadcast %57 : vector<8x1xf32> to vector<8x1024xf32>
    %70 = arith.mulf %69, %68 : vector<8x1024xf32>
    %71 = vector.extract_strided_slice %70 {offsets = [0, 0], sizes = [1, 1024], strides = [1, 1]} : vector<8x1024xf32> to vector<1x1024xf32>
    %72 = vector.extract_strided_slice %62 {offsets = [0, 0], sizes = [1, 1], strides = [1, 1]} : vector<8x1xi32> to vector<1x1xi32>
    %73 = vector.shape_cast %72 : vector<1x1xi32> to vector<1x1xi32>
    %74 = vector.broadcast %73 : vector<1x1xi32> to vector<1x1024xi32>
    %75 = vector.extract_strided_slice %70 {offsets = [1, 0], sizes = [1, 1024], strides = [1, 1]} : vector<8x1024xf32> to vector<1x1024xf32>
    %76 = arith.cmpf ogt, %75, %71 : vector<1x1024xf32>
    %77 = arith.select %76, %75, %71 : vector<1x1024xi1>, vector<1x1024xf32>
    %78 = vector.extract_strided_slice %62 {offsets = [1, 0], sizes = [1, 1], strides = [1, 1]} : vector<8x1xi32> to vector<1x1xi32>
    %79 = vector.shape_cast %78 : vector<1x1xi32> to vector<1x1xi32>
    %80 = vector.broadcast %79 : vector<1x1xi32> to vector<1x1024xi32>
    %81 = arith.select %76, %80, %74 : vector<1x1024xi1>, vector<1x1024xi32>
    %82 = vector.extract_strided_slice %70 {offsets = [2, 0], sizes = [1, 1024], strides = [1, 1]} : vector<8x1024xf32> to vector<1x1024xf32>
    %83 = arith.cmpf ogt, %82, %77 : vector<1x1024xf32>
    %84 = arith.select %83, %82, %77 : vector<1x1024xi1>, vector<1x1024xf32>
    %85 = vector.extract_strided_slice %62 {offsets = [2, 0], sizes = [1, 1], strides = [1, 1]} : vector<8x1xi32> to vector<1x1xi32>
    %86 = vector.shape_cast %85 : vector<1x1xi32> to vector<1x1xi32>
    %87 = vector.broadcast %86 : vector<1x1xi32> to vector<1x1024xi32>
    %88 = arith.select %83, %87, %81 : vector<1x1024xi1>, vector<1x1024xi32>
    %89 = vector.extract_strided_slice %70 {offsets = [3, 0], sizes = [1, 1024], strides = [1, 1]} : vector<8x1024xf32> to vector<1x1024xf32>
    %90 = arith.cmpf ogt, %89, %84 : vector<1x1024xf32>
    %91 = arith.select %90, %89, %84 : vector<1x1024xi1>, vector<1x1024xf32>
    %92 = vector.extract_strided_slice %62 {offsets = [3, 0], sizes = [1, 1], strides = [1, 1]} : vector<8x1xi32> to vector<1x1xi32>
    %93 = vector.shape_cast %92 : vector<1x1xi32> to vector<1x1xi32>
    %94 = vector.broadcast %93 : vector<1x1xi32> to vector<1x1024xi32>
    %95 = arith.select %90, %94, %88 : vector<1x1024xi1>, vector<1x1024xi32>
    %96 = vector.extract_strided_slice %70 {offsets = [4, 0], sizes = [1, 1024], strides = [1, 1]} : vector<8x1024xf32> to vector<1x1024xf32>
    %97 = arith.cmpf ogt, %96, %91 : vector<1x1024xf32>
    %98 = arith.select %97, %96, %91 : vector<1x1024xi1>, vector<1x1024xf32>
    %99 = vector.extract_strided_slice %62 {offsets = [4, 0], sizes = [1, 1], strides = [1, 1]} : vector<8x1xi32> to vector<1x1xi32>
    %100 = vector.shape_cast %99 : vector<1x1xi32> to vector<1x1xi32>
    %101 = vector.broadcast %100 : vector<1x1xi32> to vector<1x1024xi32>
    %102 = arith.select %97, %101, %95 : vector<1x1024xi1>, vector<1x1024xi32>
    %103 = vector.extract_strided_slice %70 {offsets = [5, 0], sizes = [1, 1024], strides = [1, 1]} : vector<8x1024xf32> to vector<1x1024xf32>
    %104 = arith.cmpf ogt, %103, %98 : vector<1x1024xf32>
    %105 = arith.select %104, %103, %98 : vector<1x1024xi1>, vector<1x1024xf32>
    %106 = vector.extract_strided_slice %62 {offsets = [5, 0], sizes = [1, 1], strides = [1, 1]} : vector<8x1xi32> to vector<1x1xi32>
    %107 = vector.shape_cast %106 : vector<1x1xi32> to vector<1x1xi32>
    %108 = vector.broadcast %107 : vector<1x1xi32> to vector<1x1024xi32>
    %109 = arith.select %104, %108, %102 : vector<1x1024xi1>, vector<1x1024xi32>
    %110 = vector.extract_strided_slice %70 {offsets = [6, 0], sizes = [1, 1024], strides = [1, 1]} : vector<8x1024xf32> to vector<1x1024xf32>
    %111 = arith.cmpf ogt, %110, %105 : vector<1x1024xf32>
    %112 = arith.select %111, %110, %105 : vector<1x1024xi1>, vector<1x1024xf32>
    %113 = vector.extract_strided_slice %62 {offsets = [6, 0], sizes = [1, 1], strides = [1, 1]} : vector<8x1xi32> to vector<1x1xi32>
    %114 = vector.shape_cast %113 : vector<1x1xi32> to vector<1x1xi32>
    %115 = vector.broadcast %114 : vector<1x1xi32> to vector<1x1024xi32>
    %116 = arith.select %111, %115, %109 : vector<1x1024xi1>, vector<1x1024xi32>
    %117 = vector.extract_strided_slice %70 {offsets = [7, 0], sizes = [1, 1024], strides = [1, 1]} : vector<8x1024xf32> to vector<1x1024xf32>
    %118 = arith.cmpf ogt, %117, %112 : vector<1x1024xf32>
    %119 = vector.extract_strided_slice %62 {offsets = [7, 0], sizes = [1, 1], strides = [1, 1]} : vector<8x1xi32> to vector<1x1xi32>
    %120 = vector.shape_cast %119 : vector<1x1xi32> to vector<1x1xi32>
    %121 = vector.broadcast %120 : vector<1x1xi32> to vector<1x1024xi32>
    %122 = arith.select %118, %121, %116 : vector<1x1024xi1>, vector<1x1024xi32>
    %123 = vector.extract_strided_slice %36 {offsets = [8, 0], sizes = [8, 6], strides = [1, 1]} : vector<16x6xf32> to vector<8x6xf32>
    %cst_36 = arith.constant dense<0xFF800000> : vector<8xf32>
    %124 = vector.multi_reduction <maximumf>, %123, %cst_36 [1] : vector<8x6xf32> to vector<8xf32>
    %cst_37 = arith.constant 0xFF800000 : f32
    %125 = vector.broadcast %cst_37 : f32 to vector<8xf32>
    %126 = arith.maximumf %125, %124 : vector<8xf32>
    %127 = vector.shape_cast %126 : vector<8xf32> to vector<8x1xf32>
    %128 = vector.broadcast %127 : vector<8x1xf32> to vector<8x6xf32>
    %129 = arith.subf %123, %128 : vector<8x6xf32>
    %130 = math.exp %129 : vector<8x6xf32>
    %cst_38 = arith.constant dense<0.000000e+00> : vector<8xf32>
    %131 = vector.multi_reduction <add>, %130, %cst_38 [1] : vector<8x6xf32> to vector<8xf32>
    %132 = vector.shape_cast %131 : vector<8xf32> to vector<8x1xf32>
    %133 = vector.broadcast %132 : vector<8x1xf32> to vector<8x6xf32>
    %134 = arith.divf %130, %133 : vector<8x6xf32>
    %135 = vector.extract_strided_slice %134 {offsets = [0, 0], sizes = [8, 5], strides = [1, 1]} : vector<8x6xf32> to vector<8x5xf32>
    %cst_39 = arith.constant dense<0xFF800000> : vector<8xf32>
    %136 = vector.multi_reduction <maximumf>, %135, %cst_39 [1] : vector<8x5xf32> to vector<8xf32>
    %137 = vector.shape_cast %136 : vector<8xf32> to vector<8x1xf32>
    %138 = tpu.reduce_index %135 {axis = 1 : i32, kind = #tpu.reduction_kind<arg_max>} : vector<8x5xf32> -> vector<8xi32>
    %139 = vector.shape_cast %138 : vector<8xi32> to vector<8x1xi32>
    %c1000_i32_40 = arith.constant 1000 : i32
    %140 = vector.broadcast %c1000_i32_40 : i32 to vector<8x1xi32>
    %141 = arith.muli %139, %140 : vector<8x1xi32>
    %142 = arith.addi %141, %42 : vector<8x1xi32>
    %143 = vector.extract_strided_slice %40 {offsets = [8, 0], sizes = [8, 1024], strides = [1, 1]} : vector<16x1024xf32> to vector<8x1024xf32>
    %144 = arith.negf %143 : vector<8x1024xf32>
    %145 = math.exp %144 : vector<8x1024xf32>
    %cst_41 = arith.constant 1.000000e+00 : f32
    %146 = vector.broadcast %cst_41 : f32 to vector<8x1024xf32>
    %147 = arith.addf %146, %145 : vector<8x1024xf32>
    %148 = arith.divf %146, %147 : vector<8x1024xf32>
    %149 = vector.broadcast %137 : vector<8x1xf32> to vector<8x1024xf32>
    %150 = arith.mulf %149, %148 : vector<8x1024xf32>
    %151 = vector.extract_strided_slice %150 {offsets = [0, 0], sizes = [1, 1024], strides = [1, 1]} : vector<8x1024xf32> to vector<1x1024xf32>
    %152 = vector.extract_strided_slice %142 {offsets = [0, 0], sizes = [1, 1], strides = [1, 1]} : vector<8x1xi32> to vector<1x1xi32>
    %153 = vector.shape_cast %152 : vector<1x1xi32> to vector<1x1xi32>
    %154 = vector.broadcast %153 : vector<1x1xi32> to vector<1x1024xi32>
    %155 = vector.extract_strided_slice %150 {offsets = [1, 0], sizes = [1, 1024], strides = [1, 1]} : vector<8x1024xf32> to vector<1x1024xf32>
    %156 = arith.cmpf ogt, %155, %151 : vector<1x1024xf32>
    %157 = arith.select %156, %155, %151 : vector<1x1024xi1>, vector<1x1024xf32>
    %158 = vector.extract_strided_slice %142 {offsets = [1, 0], sizes = [1, 1], strides = [1, 1]} : vector<8x1xi32> to vector<1x1xi32>
    %159 = vector.shape_cast %158 : vector<1x1xi32> to vector<1x1xi32>
    %160 = vector.broadcast %159 : vector<1x1xi32> to vector<1x1024xi32>
    %161 = arith.select %156, %160, %154 : vector<1x1024xi1>, vector<1x1024xi32>
    %162 = vector.extract_strided_slice %150 {offsets = [2, 0], sizes = [1, 1024], strides = [1, 1]} : vector<8x1024xf32> to vector<1x1024xf32>
    %163 = arith.cmpf ogt, %162, %157 : vector<1x1024xf32>
    %164 = arith.select %163, %162, %157 : vector<1x1024xi1>, vector<1x1024xf32>
    %165 = vector.extract_strided_slice %142 {offsets = [2, 0], sizes = [1, 1], strides = [1, 1]} : vector<8x1xi32> to vector<1x1xi32>
    %166 = vector.shape_cast %165 : vector<1x1xi32> to vector<1x1xi32>
    %167 = vector.broadcast %166 : vector<1x1xi32> to vector<1x1024xi32>
    %168 = arith.select %163, %167, %161 : vector<1x1024xi1>, vector<1x1024xi32>
    %169 = vector.extract_strided_slice %150 {offsets = [3, 0], sizes = [1, 1024], strides = [1, 1]} : vector<8x1024xf32> to vector<1x1024xf32>
    %170 = arith.cmpf ogt, %169, %164 : vector<1x1024xf32>
    %171 = arith.select %170, %169, %164 : vector<1x1024xi1>, vector<1x1024xf32>
    %172 = vector.extract_strided_slice %142 {offsets = [3, 0], sizes = [1, 1], strides = [1, 1]} : vector<8x1xi32> to vector<1x1xi32>
    %173 = vector.shape_cast %172 : vector<1x1xi32> to vector<1x1xi32>
    %174 = vector.broadcast %173 : vector<1x1xi32> to vector<1x1024xi32>
    %175 = arith.select %170, %174, %168 : vector<1x1024xi1>, vector<1x1024xi32>
    %176 = vector.extract_strided_slice %150 {offsets = [4, 0], sizes = [1, 1024], strides = [1, 1]} : vector<8x1024xf32> to vector<1x1024xf32>
    %177 = arith.cmpf ogt, %176, %171 : vector<1x1024xf32>
    %178 = arith.select %177, %176, %171 : vector<1x1024xi1>, vector<1x1024xf32>
    %179 = vector.extract_strided_slice %142 {offsets = [4, 0], sizes = [1, 1], strides = [1, 1]} : vector<8x1xi32> to vector<1x1xi32>
    %180 = vector.shape_cast %179 : vector<1x1xi32> to vector<1x1xi32>
    %181 = vector.broadcast %180 : vector<1x1xi32> to vector<1x1024xi32>
    %182 = arith.select %177, %181, %175 : vector<1x1024xi1>, vector<1x1024xi32>
    %183 = vector.extract_strided_slice %150 {offsets = [5, 0], sizes = [1, 1024], strides = [1, 1]} : vector<8x1024xf32> to vector<1x1024xf32>
    %184 = arith.cmpf ogt, %183, %178 : vector<1x1024xf32>
    %185 = arith.select %184, %183, %178 : vector<1x1024xi1>, vector<1x1024xf32>
    %186 = vector.extract_strided_slice %142 {offsets = [5, 0], sizes = [1, 1], strides = [1, 1]} : vector<8x1xi32> to vector<1x1xi32>
    %187 = vector.shape_cast %186 : vector<1x1xi32> to vector<1x1xi32>
    %188 = vector.broadcast %187 : vector<1x1xi32> to vector<1x1024xi32>
    %189 = arith.select %184, %188, %182 : vector<1x1024xi1>, vector<1x1024xi32>
    %190 = vector.extract_strided_slice %150 {offsets = [6, 0], sizes = [1, 1024], strides = [1, 1]} : vector<8x1024xf32> to vector<1x1024xf32>
    %191 = arith.cmpf ogt, %190, %185 : vector<1x1024xf32>
    %192 = arith.select %191, %190, %185 : vector<1x1024xi1>, vector<1x1024xf32>
    %193 = vector.extract_strided_slice %142 {offsets = [6, 0], sizes = [1, 1], strides = [1, 1]} : vector<8x1xi32> to vector<1x1xi32>
    %194 = vector.shape_cast %193 : vector<1x1xi32> to vector<1x1xi32>
    %195 = vector.broadcast %194 : vector<1x1xi32> to vector<1x1024xi32>
    %196 = arith.select %191, %195, %189 : vector<1x1024xi1>, vector<1x1024xi32>
    %197 = vector.extract_strided_slice %150 {offsets = [7, 0], sizes = [1, 1024], strides = [1, 1]} : vector<8x1024xf32> to vector<1x1024xf32>
    %198 = arith.cmpf ogt, %197, %192 : vector<1x1024xf32>
    %199 = vector.extract_strided_slice %142 {offsets = [7, 0], sizes = [1, 1], strides = [1, 1]} : vector<8x1xi32> to vector<1x1xi32>
    %200 = vector.shape_cast %199 : vector<1x1xi32> to vector<1x1xi32>
    %201 = vector.broadcast %200 : vector<1x1xi32> to vector<1x1024xi32>
    %202 = arith.select %198, %201, %196 : vector<1x1024xi1>, vector<1x1024xi32>
    %203 = tpu.concatenate %122, %202 in 0 : vector<1x1024xi32>, vector<1x1024xi32> -> vector<2x1024xi32>
    %c0_42 = arith.constant 0 : index
    %c0_43 = arith.constant 0 : index
    %204 = vector.load %arg10[%c0_42, %c0_43] : memref<2x1024xi32, #tpu.memory_space<vmem>>, vector<2x1024xi32>
    tpu.vector_store %arg10[%c0_42, %c0_43], %203 {strides = array<i32>} : memref<2x1024xi32, #tpu.memory_space<vmem>>, vector<2x1024xi32>,
    return
  }
  func.func @transform_0(%arg0: i32) -> (i32, i32) {
    %c0_i32 = arith.constant 0 : i32
    %c0_i32_0 = arith.constant 0 : i32
    %c0_i32_1 = arith.constant 0 : i32
    return %c0_i32, %c0_i32_0 : i32, i32
  }
  func.func @transform_1(%arg0: i32) -> (i32, i32) {
    %c0_i32 = arith.constant 0 : i32
    %c0_i32_0 = arith.constant 0 : i32
    %c0_i32_1 = arith.constant 0 : i32
    return %c0_i32, %c0_i32_0 : i32, i32
  }
  func.func @transform_2(%arg0: i32) -> (i32, i32) {
    %c0_i32 = arith.constant 0 : i32
    %c0_i32_0 = arith.constant 0 : i32
    %c0_i32_1 = arith.constant 0 : i32
    return %c0_i32, %c0_i32_0 : i32, i32
  }
  func.func @transform_3(%arg0: i32) -> (i32, i32) {
    %c0_i32 = arith.constant 0 : i32
    %c0_i32_0 = arith.constant 0 : i32
    %c0_i32_1 = arith.constant 0 : i32
    return %c0_i32, %c0_i32_0 : i32, i32
  }
  func.func @transform_4(%arg0: i32) -> (i32, i32) {
    %c0_i32 = arith.constant 0 : i32
    %c0_i32_0 = arith.constant 0 : i32
    %c0_i32_1 = arith.constant 0 : i32
    return %c0_i32, %c0_i32_0 : i32, i32
  }
  func.func @transform_5(%arg0: i32) -> (i32, i32) {
    %c0_i32 = arith.constant 0 : i32
    %c0_i32_0 = arith.constant 0 : i32
    %c0_i32_1 = arith.constant 0 : i32
    return %c0_i32, %c0_i32_0 : i32, i32
  }
  func.func @transform_7(%arg0: i32) -> (i32, i32) {
    %c0_i32 = arith.constant 0 : i32
    %c0_i32_0 = arith.constant 0 : i32
    %c0_i32_1 = arith.constant 0 : i32
    return %c0_i32, %c0_i32_0 : i32, i32
  }
  func.func @transform_8(%arg0: i32) -> (i32, i32) {
    %c0_i32 = arith.constant 0 : i32
    %c0_i32_0 = arith.constant 0 : i32
    %c0_i32_1 = arith.constant 0 : i32
    return %c0_i32, %c0_i32_0 : i32, i32
  }
  func.func @transform_9(%arg0: i32) -> (i32, i32) {
    %c0_i32 = arith.constant 0 : i32
    %c0_i32_0 = arith.constant 0 : i32
    %c0_i32_1 = arith.constant 0 : i32
    return %c0_i32, %c0_i32_0 : i32, i32
  }
}

</mosaic_0001>

<bundles_post_ra>
// kernel: tile.15
= control target key start
LH: loop header
LB: loop body
LE: loop exit
PB: predicated region body
PF: predicated region fallthrough
CT: control target
= control target key end

     0   :  { %s28_s0 = inlined_call_operand.vmem [shape: f32[3], index: 0, kind: input, shape index: {}]   ;;  %s29_s1 = inlined_call_operand.vmem [shape: f32[16,3], index: 1, kind: output, shape index: {}]  }
   0x1   :  { %v4_v0 = vld [vmem:[%s28_s0] ss:$0 sm:$0xff] }
   0x2   :  { %5 = vst [vmem:[%s29_s1] sm:$0xff] %v4_v0 }
   0x3   :  { %8 = vst [vmem:[%s29_s1 + $0x8] sm:$0xff] %v4_v0 }

// kernel: div.6
= control target key start
LH: loop header
LB: loop body
LE: loop exit
PB: predicated region body
PF: predicated region fallthrough
CT: control target
= control target key end

     0   :  { %s131_s10 = smov 45   ;;  %s132_s11 = smov 39   ;;  %vm3_vm0 = vcmask 23552   ;;  %vm9_vm1 = vcmask 392552   ;;  %vm15_vm2 = vcmask 367952   ;;  %vm21_vm3 = vcmask 343352   ;;  %s207_s0 = inlined_call_operand.vmem [shape: f32[16,3], index: 0, kind: input, shape index: {}]   ;;  %s208_s1 = inlined_call_operand.vmem [shape: f32[48], index: 1, kind: output, shape index: {}]  }
   0x1   :  { %v101_v0 = vld [vmem:[%s207_s0 + $0xf] sm:$0x1]   ;;  %v103_v1 = vld [vmem:[%s207_s0 + $0xd] sm:$0x1]   ;;  %v105_v2 = vld [vmem:[%s207_s0 + $0xb] sm:$0x1]  }
   0x2   :  { %7 = vrot.lane.b32.xlu0 %v101_v0, %s131_s10  ;;  %19 = vrot.lane.b32.xlu1 %v103_v1, %s132_s11  ;;  %s133_s14 = smov 33   ;;  %v102_v3 = vld [vmem:[%s207_s0 + $0xe] sm:$0x1]   ;;  %v104_v4 = vld [vmem:[%s207_s0 + $0xc] sm:$0x1]   ;;  %s134_s19 = smov 42  }
   0x3   :  { %31 = vrot.lane.b32.xlu2 %v105_v2, %s133_s14  ;;  %s135_s20 = smov 36   ;;  %v106_v5 = vld [vmem:[%s207_s0 + $0xa] sm:$0x1]   ;;  %s136_s23 = smov 30   ;;  %v107_v6 = vld [vmem:[%s207_s0 + $0x9] sm:$0x1]  }
   0x4   :  { %v108_v7 = vld [vmem:[%s207_s0 + $0x8] sm:$0x1]   ;;  %s137_s28 = smov 27   ;;  %s138_s29 = smov 24   ;;  %v109_v8 = vld [vmem:[%s207_s0 + $0x7] sm:$0x1]  }
   0x5   :  { %s139_s3 = smov 21   ;;  %v110_v9 = vld [vmem:[%s207_s0 + $0x6] sm:$0x1]   ;;  %v111_v10 = vld [vmem:[%s207_s0 + $0x5] sm:$0x1]   ;;  %s140_s8 = smov 18  }
   0x6   :  { %s141_s9 = smov 15   ;;  %v112_v11 = vld [vmem:[%s207_s0 + $0x4] sm:$0x1]   ;;  %s142_s12 = smov 12   ;;  %v113_v12 = vld [vmem:[%s207_s0 + $0x3] sm:$0x1]  }
   0x7   :  { %v114_v13 = vld [vmem:[%s207_s0 + $0x2] sm:$0x1]   ;;  %s143_s17 = smov 9   ;;  %s144_s18 = smov 6   ;;  %v115_v14 = vld [vmem:[%s207_s0 + $0x1] sm:$0x1]  }
   0x8   :  { %s145_s21 = smov 3   ;;  %v2_v15 = vld [vmem:[%s207_s0] sm:$0x1]   ;;  %vm27_vm4 = vcmask 318752   ;;  %vm33_vm5 = vcmask 294152   ;;  %vm39_vm6 = vcmask 269552  }
   0x9   :  { %4 = vst.msk [vmem:[#allocation0] sm:$0x1] %vm3_vm0, %v2_v15   ;;  %vm45_vm7 = vcmask 244952   ;;  %vm51_vm8 = vcmask 220352   ;;  %vm57_vm9 = vcmask 195752   ;;  %vm63_vm10 = vcmask 171152  }
   0xa   :  { %13 = vrot.lane.b32.xlu0 %v102_v3, %s134_s19  ;;  %25 = vrot.lane.b32.xlu1 %v104_v4, %s135_s20  ;;  %vm69_vm11 = vcmask 146552   ;;  %vm75_vm12 = vcmask 121952   ;;  %vm81_vm13 = vcmask 97352   ;;  %vm87_vm14 = vcmask 72752  }
   0xb   :  { %37 = vrot.lane.b32.xlu2 %v106_v5, %s136_s23  ;;  %vm93_vm15 = vcmask 48152  }
  0x12   :  { %43 = vrot.lane.b32.xlu0 %v107_v6, %s137_s28  ;;  %49 = vrot.lane.b32.xlu1 %v108_v7, %s138_s29 }
  0x13   :  { %55 = vrot.lane.b32.xlu2 %v109_v8, %s139_s3 }
  0x1a   :  { %61 = vrot.lane.b32.xlu0 %v110_v9, %s140_s8  ;;  %67 = vrot.lane.b32.xlu1 %v111_v10, %s141_s9 }
  0x1b   :  { %73 = vrot.lane.b32.xlu2 %v112_v11, %s142_s12 }
  0x22   :  { %79 = vrot.lane.b32.xlu0 %v113_v12, %s143_s17  ;;  %85 = vrot.lane.b32.xlu1 %v114_v13, %s144_s18 }
  0x23   :  { %91 = vrot.lane.b32.xlu2 %v115_v14, %s145_s21 }
  0x5d   :  { %v32_v16 = vpop.permute.xlu2 %31  }
  0x65   :  { %v38_v17 = vpop.permute.xlu2 %37  }
  0x6d   :  { %v56_v18 = vpop.permute.xlu2 %55  }
  0x74   :  { %v8_v19 = vpop.permute.xlu0 %7   ;;  %v20_v20 = vpop.permute.xlu1 %19  }
  0x75   :  { %10 = vst.msk [vmem:[#allocation0] sm:$0x1] %vm9_vm1, %v8_v19   ;;  %v74_v21 = vpop.permute.xlu2 %73  }
  0x7c   :  { %v14_v22 = vpop.permute.xlu0 %13   ;;  %v26_v23 = vpop.permute.xlu1 %25  }
  0x7d   :  { %16 = vst.msk [vmem:[#allocation0] sm:$0x1] %vm15_vm2, %v14_v22   ;;  %v92_v24 = vpop.permute.xlu2 %91  }
  0x7e   :  { %22 = vst.msk [vmem:[#allocation0] sm:$0x1] %vm21_vm3, %v20_v20  }
  0x7f   :  { %28 = vst.msk [vmem:[#allocation0] sm:$0x1] %vm27_vm4, %v26_v23  }
  0x80   :  { %34 = vst.msk [vmem:[#allocation0] sm:$0x1] %vm33_vm5, %v32_v16  }
  0x81   :  { %40 = vst.msk [vmem:[#allocation0] sm:$0x1] %vm39_vm6, %v38_v17  }
  0x84   :  { %v44_v25 = vpop.permute.xlu0 %43   ;;  %v50_v26 = vpop.permute.xlu1 %49  }
  0x85   :  { %46 = vst.msk [vmem:[#allocation0] sm:$0x1] %vm45_vm7, %v44_v25  }
  0x86   :  { %52 = vst.msk [vmem:[#allocation0] sm:$0x1] %vm51_vm8, %v50_v26  }
  0x87   :  { %58 = vst.msk [vmem:[#allocation0] sm:$0x1] %vm57_vm9, %v56_v18  }
  0x8c   :  { %v62_v27 = vpop.permute.xlu0 %61   ;;  %v68_v28 = vpop.permute.xlu1 %67  }
  0x8d   :  { %64 = vst.msk [vmem:[#allocation0] sm:$0x1] %vm63_vm10, %v62_v27  }
  0x8e   :  { %70 = vst.msk [vmem:[#allocation0] sm:$0x1] %vm69_vm11, %v68_v28  }
  0x8f   :  { %76 = vst.msk [vmem:[#allocation0] sm:$0x1] %vm75_vm12, %v74_v21  }
  0x94   :  { %v80_v29 = vpop.permute.xlu0 %79   ;;  %v86_v30 = vpop.permute.xlu1 %85  }
  0x95   :  { %82 = vst.msk [vmem:[#allocation0] sm:$0x1] %vm81_vm13, %v80_v29  }
  0x96   :  { %88 = vst.msk [vmem:[#allocation0] sm:$0x1] %vm87_vm14, %v86_v30  }
  0x97   :  { %94 = vst.msk [vmem:[#allocation0] sm:$0x1] %vm93_vm15, %v92_v24  }
  0x9e   :  { %v97_v31 = vld [vmem:[#allocation0] sm:$0x1] }
  0x9f   :  { %100 = vst [vmem:[%s208_s1] sm:$0x1] %v97_v31 }

// kernel: div.1
= control target key start
LH: loop header
LB: loop body
LE: loop exit
PB: predicated region body
PF: predicated region fallthrough
CT: control target
= control target key end

     0   :  { %s50_s0 = inlined_call_operand.vmem [shape: f32[48], index: 0, kind: input, shape index: {}]   ;;  %s51_s1 = inlined_call_operand.vmem [shape: f32[48], index: 1, kind: input, shape index: {}]   ;;  %s52_s2 = inlined_call_operand.vmem [shape: f32[48], index: 2, kind: output, shape index: {}]  }
   0x1   :  { %v4_v0 = vld [vmem:[%s51_s1] sm:$0x1] }
   0x2   :  { %24 = vrcp.f32 %v4_v0  ;;  %v18_v3 = vand.u32 2147483648, %v4_v0  ;;  %vm12_vm0 = vweird.f32 %v4_v0  ;;  %v16_v5 = vand.u32 2147483647, %v4_v0  ;;  %v3_v9 = vld [vmem:[%s50_s0] sm:$0x1] }
   0x4   :  { %v19_v7 = vor.u32 1.1754944e-38, %v18_v3  ;;  %vm17_vm3 = vcmp.eq.f32.partialorder %v16_v5, 8.507059e+37 }
   0x8   :  { %v25_v1 = vpop.eup %24 }
   0x9   :  { %v8_v2 = vmul.f32 %v25_v1, %v4_v0  ;;  %vm13_vm1 = vweird.f32 %v25_v1 }
   0xa   :  { %vm14_vm2 = vmor %vm12_vm0, %vm13_vm1 }
   0xb   :  { %v9_v4 = vsub.f32 1.0, %v8_v2 }
   0xd   :  { %v10_v6 = vmul.f32 %v25_v1, %v9_v4 }
   0xf   :  { %v11_v8 = vadd.f32 %v25_v1, %v10_v6 }
  0x11   :  { %v15_v10 = vsel %vm14_vm2, %v25_v1, %v11_v8 }
  0x12   :  { %v20_v11 = vsel %vm17_vm3, %v19_v7, %v15_v10 }
  0x13   :  { %v21_v12 = vmul.f32 %v20_v11, %v3_v9 }
  0x15   :  { %23 = vst [vmem:[%s52_s2] sm:$0x1] %v21_v12 }

// kernel: rtknet_forward.1
= control target key start
LH: loop header
LB: loop body
LE: loop exit
PB: predicated region body
PF: predicated region fallthrough
CT: control target
= control target key end

     0   :  { %s4756_s0 = inlined_call_operand.vmem [shape: f32[128,48], index: 0, kind: input, shape index: {}]   ;;  %s4757_s1 = inlined_call_operand.vmem [shape: f32[48,32], index: 1, kind: input, shape index: {}]   ;;  %s4758_s2 = inlined_call_operand.vmem [shape: f32[1,32], index: 2, kind: input, shape index: {}]   ;;  %s4759_s3 = inlined_call_operand.vmem [shape: f32[8,32], index: 3, kind: input, shape index: {}]   ;;  %s4760_s4 = inlined_call_operand.vmem [shape: f32[32,6], index: 4, kind: input, shape index: {}]   ;;  %s4761_s5 = inlined_call_operand.vmem [shape: f32[1,6], index: 5, kind: input, shape index: {}]   ;;  %s4762_s6 = inlined_call_operand.vmem [shape: bf16[64,1024], index: 6, kind: input, shape index: {}]   ;;  %s4763_s7 = inlined_call_operand.vmem [shape: f32[16,1024], index: 7, kind: output, shape index: {0}]   ;;  %s4764_s8 = inlined_call_operand.vmem [shape: f32[16,6], index: 8, kind: output, shape index: {1}]   ;;  %s4765_s9 = inlined_call_operand.vmem [shape: s32[2,1024], index: 9, kind: output, shape index: {2}]  }
   0x1   :  { %v38_v0 = vld [vmem:[%s4762_s6] sm:$0xff]  ;;  %v40_v1 = vld [vmem:[%s4762_s6 + $0x8] sm:$0xff]  ;;  %v42_v2 = vld [vmem:[%s4762_s6 + $0x10] sm:$0xff] }
   0x2   :  { %39 = vst [vmem:[#allocation2] sm:$0xff] %v38_v0  ;;  %v44_v3 = vld [vmem:[%s4762_s6 + $0x18] sm:$0xff]  ;;  %v46_v4 = vld [vmem:[%s4762_s6 + $0x20] sm:$0xff]  ;;  %v48_v5 = vld [vmem:[%s4762_s6 + $0x28] sm:$0xff] }
   0x3   :  { %41 = vst [vmem:[#allocation2 + $0x8] sm:$0xff] %v40_v1  ;;  %v50_v6 = vld [vmem:[%s4762_s6 + $0x30] sm:$0xff]  ;;  %v52_v7 = vld [vmem:[%s4762_s6 + $0x38] sm:$0xff]  ;;  %v54_v8 = vld [vmem:[%s4762_s6 + $0x40] sm:$0xff] }
   0x4   :  { %43 = vst [vmem:[#allocation2 + $0x10] sm:$0xff] %v42_v2  ;;  %v56_v9 = vld [vmem:[%s4762_s6 + $0x48] sm:$0xff]  ;;  %v58_v10 = vld [vmem:[%s4762_s6 + $0x50] sm:$0xff]  ;;  %v60_v11 = vld [vmem:[%s4762_s6 + $0x58] sm:$0xff] }
   0x5   :  { %45 = vst [vmem:[#allocation2 + $0x18] sm:$0xff] %v44_v3  ;;  %v62_v12 = vld [vmem:[%s4762_s6 + $0x60] sm:$0xff]  ;;  %v64_v13 = vld [vmem:[%s4762_s6 + $0x68] sm:$0xff]  ;;  %v66_v14 = vld [vmem:[%s4762_s6 + $0x70] sm:$0xff] }
   0x6   :  { %47 = vst [vmem:[#allocation2 + $0x20] sm:$0xff] %v46_v4  ;;  %v68_v15 = vld [vmem:[%s4762_s6 + $0x78] sm:$0xff]  ;;  %v70_v16 = vld [vmem:[%s4762_s6 + $0x80] sm:$0xff]  ;;  %v72_v17 = vld [vmem:[%s4762_s6 + $0x88] sm:$0xff] }
   0x7   :  { %49 = vst [vmem:[#allocation2 + $0x28] sm:$0xff] %v48_v5  ;;  %v74_v18 = vld [vmem:[%s4762_s6 + $0x90] sm:$0xff]  ;;  %v76_v19 = vld [vmem:[%s4762_s6 + $0x98] sm:$0xff]  ;;  %v78_v20 = vld [vmem:[%s4762_s6 + $0xa0] sm:$0xff] }
   0x8   :  { %51 = vst [vmem:[#allocation2 + $0x30] sm:$0xff] %v50_v6  ;;  %v80_v21 = vld [vmem:[%s4762_s6 + $0xa8] sm:$0xff]  ;;  %v82_v22 = vld [vmem:[%s4762_s6 + $0xb0] sm:$0xff]  ;;  %v84_v23 = vld [vmem:[%s4762_s6 + $0xb8] sm:$0xff] }
   0x9   :  { %53 = vst [vmem:[#allocation2 + $0x38] sm:$0xff] %v52_v7  ;;  %v86_v24 = vld [vmem:[%s4762_s6 + $0xc0] sm:$0xff]  ;;  %v88_v25 = vld [vmem:[%s4762_s6 + $0xc8] sm:$0xff]  ;;  %v90_v26 = vld [vmem:[%s4762_s6 + $0xd0] sm:$0xff] }
   0xa   :  { %55 = vst [vmem:[#allocation2 + $0x40] sm:$0xff] %v54_v8  ;;  %v92_v27 = vld [vmem:[%s4762_s6 + $0xd8] sm:$0xff]  ;;  %v94_v28 = vld [vmem:[%s4762_s6 + $0xe0] sm:$0xff]  ;;  %v96_v29 = vld [vmem:[%s4762_s6 + $0xe8] sm:$0xff] }
   0xb   :  { %57 = vst [vmem:[#allocation2 + $0x48] sm:$0xff] %v56_v9  ;;  %v98_v30 = vld [vmem:[%s4762_s6 + $0xf0] sm:$0xff]  ;;  %v100_v31 = vld [vmem:[%s4762_s6 + $0xf8] sm:$0xff] }
   0xc   :  { %59 = vst [vmem:[#allocation2 + $0x50] sm:$0xff] %v58_v10 }
   0xd   :  { %61 = vst [vmem:[#allocation2 + $0x58] sm:$0xff] %v60_v11 }
   0xe   :  { %63 = vst [vmem:[#allocation2 + $0x60] sm:$0xff] %v62_v12 }
   0xf   :  { %65 = vst [vmem:[#allocation2 + $0x68] sm:$0xff] %v64_v13 }
  0x10   :  { %67 = vst [vmem:[#allocation2 + $0x70] sm:$0xff] %v66_v14 }
  0x11   :  { %69 = vst [vmem:[#allocation2 + $0x78] sm:$0xff] %v68_v15 }
  0x12   :  { %71 = vst [vmem:[#allocation2 + $0x80] sm:$0xff] %v70_v16 }
  0x13   :  { %73 = vst [vmem:[#allocation2 + $0x88] sm:$0xff] %v72_v17 }
  0x14   :  { %75 = vst [vmem:[#allocation2 + $0x90] sm:$0xff] %v74_v18 }
  0x15   :  { %77 = vst [vmem:[#allocation2 + $0x98] sm:$0xff] %v76_v19 }
  0x16   :  { %79 = vst [vmem:[#allocation2 + $0xa0] sm:$0xff] %v78_v20 }
  0x17   :  { %81 = vst [vmem:[#allocation2 + $0xa8] sm:$0xff] %v80_v21 }
  0x18   :  { %83 = vst [vmem:[#allocation2 + $0xb0] sm:$0xff] %v82_v22 }
  0x19   :  { %85 = vst [vmem:[#allocation2 + $0xb8] sm:$0xff] %v84_v23 }
  0x1a   :  { %87 = vst [vmem:[#allocation2 + $0xc0] sm:$0xff] %v86_v24 }
  0x1b   :  { %89 = vst [vmem:[#allocation2 + $0xc8] sm:$0xff] %v88_v25 }
  0x1c   :  { %91 = vst [vmem:[#allocation2 + $0xd0] sm:$0xff] %v90_v26 }
  0x1d   :  { %93 = vst [vmem:[#allocation2 + $0xd8] sm:$0xff] %v92_v27 }
  0x1e   :  { %95 = vst [vmem:[#allocation2 + $0xe0] sm:$0xff] %v94_v28 }
  0x1f   :  { %97 = vst [vmem:[#allocation2 + $0xe8] sm:$0xff] %v96_v29 }
  0x20   :  { %99 = vst [vmem:[#allocation2 + $0xf0] sm:$0xff] %v98_v30 }
  0x21   :  { %101 = vst [vmem:[#allocation2 + $0xf8] sm:$0xff] %v100_v31 }
  0x22   :  { %107 = vsyncadd [#allocation3], 4096  ;;  %v129_v32 = vld [vmem:[%s4757_s1 + $0x28] sm:$0xff]  ;;  %v128_v33 = vld [vmem:[%s4757_s1 + $0x20] sm:$0xff]  ;;  %vm134_vm0 = vcmask 392192   ;;  %vm265_vm1 = vcmask 261120  }
  0x23   :  { %193 = vmatpush.msra.mxu0 %v129_v32  ;;  %2221 = vmatpush.msra.mxu3 %v129_v32  ;;  %v127_v34 = vld [vmem:[%s4757_s1 + $0x18] sm:$0xff]  ;;  %v126_v35 = vld [vmem:[%s4757_s1 + $0x10] sm:$0xff]  ;;  %v125_v36 = vld [vmem:[%s4757_s1 + $0x8] sm:$0xff]  ;;  %v2311_v28 = vmov 64.0   ;;  %vm464_vm3 = vcmask 48128  }
  0x24   :  { %2220 = vmatpush.msra.mxu2 %v129_v32  ;;  %v124_v37 = vld [vmem:[%s4757_s1] sm:$0xff]  ;;  %v109_v40 = vld [vmem:[%s4756_s0 + $0x8] sm:$0xff]  ;;  %v110_v42 = vld [vmem:[%s4756_s0 + $0x10] sm:$0xff]  ;;  %2235 = vrcp.f32 %v2311_v28 }
  0x25   :  { %194 = vmatpush.msra.mxu0 %v128_v33  ;;  %2223 = vmatpush.msra.mxu3 %v128_v33  ;;  %v108_v38 = vld [vmem:[%s4756_s0] sm:$0xff]  ;;  %v121_v41 = vld [vmem:[%s4756_s0 + $0x68] sm:$0xff]  ;;  %v122_v43 = vld [vmem:[%s4756_s0 + $0x70] sm:$0xff] }
  0x26   :  { %2222 = vmatpush.msra.mxu2 %v128_v33  ;;  %v120_v39 = vld [vmem:[%s4756_s0 + $0x60] sm:$0xff]  ;;  %v111_v44 = vld [vmem:[%s4756_s0 + $0x18] sm:$0xff]  ;;  %v113_v48 = vld [vmem:[%s4756_s0 + $0x28] sm:$0xff] }
  0x27   :  { %195 = vmatpush.msra.mxu0 %v127_v34  ;;  %2225 = vmatpush.msra.mxu3 %v127_v34  ;;  %v123_v45 = vld [vmem:[%s4756_s0 + $0x78] sm:$0xff]  ;;  %v112_v46 = vld [vmem:[%s4756_s0 + $0x20] sm:$0xff]  ;;  %v114_v49 = vld [vmem:[%s4756_s0 + $0x30] sm:$0xff] }
  0x28   :  { %2224 = vmatpush.msra.mxu2 %v127_v34  ;;  %v119_v47 = vld [vmem:[%s4756_s0 + $0x58] sm:$0xff]  ;;  %v116_v51 = vld [vmem:[%s4756_s0 + $0x40] sm:$0xff]  ;;  %v117_v52 = vld [vmem:[%s4756_s0 + $0x48] sm:$0xff] }
  0x29   :  { %196 = vmatpush.msra.mxu0 %v126_v35  ;;  %2227 = vmatpush.msra.mxu3 %v126_v35  ;;  %v115_v50 = vld [vmem:[%s4756_s0 + $0x38] sm:$0xff]  ;;  %v118_v53 = vld [vmem:[%s4756_s0 + $0x50] sm:$0xff]  ;;  %v2543_v61 = vld [vmem:[%s4758_s2] ss:$0 sm:$0xff] }
  0x2a   :  { %2226 = vmatpush.msra.mxu2 %v126_v35  ;;  %v346_v10 = vld [vmem:[%s4760_s4 + $0x18] sm:$0xff]  ;;  %v345_v12 = vld [vmem:[%s4760_s4 + $0x10] sm:$0xff]  ;;  %v344_v18 = vld [vmem:[%s4760_s4 + $0x8] sm:$0xff] }
  0x2b   :  { %197 = vmatpush.msra.mxu0 %v125_v36  ;;  %2229 = vmatpush.msra.mxu3 %v125_v36  ;;  %v343_v22 = vld [vmem:[%s4760_s4] sm:$0xff] }
  0x2c   :  { %2228 = vmatpush.msra.mxu2 %v125_v36 }
  0x2d   :  { %198 = vmatpush.msra.mxu0 %v124_v37  ;;  %2231 = vmatpush.msra.mxu3 %v124_v37 }
  0x2e   :  { %1999 = vmatmul.msk.f32.vlgmr.msra.gmra.mxu0 %vm134_vm0, %v108_v38  ;;  %2011 = vmatmul.msk.f32.vlgmr.msra.gmra.mxu3 %vm134_vm0, %v120_v39  ;;  %v2236_v39 = vpop.eup %2235 }
  0x2f   :  { %2230 = vmatpush.msra.mxu2 %v124_v37  ;;  %vm339_vm2 = vweird.f32 %v2236_v39 }
  0x30   :  { %2010 = vmatmul.msk.f32.vlgmr.msra.gmra.mxu2 %vm134_vm0, %v119_v47 }
  0x31   :  { %366 = vmatpush.msrb.mxu2 %v346_v10 }
  0x33   :  { %367 = vmatpush.msrb.mxu2 %v345_v12 }
  0x35   :  { %368 = vmatpush.msrb.mxu2 %v344_v18 }
  0x36   :  { %2000 = vmatmul.msk.f32.gmra.mxu0 %vm134_vm0, %v109_v40  ;;  %2012 = vmatmul.msk.f32.gmra.mxu3 %vm134_vm0, %v121_v41 }
  0x37   :  { %369 = vmatpush.msrb.mxu2 %v343_v22 }
  0x39   :  { %456 = vmatpush.msra.mxu2 %v346_v10 }
  0x3b   :  { %457 = vmatpush.msra.mxu2 %v345_v12 }
  0x3d   :  { %458 = vmatpush.msra.mxu2 %v344_v18 }
  0x3e   :  { %2001 = vmatmul.msk.f32.gmra.mxu0 %vm134_vm0, %v110_v42  ;;  %2013 = vmatmul.msk.f32.gmra.mxu3 %vm134_vm0, %v122_v43 }
  0x3f   :  { %459 = vmatpush.msra.mxu2 %v343_v22 }
  0x46   :  { %2002 = vmatmul.msk.f32.gmra.mxu0 %vm134_vm0, %v111_v44  ;;  %2014 = vmatmul.msk.f32.gmra.mxu3 %vm134_vm0, %v123_v45 }
  0x4e   :  { %2003 = vmatmul.msk.f32.gmra.mxu0 %vm134_vm0, %v112_v46  ;;  %v335_v46 = vmul.f32 64.0, %v2236_v39 }
  0x56   :  { %2004 = vmatmul.msk.f32.gmra.mxu0 %vm134_vm0, %v113_v48 }
  0x5e   :  { %2005 = vmatmul.msk.f32.gmra.mxu0 %vm134_vm0, %v114_v49 }
  0x66   :  { %2006 = vmatmul.msk.f32.gmra.mxu0 %vm134_vm0, %v115_v50 }
  0x6e   :  { %2007 = vmatmul.msk.f32.gmra.mxu0 %vm134_vm0, %v116_v51  ;;  %v336_v51 = vsub.f32 1.0, %v335_v46 }
  0x76   :  { %2008 = vmatmul.msk.f32.gmra.mxu0 %vm134_vm0, %v117_v52 }
  0x7e   :  { %2009 = vmatmul.msk.f32.gmra.mxu0 %vm134_vm0, %v118_v53 }
  0xab   :  { %v200_v54 = vpop.f32.mrf.mxu0 }
  0xac   :  { %v2570_v8 = vadd.f32 %v2543_v61, %v200_v54 }
  0xae   :  { %v248_v16 = vmax.f32 %v2570_v8, 0.0 }
  0xb0   :  { %v313_v29 = vsel %vm265_vm1, %v248_v16, 0.0 }
  0xb1   :  { %v236_v55 = vpop.f32.mrf.mxu3 }
  0xb2   :  { %v2563_v6 = vadd.f32 %v2543_v61, %v236_v55  ;;  %v337_v55 = vmul.f32 %v2236_v39, %v336_v51 }
  0xb3   :  { %v203_v56 = vpop.f32.mrf.mxu0  ;;  %v233_v17 = vpop.f32.mrf.mxu2 }
  0xb4   :  { %v2560_v5 = vadd.f32 %v2543_v61, %v203_v56  ;;  %v260_v14 = vmax.f32 %v2563_v6, 0.0  ;;  %v2596_v21 = vadd.f32 %v2543_v61, %v233_v17 }
  0xb6   :  { %v249_v13 = vmax.f32 %v2560_v5, 0.0  ;;  %v259_v26 = vmax.f32 %v2596_v21, 0.0 }
  0xb8   :  { %v314_v23 = vsel %vm265_vm1, %v249_v13, 0.0 }
  0xb9   :  { %v239_v57 = vpop.f32.mrf.mxu3  ;;  %v315_v33 = vadd.f32 %v314_v23, %v313_v29 }
  0xba   :  { %v2553_v3 = vadd.f32 %v2543_v61, %v239_v57 }
  0xbb   :  { %v206_v58 = vpop.f32.mrf.mxu0 }
  0xbc   :  { %v261_v7 = vmax.f32 %v2553_v3, 0.0  ;;  %v2576_v11 = vadd.f32 %v2543_v61, %v206_v58  ;;  %v338_v58 = vadd.f32 %v2236_v39, %v337_v55 }
  0xbe   :  { %v250_v19 = vmax.f32 %v2576_v11, 0.0  ;;  %v427_v5 = vsel %vm265_vm1, %v261_v7, 0.0 }
  0xc0   :  { %v316_v30 = vsel %vm265_vm1, %v250_v19, 0.0 }
  0xc1   :  { %v242_v59 = vpop.f32.mrf.mxu3  ;;  %v317_v36 = vadd.f32 %v316_v30, %v315_v33 }
  0xc2   :  { %v2546_v63 = vadd.f32 %v2543_v61, %v242_v59 }
  0xc3   :  { %v209_v60 = vpop.f32.mrf.mxu0 }
  0xc4   :  { %v262_v4 = vmax.f32 %v2546_v63, 0.0  ;;  %v2584_v15 = vadd.f32 %v2543_v61, %v209_v60 }
  0xc6   :  { %v251_v24 = vmax.f32 %v2584_v15, 0.0  ;;  %v264_v15 = vld [vmem:[%s4759_s3] sm:$0xff]  ;;  %v429_v6 = vsel %vm265_vm1, %v262_v4, 0.0 }
  0xc8   :  { %v318_v34 = vsel %vm265_vm1, %v251_v24, 0.0 }
  0xc9   :  { %v245_v62 = vpop.f32.mrf.mxu3  ;;  %v319_v40 = vadd.f32 %v318_v34, %v317_v36 }
  0xca   :  { %v2549_v0 = vadd.f32 %v2543_v61, %v245_v62 }
  0xcb   :  { %v212_v1 = vpop.f32.mrf.mxu0 }
  0xcc   :  { %v263_v2 = vmax.f32 %v2549_v0, 0.0  ;;  %v213_v20 = vadd.f32 %v2543_v61, %v212_v1 }
  0xce   :  { %2025 = vmatpush.xpose.msk.msrb.mxu3 %vm265_vm1, %v263_v2  ;;  %v252_v31 = vmax.f32 %v213_v20, 0.0  ;;  %v431_v8 = vsel %vm265_vm1, %v263_v2, 0.0 }
  0xd0   :  { %v320_v37 = vsel %vm265_vm1, %v252_v31, 0.0 }
  0xd1   :  { %v321_v42 = vadd.f32 %v320_v37, %v319_v40 }
  0xd2   :  { %2026 = vmatpush.xpose.msk.msrb.mxu3 %vm265_vm1, %v262_v4  ;;  %v2234_v4 = vld [vmem:[%s4761_s5] ss:$0 sm:$0xff] }
  0xd3   :  { %v215_v9 = vpop.f32.mrf.mxu0 }
  0xd4   :  { %v216_v25 = vadd.f32 %v2543_v61, %v215_v9  ;;  %v340_v9 = vsel %vm339_vm2, %v2236_v39, %v338_v58 }
  0xd6   :  { %2027 = vmatpush.xpose.msk.msrb.mxu3 %vm265_vm1, %v261_v7  ;;  %v253_v35 = vmax.f32 %v216_v25, 0.0 }
  0xd8   :  { %v322_v41 = vsel %vm265_vm1, %v253_v35, 0.0 }
  0xd9   :  { %v323_v47 = vadd.f32 %v322_v41, %v321_v42 }
  0xda   :  { %2028 = vmatpush.xpose.msk.msrb.mxu3 %vm265_vm1, %v260_v14 }
  0xdb   :  { %v218_v27 = vpop.f32.mrf.mxu0 }
  0xdc   :  { %v219_v32 = vadd.f32 %v2543_v61, %v218_v27 }
  0xde   :  { %2029 = vmatpush.xpose.msk.msrb.mxu3 %vm265_vm1, %v259_v26  ;;  %v254_v38 = vmax.f32 %v219_v32, 0.0 }
  0xe0   :  { %v324_v44 = vsel %vm265_vm1, %v254_v38, 0.0 }
  0xe1   :  { %v325_v49 = vadd.f32 %v324_v44, %v323_v47 }
  0xe3   :  { %v221_v43 = vpop.f32.mrf.mxu0 }
  0xe4   :  { %v222_v45 = vadd.f32 %v2543_v61, %v221_v43 }
  0xe6   :  { %v255_v48 = vmax.f32 %v222_v45, 0.0 }
  0xe8   :  { %v326_v50 = vsel %vm265_vm1, %v255_v48, 0.0  ;;  %2015 = vmatpush.xpose.msk.msra.mxu1 %vm265_vm1, %v255_v48 }
  0xe9   :  { %v327_v52 = vadd.f32 %v326_v50, %v325_v49 }
  0xeb   :  { %v328_v53 = vrot.slane %v327_v52, 4  ;;  %v224_v54 = vpop.f32.mrf.mxu0 }
  0xec   :  { %2016 = vmatpush.xpose.msk.msra.mxu1 %vm265_vm1, %v254_v38  ;;  %v225_v12 = vadd.f32 %v2543_v61, %v224_v54 }
  0xed   :  { %v329_v56 = vadd.f32 %v328_v53, %v327_v52 }
  0xee   :  { %v256_v22 = vmax.f32 %v225_v12, 0.0 }
  0xef   :  { %v330_v57 = vrot.slane %v329_v56, 2 }
  0xf0   :  { %2017 = vmatpush.xpose.msk.msra.mxu1 %vm265_vm1, %v253_v35  ;;  %v418_v28 = vsel %vm265_vm1, %v256_v22, 0.0 }
  0xf1   :  { %v331_v59 = vadd.f32 %v330_v57, %v329_v56 }
  0xf3   :  { %v332_v60 = vrot.slane %v331_v59, 1  ;;  %v227_v62 = vpop.f32.mrf.mxu0 }
  0xf4   :  { %v228_v1 = vadd.f32 %v2543_v61, %v227_v62  ;;  %2018 = vmatpush.xpose.msk.msra.mxu1 %vm265_vm1, %v252_v31 }
  0xf5   :  { %v333_v10 = vadd.f32 %v332_v60, %v331_v59 }
  0xf6   :  { %v257_v18 = vmax.f32 %v228_v1, 0.0 }
  0xf7   :  { %v341_v17 = vmul.f32 %v340_v9, %v333_v10 }
  0xf8   :  { %2019 = vmatpush.xpose.msk.msra.mxu1 %vm265_vm1, %v251_v24  ;;  %v419_v25 = vsel %vm265_vm1, %v257_v18, 0.0  ;;  %v423_v24 = vsel %vm265_vm1, %v259_v26, 0.0 }
  0xf9   :  { %v342_v20 = vadd.f32 %v341_v17, %v264_v15  ;;  %v420_v30 = vadd.f32 %v419_v25, %v418_v28 }
  0xfb   :  { %v230_v23 = vpop.f32.mrf.mxu0  ;;  %2024 = vmatmul.msk.f32.vlgmr.msrb.gmra.mxu2 %vm265_vm1, %v342_v20 }
  0xfc   :  { %v231_v27 = vadd.f32 %v2543_v61, %v230_v23  ;;  %2020 = vmatpush.xpose.msk.msra.mxu1 %vm265_vm1, %v250_v19  ;;  %v425_v19 = vsel %vm265_vm1, %v260_v14, 0.0 }
  0xfe   :  { %v258_v29 = vmax.f32 %v231_v27, 0.0 }
 0x100   :  { %v421_v31 = vsel %vm265_vm1, %v258_v29, 0.0  ;;  %2021 = vmatpush.xpose.msk.msra.mxu1 %vm265_vm1, %v249_v13  ;;  %2030 = vmatpush.xpose.msk.msrb.mxu3 %vm265_vm1, %v258_v29 }
 0x101   :  { %v422_v61 = vadd.f32 %v421_v31, %v420_v30 }
 0x103   :  { %v424_v11 = vadd.f32 %v423_v24, %v422_v61 }
 0x104   :  { %2022 = vmatpush.xpose.msk.msra.mxu1 %vm265_vm1, %v248_v16  ;;  %2031 = vmatpush.xpose.msk.msrb.mxu3 %vm265_vm1, %v257_v18 }
 0x105   :  { %v426_v21 = vadd.f32 %v425_v19, %v424_v11 }
 0x107   :  { %v428_v13 = vadd.f32 %v427_v5, %v426_v21  ;;  %2023 = vmatmul.msk.f32.vlgmr.msra.gmra.mxu1 %vm265_vm1, %v264_v15 }
 0x108   :  { %2032 = vmatpush.xpose.msk.msrb.mxu3 %vm265_vm1, %v256_v22 }
 0x109   :  { %v430_v14 = vadd.f32 %v429_v6, %v428_v13 }
 0x10b   :  { %v432_v16 = vadd.f32 %v431_v8, %v430_v14  ;;  %2033 = vmatmul.msk.f32.vlgmr.msrb.gmra.mxu3 %vm265_vm1, %v264_v15 }
 0x10d   :  { %v433_v3 = vrot.slane %v432_v16, 4 }
 0x10f   :  { %v434_v26 = vadd.f32 %v433_v3, %v432_v16 }
 0x111   :  { %v435_v7 = vrot.slane %v434_v26, 2 }
 0x113   :  { %v436_v32 = vadd.f32 %v435_v7, %v434_v26 }
 0x115   :  { %v437_v33 = vrot.slane %v436_v32, 1 }
 0x117   :  { %v438_v34 = vadd.f32 %v437_v33, %v436_v32 }
 0x119   :  { %v439_v35 = vmul.f32 %v438_v34, %v340_v9 }
 0x11b   :  { %v440_v63 = vadd.f32 %v439_v35, %v264_v15 }
 0x11d   :  { %2034 = vmatmul.msk.f32.vlgmr.msra.gmra.mxu2 %vm265_vm1, %v440_v63 }
 0x17e   :  { %v371_v0 = vpop.f32.mrf.mxu2 }
 0x17f   :  { %v2674_v2 = vadd.f32 %v2234_v4, %v371_v0 }
 0x181   :  { %465 = vst.msk [vmem:[%s4764_s8] sm:$0xff] %vm464_vm3, %v2674_v2  ;;  %v798_v40 = vsel %vm464_vm3, %v2674_v2, -inf }
 0x184   :  { %v2681_v36 = vpop.f32.mrf.mxu1 }
 0x18e   :  { %v2683_v37 = vpop.f32.mrf.mxu3 }
 0x1a0   :  { %v461_v38 = vpop.f32.mrf.mxu2 }
 0x1a1   :  { %v2685_v39 = vadd.f32 %v2234_v4, %v461_v38 }
 0x1a3   :  { %466 = vst.msk [vmem:[%s4764_s8 + $0x8] sm:$0xff] %vm464_vm3, %v2685_v39 }
 0x1a4   :  { %2309 = dma.done.wait [#allocation3], 4096 }
 0x1a5   :  { %2310 = vsyncadd [#allocation3], 4294963200  ;;  %799 = vmax.xlane.f32.xlu0 %v798_v40  ;;  %v1367_v41 = vsel %vm464_vm3, %v2685_v39, -inf  ;;  %v2133_v42 = vld [vmem:[#allocation2 + $0xc0] sm:$0xf]  ;;  %v2699_v16 = vpack.c.bf16 %v2683_v37, %v2681_v36  ;;  %vm664_vm4 = vcmask 523264  }
 0x1a6   :  { %v2216_v43 = vld [vmem:[#allocation2 + $0xdc] sm:$0xf0]  ;;  %v2212_v47 = vld [vmem:[#allocation2 + $0xc4] sm:$0xf]  ;;  %v2213_v58 = vld [vmem:[#allocation2 + $0xcc] sm:$0xf] }
 0x1a7   :  { %v2101_v44 = vld [vmem:[#allocation2 + $0x80] sm:$0xf]  ;;  %v2134_v45 = vor.u32 %v2216_v43, %v2133_v42  ;;  %v2135_v48 = vld [vmem:[#allocation2 + $0xe0] sm:$0xf0]  ;;  %v2143_v59 = vld [vmem:[#allocation2 + $0xe8] sm:$0xf0] }
 0x1a8   :  { %v2208_v46 = vld [vmem:[#allocation2 + $0x9c] sm:$0xf0]  ;;  %v2138_v49 = vor.u32 %v2212_v47, %v2135_v48  ;;  %v2204_v50 = vld [vmem:[#allocation2 + $0x84] sm:$0xf]  ;;  %v2146_v9 = vor.u32 %v2213_v58, %v2143_v59  ;;  %v2205_v10 = vld [vmem:[#allocation2 + $0x8c] sm:$0xf] }
 0x1a9   :  { %672 = vmatpush.bf16.msrb.mxu2 %v2134_v45  ;;  %v2102_v51 = vor.u32 %v2208_v46, %v2101_v44  ;;  %v2103_v52 = vld [vmem:[#allocation2 + $0xa0] sm:$0xf0]  ;;  %v2069_v53 = vld [vmem:[#allocation2 + $0x40] sm:$0xf]  ;;  %v2141_v15 = vld [vmem:[#allocation2 + $0xc8] sm:$0xf] }
 0x1aa   :  { %686 = vmatpush.bf16.msrb.mxu1 %v2138_v49  ;;  %v2200_v54 = vld [vmem:[#allocation2 + $0x5c] sm:$0xf0]  ;;  %v2106_v55 = vor.u32 %v2204_v50, %v2103_v52  ;;  %v2196_v56 = vld [vmem:[#allocation2 + $0x44] sm:$0xf]  ;;  %v2217_v17 = vld [vmem:[#allocation2 + $0xe4] sm:$0xf0]  ;;  %714 = vmatpush.bf16.msra.mxu3 %v2146_v9 }
 0x1ab   :  { %v2071_v57 = vld [vmem:[#allocation2 + $0x60] sm:$0xf0]  ;;  %v2070_v60 = vor.u32 %v2200_v54, %v2069_v53  ;;  %v2037_v62 = vld [vmem:[#allocation2] sm:$0xf]  ;;  %v2111_v18 = vld [vmem:[#allocation2 + $0xa8] sm:$0xf0]  ;;  %v2142_v61 = vor.u32 %v2217_v17, %v2141_v15 }
 0x1ac   :  { %v2192_v1 = vld [vmem:[#allocation2 + $0x1c] sm:$0xf0]  ;;  %v2074_v12 = vor.u32 %v2196_v56, %v2071_v57  ;;  %v2188_v20 = vld [vmem:[#allocation2 + $0x4] sm:$0xf]  ;;  %v2114_v23 = vor.u32 %v2205_v10, %v2111_v18  ;;  %v2149_v25 = vld [vmem:[#allocation2 + $0xd0] sm:$0xf] }
 0x1ad   :  { %1368 = vmax.xlane.f32.xlu0 %v1367_v41  ;;  %673 = vmatpush.bf16.msrb.mxu2 %v2102_v51  ;;  %v2039_v22 = vld [vmem:[#allocation2 + $0x20] sm:$0xf0]  ;;  %v2218_v27 = vld [vmem:[#allocation2 + $0xec] sm:$0xf0]  ;;  %v2197_v28 = vld [vmem:[#allocation2 + $0x4c] sm:$0xf]  ;;  %v2038_v24 = vor.u32 %v2192_v1, %v2037_v62 }
 0x1ae   :  { %687 = vmatpush.bf16.msrb.mxu1 %v2106_v55  ;;  %v2079_v29 = vld [vmem:[#allocation2 + $0x68] sm:$0xf0]  ;;  %v2042_v11 = vor.u32 %v2188_v20, %v2039_v22  ;;  %v2109_v19 = vld [vmem:[#allocation2 + $0x88] sm:$0xf]  ;;  %715 = vmatpush.bf16.msra.mxu3 %v2114_v23  ;;  %v2150_v5 = vor.u32 %v2218_v27, %v2149_v25  ;;  %v2117_v6 = vld [vmem:[#allocation2 + $0x90] sm:$0xf] }
 0x1af   :  { %v2209_v21 = vld [vmem:[#allocation2 + $0xa4] sm:$0xf0]  ;;  %v2082_v13 = vor.u32 %v2197_v28, %v2079_v29  ;;  %v2210_v14 = vld [vmem:[#allocation2 + $0xac] sm:$0xf0]  ;;  %v2189_v3 = vld [vmem:[#allocation2 + $0xc] sm:$0xf] }
 0x1b0   :  { %v2047_v26 = vld [vmem:[#allocation2 + $0x28] sm:$0xf0]  ;;  %v2157_v7 = vld [vmem:[#allocation2 + $0xd8] sm:$0xf]  ;;  %v2110_v33 = vor.u32 %v2209_v21, %v2109_v19  ;;  %v2077_v34 = vld [vmem:[#allocation2 + $0x48] sm:$0xf]  ;;  %v2118_v63 = vor.u32 %v2210_v14, %v2117_v6 }
 0x1b1   :  { %674 = vmatpush.bf16.msrb.mxu2 %v2070_v60  ;;  %v2219_v32 = vld [vmem:[#allocation2 + $0xf4] sm:$0xf0]  ;;  %v2201_v35 = vld [vmem:[#allocation2 + $0x64] sm:$0xf0]  ;;  %v2050_v4 = vor.u32 %v2189_v3, %v2047_v26  ;;  %v2085_v0 = vld [vmem:[#allocation2 + $0x50] sm:$0xf] }
 0x1b2   :  { %688 = vmatpush.bf16.msrb.mxu1 %v2074_v12  ;;  %716 = vmatpush.bf16.msra.mxu3 %v2082_v13  ;;  %v2158_v36 = vor.u32 %v2219_v32, %v2157_v7  ;;  %v2125_v38 = vld [vmem:[#allocation2 + $0x98] sm:$0xf]  ;;  %v2078_v42 = vor.u32 %v2201_v35, %v2077_v34  ;;  %v2045_v43 = vld [vmem:[#allocation2 + $0x8] sm:$0xf]  ;;  %v2214_v45 = vld [vmem:[#allocation2 + $0xd4] sm:$0xf] }
 0x1b3   :  { %v2211_v40 = vld [vmem:[#allocation2 + $0xb4] sm:$0xf0]  ;;  %v2193_v44 = vld [vmem:[#allocation2 + $0x24] sm:$0xf0]  ;;  %v2151_v47 = vld [vmem:[#allocation2 + $0xf0] sm:$0xf0] }
 0x1b4   :  { %v2053_v48 = vld [vmem:[#allocation2 + $0x10] sm:$0xf]  ;;  %v2126_v52 = vor.u32 %v2211_v40, %v2125_v38  ;;  %v2215_v53 = vld [vmem:[#allocation2 + $0xdc] sm:$0xf]  ;;  %v2093_v55 = vld [vmem:[#allocation2 + $0x58] sm:$0xf]  ;;  %v2046_v57 = vor.u32 %v2193_v44, %v2045_v43  ;;  %v2154_v58 = vor.u32 %v2214_v45, %v2151_v47 }
 0x1b5   :  { %675 = vmatpush.bf16.msrb.mxu2 %v2038_v24  ;;  %v2194_v49 = vld [vmem:[#allocation2 + $0x2c] sm:$0xf0]  ;;  %v2159_v54 = vld [vmem:[#allocation2 + $0xf8] sm:$0xf0]  ;;  %v2203_v56 = vld [vmem:[#allocation2 + $0x74] sm:$0xf0] }
 0x1b6   :  { %689 = vmatpush.bf16.msrb.mxu1 %v2042_v11  ;;  %717 = vmatpush.bf16.msra.mxu3 %v2050_v4  ;;  %v2054_v59 = vor.u32 %v2194_v49, %v2053_v48  ;;  %v2206_v60 = vld [vmem:[#allocation2 + $0x94] sm:$0xf]  ;;  %v2162_v1 = vor.u32 %v2215_v53, %v2159_v54  ;;  %v2094_v9 = vor.u32 %v2203_v56, %v2093_v55  ;;  %v2207_v10 = vld [vmem:[#allocation2 + $0x9c] sm:$0xf]  ;;  %v2061_v15 = vld [vmem:[#allocation2 + $0x18] sm:$0xf] }
 0x1b7   :  { %v2119_v62 = vld [vmem:[#allocation2 + $0xb0] sm:$0xf0]  ;;  %v2127_v12 = vld [vmem:[#allocation2 + $0xb8] sm:$0xf0]  ;;  %v2195_v17 = vld [vmem:[#allocation2 + $0x34] sm:$0xf0] }
 0x1b8   :  { %2163 = vmatmul.msk.bf16.vlgmr.msrb.gmra.mxu2 %vm664_vm4, %v2699_v16  ;;  %v2122_v18 = vor.u32 %v2206_v60, %v2119_v62  ;;  %v2198_v22 = vld [vmem:[#allocation2 + $0x54] sm:$0xf]  ;;  %v2130_v25 = vor.u32 %v2207_v10, %v2127_v12  ;;  %v2062_v28 = vor.u32 %v2195_v17, %v2061_v15  ;;  %v2199_v29 = vld [vmem:[#allocation2 + $0x5c] sm:$0xf]  ;;  %vm822_vm9 = vcmask 39936  }
 0x1b9   :  { %700 = vmatpush.bf16.msra.mxu2 %v2142_v61  ;;  %2164 = vmatmul.msk.bf16.vlgmr.msrb.gmra.mxu1 %vm664_vm4, %v2699_v16  ;;  %v2087_v23 = vld [vmem:[#allocation2 + $0x70] sm:$0xf0]  ;;  %v2191_v19 = vld [vmem:[#allocation2 + $0x1c] sm:$0xf] }
 0x1ba   :  { %728 = vmatpush.bf16.msra.mxu1 %v2150_v5  ;;  %756 = vmatpush.bf16.msrb.mxu3 %v2158_v36  ;;  %v2090_v24 = vor.u32 %v2198_v22, %v2087_v23  ;;  %v2055_v61 = vld [vmem:[#allocation2 + $0x30] sm:$0xf0]  ;;  %v2063_v21 = vld [vmem:[#allocation2 + $0x38] sm:$0xf0] }
 0x1bb   :  { %2166 = vmatmul.msk.bf16.vlgmr.msra.gmra.mxu3 %vm664_vm4, %v2699_v16  ;;  %v2066_v13 = vor.u32 %v2191_v19, %v2063_v21 }
 0x1bd   :  { %701 = vmatpush.bf16.msra.mxu2 %v2110_v33 }
 0x1be   :  { %729 = vmatpush.bf16.msra.mxu1 %v2118_v63  ;;  %757 = vmatpush.bf16.msrb.mxu3 %v2126_v52 }
 0x1c1   :  { %702 = vmatpush.bf16.msra.mxu2 %v2078_v42 }
 0x1c2   :  { %758 = vmatpush.bf16.msrb.mxu3 %v2094_v9 }
 0x1c5   :  { %703 = vmatpush.bf16.msra.mxu2 %v2046_v57 }
 0x1c6   :  { %759 = vmatpush.bf16.msrb.mxu3 %v2062_v28 }
 0x1c8   :  { %2165 = vmatmul.msk.bf16.vlgmr.msra.gmra.mxu2 %vm664_vm4, %v2699_v16 }
 0x1c9   :  { %742 = vmatpush.bf16.msrb.mxu2 %v2154_v58 }
 0x1cb   :  { %2169 = vmatmul.msk.bf16.vlgmr.msrb.gmra.mxu3 %vm664_vm4, %v2699_v16 }
 0x1cd   :  { %743 = vmatpush.bf16.msrb.mxu2 %v2122_v18 }
 0x1d1   :  { %744 = vmatpush.bf16.msrb.mxu2 %v2090_v24 }
 0x218   :  { %v800_v30 = vpop.xlane.xlu0 %799 }
 0x219   :  { %v801_v31 = vsub.f32 %v2674_v2, %v800_v30  ;;  %v2202_v2 = vld [vmem:[#allocation2 + $0x6c] sm:$0xf0]  ;;  %v2095_v30 = vld [vmem:[#allocation2 + $0x78] sm:$0xf0] }
 0x21a   :  { %v2086_v46 = vor.u32 %v2202_v2, %v2085_v0  ;;  %v2098_v11 = vor.u32 %v2199_v29, %v2095_v30 }
 0x21b   :  { %v802_v8 = vmul.f32 1.442695, %v801_v31  ;;  %v2190_v31 = vld [vmem:[#allocation2 + $0x14] sm:$0xf] }
 0x21c   :  { %730 = vmatpush.bf16.msra.mxu1 %v2086_v46  ;;  %v2058_v5 = vor.u32 %v2190_v31, %v2055_v61 }
 0x21d   :  { %2237 = vpow2.f32 %v802_v8 }
 0x21e   :  { %745 = vmatpush.bf16.msrb.mxu2 %v2058_v5 }
 0x220   :  { %v1369_v37 = vpop.xlane.xlu0 %1368  ;;  %731 = vmatpush.bf16.msra.mxu1 %v2054_v59 }
 0x221   :  { %v1370_v41 = vsub.f32 %v2685_v39, %v1369_v37  ;;  %2168 = vmatmul.msk.bf16.vlgmr.msrb.gmra.mxu2 %vm664_vm4, %v2699_v16 }
 0x223   :  { %v2706_v50 = vpop.eup %2237  ;;  %v1371_v51 = vmul.f32 1.442695, %v1370_v41  ;;  %2167 = vmatmul.msk.bf16.vlgmr.msra.gmra.mxu1 %vm664_vm4, %v2699_v16 }
 0x224   :  { %v804_v39 = vsel %vm464_vm3, %v2706_v50, 0.0  ;;  %770 = vmatpush.bf16.msrb.mxu1 %v2162_v1 }
 0x225   :  { %2239 = vpow2.f32 %v1371_v51  ;;  %805 = vadd.xlane.f32.xlu1 %v804_v39 }
 0x228   :  { %771 = vmatpush.bf16.msrb.mxu1 %v2130_v25 }
 0x22b   :  { %v2712_v20 = vpop.eup %2239 }
 0x22c   :  { %v1373_v27 = vsel %vm464_vm3, %v2712_v20, 0.0  ;;  %772 = vmatpush.bf16.msrb.mxu1 %v2098_v11 }
 0x22d   :  { %1374 = vadd.xlane.f32.xlu1 %v1373_v27 }
 0x230   :  { %773 = vmatpush.bf16.msrb.mxu1 %v2066_v13 }
 0x233   :  { %2170 = vmatmul.msk.bf16.vlgmr.msrb.gmra.mxu1 %vm664_vm4, %v2699_v16 }
 0x236   :  { %v2726_v14 = vpop.f32.mrf.mxu1 }
 0x237   :  { %781 = vst [vmem:[%s4763_s7 + $0x8] sm:$0xff] %v2726_v14  ;;  %v2172_v62 = vmul.f32 -1.442695, %v2726_v14 }
 0x23b   :  { %v677_v32 = vpop.f32.mrf.mxu2 }
 0x23c   :  { %780 = vst [vmem:[%s4763_s7] sm:$0xff] %v677_v32  ;;  %v2171_v1 = vmul.f32 -1.442695, %v677_v32 }
 0x23e   :  { %v693_v63 = vpop.f32.mrf.mxu1  ;;  %v719_v48 = vpop.f32.mrf.mxu3 }
 0x23f   :  { %789 = vst [vmem:[%s4763_s7 + $0x48] sm:$0xff] %v693_v63  ;;  %v2180_v17 = vmul.f32 -1.442695, %v693_v63  ;;  %v2174_v23 = vmul.f32 -1.442695, %v719_v48 }
 0x240   :  { %783 = vst [vmem:[%s4763_s7 + $0x18] sm:$0xff] %v719_v48 }
 0x243   :  { %v679_v41 = vpop.f32.mrf.mxu2 }
 0x244   :  { %788 = vst [vmem:[%s4763_s7 + $0x40] sm:$0xff] %v679_v41  ;;  %v2179_v18 = vmul.f32 -1.442695, %v679_v41 }
 0x246   :  { %v721_v39 = vpop.f32.mrf.mxu3 }
 0x247   :  { %791 = vst [vmem:[%s4763_s7 + $0x58] sm:$0xff] %v721_v39  ;;  %v2182_v21 = vmul.f32 -1.442695, %v721_v39 }
 0x24b   :  { %v705_v53 = vpop.f32.mrf.mxu2 }
 0x24c   :  { %782 = vst [vmem:[%s4763_s7 + $0x10] sm:$0xff] %v705_v53  ;;  %v2173_v25 = vmul.f32 -1.442695, %v705_v53 }
 0x24e   :  { %v761_v58 = vpop.f32.mrf.mxu3 }
 0x24f   :  { %786 = vst [vmem:[%s4763_s7 + $0x30] sm:$0xff] %v761_v58 }
 0x253   :  { %v707_v56 = vpop.f32.mrf.mxu2 }
 0x254   :  { %790 = vst [vmem:[%s4763_s7 + $0x50] sm:$0xff] %v707_v56 }
 0x256   :  { %v2779_v9 = vpop.f32.mrf.mxu3 }
 0x257   :  { %794 = vst [vmem:[%s4763_s7 + $0x70] sm:$0xff] %v2779_v9 }
 0x298   :  { %v806_v6 = vpop.xlane.xlu1 %805 }
 0x299   :  { %2241 = vrcp.f32 %v806_v6  ;;  %v818_v33 = vand.u32 2147483648, %v806_v6  ;;  %v816_v34 = vand.u32 2147483647, %v806_v6  ;;  %vm812_vm6 = vweird.f32 %v806_v6 }
 0x29b   :  { %v819_v0 = vor.u32 1.1754944e-38, %v818_v33  ;;  %vm817_vm8 = vcmp.eq.f32.partialorder %v816_v34, 8.507059e+37  ;;  %v2177_v34 = vmul.f32 -1.442695, %v761_v58 }
 0x29f   :  { %v2242_v8 = vpop.eup %2241 }
 0x2a0   :  { %v808_v3 = vmul.f32 %v2242_v8, %v806_v6  ;;  %v1375_v26 = vpop.xlane.xlu1 %1374  ;;  %vm813_vm5 = vweird.f32 %v2242_v8  ;;  %v733_v49 = vpop.f32.mrf.mxu1 }
 0x2a1   :  { %2243 = vrcp.f32 %v1375_v26  ;;  %vm814_vm7 = vmor %vm812_vm6, %vm813_vm5  ;;  %v1387_v42 = vand.u32 2147483648, %v1375_v26  ;;  %v1385_v45 = vand.u32 2147483647, %v1375_v26  ;;  %vm1381_vm11 = vweird.f32 %v1375_v26  ;;  %784 = vst [vmem:[%s4763_s7 + $0x20] sm:$0xff] %v733_v49 }
 0x2a2   :  { %v809_v7 = vsub.f32 1.0, %v808_v3  ;;  %2245 = vpow2.f32 %v2172_v62  ;;  %v2175_v27 = vmul.f32 -1.442695, %v733_v49 }
 0x2a3   :  { %v1388_v47 = vor.u32 1.1754944e-38, %v1387_v42  ;;  %vm1386_vm13 = vcmp.eq.f32.partialorder %v1385_v45, 8.507059e+37  ;;  %2247 = vpow2.f32 %v2171_v1 }
 0x2a4   :  { %v810_v16 = vmul.f32 %v2242_v8, %v809_v7  ;;  %v747_v57 = vpop.f32.mrf.mxu2  ;;  %2249 = vpow2.f32 %v2180_v17 }
 0x2a5   :  { %785 = vst [vmem:[%s4763_s7 + $0x28] sm:$0xff] %v747_v57  ;;  %2251 = vpow2.f32 %v2179_v18 }
 0x2a6   :  { %v811_v35 = vadd.f32 %v2242_v8, %v810_v16  ;;  %v2176_v16 = vmul.f32 -1.442695, %v747_v57 }
 0x2a7   :  { %v2244_v4 = vpop.eup %2243 }
 0x2a8   :  { %v1377_v2 = vmul.f32 %v2244_v4, %v1375_v26  ;;  %v815_v36 = vsel %vm814_vm7, %v2242_v8, %v811_v35  ;;  %vm1382_vm10 = vweird.f32 %v2244_v4  ;;  %v735_v55 = vpop.f32.mrf.mxu1  ;;  %v2246_v12 = vpop.eup %2245  ;;  %v2181_v26 = vmul.f32 -1.442695, %v707_v56 }
 0x2a9   :  { %v820_v37 = vsel %vm817_vm8, %v819_v0, %v815_v36  ;;  %vm1383_vm12 = vmor %vm1381_vm11, %vm1382_vm10  ;;  %792 = vst [vmem:[%s4763_s7 + $0x60] sm:$0xff] %v735_v55  ;;  %v2248_v15 = vpop.eup %2247  ;;  %v2183_v6 = vmul.f32 -1.442695, %v735_v55 }
 0x2aa   :  { %v1378_v38 = vsub.f32 1.0, %v1377_v2  ;;  %v821_v40 = vmul.f32 %v2706_v50, %v820_v37  ;;  %v2793_v22 = vadd.f32 1.0, %v2248_v15  ;;  %v2250_v28 = vpop.eup %2249 }
 0x2ab   :  { %v2252_v29 = vpop.eup %2251  ;;  %v2801_v31 = vadd.f32 1.0, %v2250_v28 }
 0x2ac   :  { %v1379_v43 = vmul.f32 %v2244_v4, %v1378_v38  ;;  %v823_v44 = vsel %vm822_vm9, %v821_v40, -inf  ;;  %v2772_v60 = vpop.f32.mrf.mxu2  ;;  %v2803_v11 = vadd.f32 1.0, %v2252_v29  ;;  %vm867_vm15 = vweird.f32 %v2793_v22 }
 0x2ad   :  { %826 = vmax.index.xlane.f32.xlu0 %v823_v44  ;;  %824 = vmax.xlane.f32.xlu2 %v823_v44  ;;  %793 = vst [vmem:[%s4763_s7 + $0x68] sm:$0xff] %v2772_v60  ;;  %v871_v40 = vand.u32 2147483647, %v2793_v22  ;;  %v2184_v41 = vmul.f32 -1.442695, %v2772_v60 }
 0x2ae   :  { %v1380_v46 = vadd.f32 %v2244_v4, %v1379_v43  ;;  %v2185_v44 = vmul.f32 -1.442695, %v2779_v9  ;;  %v1441_v9 = vand.u32 2147483648, %v2803_v11 }
 0x2af   :  { %vm2868_vm5 = vcmp.eq.f32.partialorder %v871_v40, 8.507059e+37 }
 0x2b0   :  { %v1384_v50 = vsel %vm1383_vm12, %v2244_v4, %v1380_v46  ;;  %v775_v59 = vpop.f32.mrf.mxu1  ;;  %v873_v46 = vand.u32 2147483648, %v2793_v22 }
 0x2b1   :  { %v1389_v51 = vsel %vm1386_vm13, %v1388_v47, %v1384_v50  ;;  %787 = vst [vmem:[%s4763_s7 + $0x38] sm:$0xff] %v775_v59  ;;  %v2178_v0 = vmul.f32 -1.442695, %v775_v59 }
 0x2b2   :  { %v1390_v52 = vmul.f32 %v2712_v20, %v1389_v51  ;;  %v2791_v20 = vadd.f32 1.0, %v2246_v12  ;;  %v874_v1 = vor.u32 1.1754944e-38, %v873_v46 }
 0x2b4   :  { %v1391_v54 = vsel %vm822_vm9, %v1390_v52, -inf  ;;  %2253 = vrcp.f32 %v2791_v20  ;;  %vm882_vm14 = vweird.f32 %v2791_v20  ;;  %v886_v63 = vand.u32 2147483647, %v2791_v20 }
 0x2b5   :  { %1394 = vmax.index.xlane.f32.xlu1 %v1391_v54  ;;  %1392 = vmax.xlane.f32.xlu2 %v1391_v54  ;;  %2255 = vrcp.f32 %v2793_v22  ;;  %v888_v4 = vand.u32 2147483648, %v2791_v20  ;;  %v1456_v52 = vand.u32 2147483648, %v2801_v31 }
 0x2b6   :  { %2257 = vpow2.f32 %v2174_v23  ;;  %vm2860_vm4 = vcmp.eq.f32.partialorder %v886_v63, 8.507059e+37 }
 0x2b7   :  { %2259 = vpow2.f32 %v2173_v25  ;;  %v889_v55 = vor.u32 1.1754944e-38, %v888_v4 }
 0x2b8   :  { %v2785_v10 = vpop.f32.mrf.mxu1  ;;  %2261 = vpow2.f32 %v2175_v27 }
 0x2b9   :  { %795 = vst [vmem:[%s4763_s7 + $0x78] sm:$0xff] %v2785_v10  ;;  %2263 = vrcp.f32 %v2801_v31  ;;  %v2186_v47 = vmul.f32 -1.442695, %v2785_v10 }
 0x2ba   :  { %v2797_v30 = vpop.eup %2253  ;;  %2265 = vrcp.f32 %v2803_v11 }
 0x2bb   :  { %v2799_v24 = vpop.eup %2255  ;;  %v878_v13 = vmul.f32 %v2797_v30, %v2791_v20  ;;  %2267 = vpow2.f32 %v2182_v21  ;;  %vm883_vm0 = vweird.f32 %v2797_v30  ;;  %v2883_v20 = vor.u32 1.1754944e-38, %v1456_v52 }
 0x2bc   :  { %v2258_v61 = vpop.eup %2257  ;;  %v863_v5 = vmul.f32 %v2799_v24, %v2793_v22  ;;  %2269 = vpow2.f32 %v2183_v6  ;;  %vm868_vm1 = vweird.f32 %v2799_v24  ;;  %vm2849_vm2 = vmor %vm882_vm14, %vm883_vm0 }
 0x2bd   :  { %v2260_v19 = vpop.eup %2259  ;;  %v2810_v8 = vadd.f32 1.0, %v2258_v61  ;;  %v879_v32 = vsub.f32 1.0, %v878_v13  ;;  %vm2856_vm3 = vmor %vm867_vm15, %vm868_vm1  ;;  %vm1450_vm1 = vweird.f32 %v2801_v31 }
 0x2be   :  { %v2262_v14 = vpop.eup %2261  ;;  %v2813_v3 = vadd.f32 1.0, %v2260_v19  ;;  %v864_v7 = vsub.f32 1.0, %v863_v5  ;;  %v2902_v19 = vor.u32 1.1754944e-38, %v1441_v9 }
 0x2bf   :  { %v2815_v33 = vadd.f32 1.0, %v2262_v14  ;;  %2271 = vrcp.f32 %v2810_v8  ;;  %v2820_v35 = vpop.eup %2263  ;;  %v880_v37 = vmul.f32 %v2797_v30, %v879_v32  ;;  %vm912_vm6 = vweird.f32 %v2810_v8 }
 0x2c0   :  { %2273 = vrcp.f32 %v2813_v3  ;;  %v2824_v2 = vpop.eup %2265  ;;  %v865_v36 = vmul.f32 %v2799_v24, %v864_v7  ;;  %v1446_v43 = vmul.f32 %v2820_v35, %v2801_v31  ;;  %v916_v14 = vand.u32 2147483647, %v2810_v8 }
 0x2c1   :  { %2275 = vpow2.f32 %v2181_v26  ;;  %v2268_v38 = vpop.eup %2267  ;;  %v881_v50 = vadd.f32 %v2797_v30, %v880_v37  ;;  %v1431_v23 = vmul.f32 %v2824_v2, %v2803_v11  ;;  %v901_v37 = vand.u32 2147483647, %v2813_v3 }
 0x2c2   :  { %2277 = vrcp.f32 %v2815_v33  ;;  %v2270_v42 = vpop.eup %2269  ;;  %v866_v49 = vadd.f32 %v2799_v24, %v865_v36  ;;  %v2864_v56 = vadd.f32 1.0, %v2268_v38  ;;  %v1447_v59 = vsub.f32 1.0, %v1446_v43 }
 0x2c3   :  { %2279 = vpow2.f32 %v2176_v16  ;;  %v2872_v60 = vadd.f32 1.0, %v2270_v42  ;;  %v885_v17 = vsel %vm2849_vm2, %v2797_v30, %v881_v50  ;;  %v1432_v32 = vsub.f32 1.0, %v1431_v23 }
 0x2c4   :  { %2281 = vpow2.f32 %v2177_v34  ;;  %v870_v15 = vsel %vm2856_vm3, %v2799_v24, %v866_v49  ;;  %v1448_v28 = vmul.f32 %v2820_v35, %v1447_v59  ;;  %v2900_v61 = vsel %vm2860_vm4, %v889_v55, %v885_v17 }
 0x2c5   :  { %v2837_v45 = vpop.eup %2271  ;;  %2283 = vpow2.f32 %v2178_v0  ;;  %v2910_v6 = vsel %vm2868_vm5, %v874_v1, %v870_v15  ;;  %v903_v16 = vand.u32 2147483648, %v2813_v3  ;;  %vm897_vm7 = vweird.f32 %v2813_v3 }
 0x2c6   :  { %v2841_v48 = vpop.eup %2273  ;;  %2285 = vpow2.f32 %v2184_v41  ;;  %v908_v25 = vmul.f32 %v2837_v45, %v2810_v8  ;;  %v2919_v63 = vadd.f32 %v2820_v35, %v1448_v28  ;;  %v918_v42 = vand.u32 2147483648, %v2810_v8 }
 0x2c7   :  { %v2276_v53 = vpop.eup %2275  ;;  %2287 = vpow2.f32 %v2185_v44  ;;  %v893_v29 = vmul.f32 %v2841_v48, %v2813_v3  ;;  %v1433_v44 = vmul.f32 %v2824_v2, %v1432_v32  ;;  %v2938_v46 = vor.u32 1.1754944e-38, %v903_v16 }
 0x2c8   :  { %v2866_v57 = vpop.eup %2277  ;;  %2289 = vpow2.f32 %v2186_v47  ;;  %v2889_v27 = vadd.f32 1.0, %v2276_v53  ;;  %v909_v34 = vsub.f32 1.0, %v908_v25  ;;  %v931_v49 = vand.u32 2147483647, %v2815_v33 }
 0x2c9   :  { %v2280_v62 = vpop.eup %2279  ;;  %2291 = vrcp.f32 %v2864_v56  ;;  %v923_v21 = vmul.f32 %v2866_v57, %v2815_v33  ;;  %v894_v4 = vsub.f32 1.0, %v893_v29  ;;  %vm2943_vm8 = vcmp.eq.f32.partialorder %v916_v14, 8.507059e+37 }
 0x2ca   :  { %v2282_v12 = vpop.eup %2281  ;;  %2293 = vrcp.f32 %v2872_v60  ;;  %v2896_v30 = vadd.f32 1.0, %v2280_v62  ;;  %v910_v47 = vmul.f32 %v2837_v45, %v909_v34  ;;  %v933_v52 = vand.u32 2147483648, %v2815_v33 }
 0x2cb   :  { %v2284_v22 = vpop.eup %2283  ;;  %v2906_v5 = vadd.f32 1.0, %v2282_v12  ;;  %2295 = vrcp.f32 %v2889_v27  ;;  %v924_v38 = vsub.f32 1.0, %v923_v21  ;;  %v895_v50 = vmul.f32 %v2841_v48, %v894_v4 }
 0x2cc   :  { %v2286_v24 = vpop.eup %2285  ;;  %v2914_v26 = vadd.f32 1.0, %v2284_v22  ;;  %2297 = vrcp.f32 %v2896_v30  ;;  %vm2953_vm9 = vcmp.eq.f32.partialorder %v901_v37, 8.507059e+37  ;;  %vm913_vm10 = vweird.f32 %v2837_v45 }
 0x2cd   :  { %v2288_v13 = vpop.eup %2287  ;;  %v2922_v0 = vadd.f32 1.0, %v2286_v24  ;;  %2299 = vrcp.f32 %v2906_v5  ;;  %v925_v55 = vmul.f32 %v2866_v57, %v924_v38  ;;  %vm898_vm11 = vweird.f32 %v2841_v48  ;;  %vm2982_vm14 = vmor %vm912_vm6, %vm913_vm10 }
 0x2ce   :  { %v2290_v7 = vpop.eup %2289  ;;  %v2928_v40 = vadd.f32 1.0, %v2288_v13  ;;  %2301 = vrcp.f32 %v2914_v26  ;;  %v919_v62 = vor.u32 1.1754944e-38, %v918_v42  ;;  %vm927_vm12 = vweird.f32 %v2815_v33  ;;  %vm2995_vm0 = vmor %vm897_vm7, %vm898_vm11 }
 0x2cf   :  { %v2924_v36 = vpop.eup %2291  ;;  %v2935_v43 = vadd.f32 1.0, %v2290_v7  ;;  %2303 = vrcp.f32 %v2922_v0  ;;  %v2970_v9 = vadd.f32 %v2824_v2, %v1433_v44  ;;  %v911_v12 = vadd.f32 %v2837_v45, %v910_v47 }
 0x2d0   :  { %v2930_v41 = vpop.eup %2293  ;;  %v1476_v53 = vmul.f32 %v2924_v36, %v2864_v56  ;;  %2305 = vrcp.f32 %v2928_v40  ;;  %vm928_vm13 = vweird.f32 %v2866_v57  ;;  %v1486_v15 = vand.u32 2147483648, %v2864_v56 }
 0x2d1   :  { %v2951_v54 = vpop.eup %2295  ;;  %v1491_v58 = vmul.f32 %v2930_v41, %v2872_v60  ;;  %2307 = vrcp.f32 %v2935_v43  ;;  %v896_v22 = vadd.f32 %v2841_v48, %v895_v50  ;;  %vm2986_vm15 = vcmp.eq.f32.partialorder %v931_v49, 8.507059e+37  ;;  %vm3010_vm3 = vmor %vm927_vm12, %vm928_vm13 }
 0x2d2   :  { %v2962_v59 = vpop.eup %2297  ;;  %v1471_v28 = vand.u32 2147483648, %v2889_v27  ;;  %v1477_v29 = vsub.f32 1.0, %v1476_v53  ;;  %v926_v8 = vadd.f32 %v2866_v57, %v925_v55  ;;  %v934_v21 = vor.u32 1.1754944e-38, %v933_v52 }
 0x2d3   :  { %v2967_v1 = vpop.eup %2299  ;;  %v1461_v13 = vmul.f32 %v2951_v54, %v2889_v27  ;;  %v1492_v14 = vsub.f32 1.0, %v1491_v58  ;;  %vm1451_vm2 = vweird.f32 %v2820_v35  ;;  %v938_v4 = vmul.f32 %v2962_v59, %v2896_v30 }
 0x2d4   :  { %v2975_v17 = vpop.eup %2301  ;;  %v915_v38 = vsel %vm2982_vm14, %v2837_v45, %v911_v12  ;;  %v3024_v33 = vor.u32 1.1754944e-38, %v1486_v15  ;;  %v953_v42 = vmul.f32 %v2967_v1, %v2906_v5  ;;  %v900_v49 = vsel %vm2995_vm0, %v2841_v48, %v896_v22  ;;  %vm3093_vm12 = vmor %vm1450_vm1, %vm1451_vm2 }
 0x2d5   :  { %v3002_v7 = vpop.eup %2303  ;;  %v968_v44 = vmul.f32 %v2975_v17, %v2914_v26  ;;  %v3035_v50 = vor.u32 1.1754944e-38, %v1471_v28  ;;  %v1478_v52 = vmul.f32 %v2924_v36, %v1477_v29  ;;  %v1501_v45 = vand.u32 2147483648, %v2872_v60 }
 0x2d6   :  { %v3019_v37 = vpop.eup %2305  ;;  %v930_v53 = vsel %vm3010_vm3, %v2866_v57, %v926_v8  ;;  %v1462_v55 = vsub.f32 1.0, %v1461_v13  ;;  %v1493_v58 = vmul.f32 %v2930_v41, %v1492_v14  ;;  %v946_v12 = vand.u32 2147483647, %v2896_v30 }
 0x2d7   :  { %v3030_v47 = vpop.eup %2307  ;;  %vm1435_vm4 = vweird.f32 %v2803_v11  ;;  %vm1436_vm5 = vweird.f32 %v2824_v2  ;;  %v939_v48 = vsub.f32 1.0, %v938_v4  ;;  %v948_v15 = vand.u32 2147483648, %v2896_v30 }
 0x2d8   :  { %4874 = vst [vmem:[#allocation6_spill] sm:$0xff] %v3030_v47  ;;  %v1506_v22 = vmul.f32 %v3002_v7, %v2922_v0  ;;  %v1521_v23 = vmul.f32 %v3019_v37, %v2928_v40  ;;  %v3053_v57 = vsel %vm2943_vm8, %v919_v62, %v915_v38  ;;  %v954_v28 = vsub.f32 1.0, %v953_v42 }
 0x2d9   :  { %v969_v29 = vsub.f32 1.0, %v968_v44  ;;  %v1536_v24 = vmul.f32 %v3030_v47, %v2935_v43  ;;  %v3060_v8 = vsel %vm2953_vm9, %v2938_v46, %v900_v49  ;;  %v3064_v13 = vsel %vm2986_vm15, %v934_v21, %v930_v53 }
 0x2da   :  { %v3067_v14 = vadd.f32 %v2924_v36, %v1478_v52  ;;  %v3069_v51 = vor.u32 1.1754944e-38, %v1501_v45  ;;  %v1463_v62 = vmul.f32 %v2951_v54, %v1462_v55  ;;  %v3073_v3 = vadd.f32 %v2930_v41, %v1493_v58 }
 0x2db   :  { %vm942_vm6 = vweird.f32 %v2896_v30  ;;  %v961_v39 = vand.u32 2147483647, %v2906_v5  ;;  %v940_v46 = vmul.f32 %v2962_v59, %v939_v48  ;;  %vm3078_vm7 = vcmp.eq.f32.partialorder %v946_v12, 8.507059e+37 }
 0x2dc   :  { %v949_v21 = vor.u32 1.1754944e-38, %v948_v15  ;;  %v1507_v4 = vsub.f32 1.0, %v1506_v22  ;;  %v1522_v38 = vsub.f32 1.0, %v1521_v23  ;;  %vm943_vm8 = vweird.f32 %v2962_v59 }
 0x2dd   :  { %v955_v42 = vmul.f32 %v2967_v1, %v954_v28  ;;  %v970_v44 = vmul.f32 %v2975_v17, %v969_v29  ;;  %v1537_v49 = vsub.f32 1.0, %v1536_v24  ;;  %vm957_vm9 = vweird.f32 %v2906_v5  ;;  %vm3107_vm15 = vmor %vm942_vm6, %vm943_vm8 }
 0x2de   :  { %vm958_vm10 = vweird.f32 %v2967_v1  ;;  %v963_v52 = vand.u32 2147483648, %v2906_v5  ;;  %vm972_vm11 = vweird.f32 %v2914_v26  ;;  %vm3097_vm13 = vcmp.eq.f32.partialorder %v961_v39, 8.507059e+37 }
 0x2df   :  { %vm973_vm14 = vweird.f32 %v2975_v17  ;;  %v976_v55 = vand.u32 2147483647, %v2914_v26  ;;  %v978_v58 = vand.u32 2147483648, %v2914_v26  ;;  %v941_v12 = vadd.f32 %v2962_v59, %v940_v46  ;;  %vm3117_vm1 = vmor %vm957_vm9, %vm958_vm10 }
 0x2e0   :  { %v1508_v15 = vmul.f32 %v3002_v7, %v1507_v4  ;;  %vm1510_vm0 = vweird.f32 %v2922_v0  ;;  %v1523_v22 = vmul.f32 %v3019_v37, %v1522_v38  ;;  %v956_v23 = vadd.f32 %v2967_v1, %v955_v42  ;;  %vm3126_vm3 = vmor %vm972_vm11, %vm973_vm14 }
 0x2e1   :  { %v971_v30 = vadd.f32 %v2975_v17, %v970_v44  ;;  %vm1511_vm2 = vweird.f32 %v3002_v7  ;;  %v1538_v29 = vmul.f32 %v3030_v47, %v1537_v49  ;;  %v964_v24 = vor.u32 1.1754944e-38, %v963_v52  ;;  %vm3137_vm9 = vmor %vm1435_vm4, %vm1436_vm5 }
 0x2e2   :  { %v1516_v46 = vand.u32 2147483648, %v2922_v0  ;;  %vm1525_vm6 = vweird.f32 %v2928_v40  ;;  %vm1526_vm8 = vweird.f32 %v3019_v37  ;;  %v1531_v26 = vand.u32 2147483648, %v2928_v40  ;;  %vm3155_vm4 = vmor %vm1510_vm0, %vm1511_vm2 }
 0x2e3   :  { %vm1540_vm10 = vweird.f32 %v2935_v43  ;;  %vm1541_vm11 = vweird.f32 %v3030_v47  ;;  %v1546_v4 = vand.u32 2147483648, %v2935_v43  ;;  %v945_v38 = vsel %vm3107_vm15, %v2962_v59, %v941_v12  ;;  %vm3170_vm14 = vmor %vm1525_vm6, %vm1526_vm8 }
 0x2e4   :  { %v979_v42 = vor.u32 1.1754944e-38, %v978_v58  ;;  %v3149_v44 = vadd.f32 %v3002_v7, %v1508_v15  ;;  %v4889_v49 = vmov 0  ;;  %v3160_v52 = vadd.f32 %v3019_v37, %v1523_v22  ;;  %vm3188_vm15 = vmor %vm1540_vm10, %vm1541_vm11 }
 0x2e5   :  { %v4890_v49 = vsel %vm3155_vm4, 4294967295, %v4889_v49  ;;  %v960_v48 = vsel %vm3117_vm1, %v2967_v1, %v956_v23  ;;  %v975_v59 = vsel %vm3126_vm3, %v2975_v17, %v971_v30  ;;  %vm977_vm5 = vcmp.eq.f32.partialorder %v976_v55, 8.507059e+37 }
 0x2e6   :  { %v4891_v58 = vmov 0  ;;  %v3175_v12 = vadd.f32 %v3030_v47, %v1538_v29  ;;  %v3178_v15 = vadd.f32 %v2951_v54, %v1463_v62  ;;  %v3181_v1 = vor.u32 1.1754944e-38, %v1516_v46 }
 0x2e7   :  { %v4892_v58 = vsel %vm3170_vm14, 4294967295, %v4891_v58  ;;  %v4894_v17 = vmov 0  ;;  %v950_v55 = vsel %vm3078_vm7, %v949_v21, %v945_v38  ;;  %v3194_v28 = vor.u32 1.1754944e-38, %v1531_v26 }
 0x2e8   :  { %4893 = vst [vmem:[#allocation7_spill] sm:$0xff] %v3175_v12  ;;  %v4895_v17 = vsel %vm3188_vm15, 4294967295, %v4894_v17  ;;  %v3197_v30 = vor.u32 1.1754944e-38, %v1546_v4  ;;  %v965_v29 = vsel %vm3097_vm13, %v964_v24, %v960_v48  ;;  %v980_v39 = vsel %vm977_vm5, %v979_v42, %v975_v59 }
 0x2e9   :  { %4896 = vst [vmem:[#allocation8_spill] sm:$0xff] %v4895_v17  ;;  %v4907_v62 = vmov 0  ;;  %v4910_v23 = vmov 0  ;;  %v4913_v22 = vmov 0  ;;  %v4916_v34 = vmov 0 }
 0x2ea   :  { %4897 = vst [vmem:[#allocation9_spill] sm:$0xff] %v3197_v30  ;;  %v4919_v16 = vmov 0  ;;  %v5069_v17 = vmov 0 }
 0x320   :  { %v825_v26 = vpop.xlane.xlu2 %824 }
 0x321   :  { %v3222_v38 = vmul.f32 %v2910_v6, %v825_v26  ;;  %v3225_v42 = vmul.f32 %v2900_v61, %v825_v26  ;;  %v3228_v48 = vmul.f32 %v3060_v8, %v825_v26  ;;  %v3231_v59 = vmul.f32 %v3053_v57, %v825_v26 }
 0x322   :  { %v3234_v21 = vmul.f32 %v3064_v13, %v825_v26  ;;  %v3236_v25 = vmul.f32 %v950_v55, %v825_v26  ;;  %v3238_v46 = vmul.f32 %v965_v29, %v825_v26  ;;  %v3240_v4 = vmul.f32 %v980_v39, %v825_v26 }
 0x323   :  { %v998_v6 = vrot.slane %v3222_v38, 7  ;;  %v999_v61 = vrot.slane %v3225_v42, 7  ;;  %v1000_v24 = vrot.slane %v3228_v48, 7  ;;  %v1001_v8 = vrot.slane %v3231_v59, 7 }
 0x324   :  { %v1002_v57 = vrot.slane %v3234_v21, 7  ;;  %v1003_v53 = vrot.slane %v3236_v25, 7  ;;  %v1004_v13 = vrot.slane %v3238_v46, 7  ;;  %v1005_v55 = vrot.slane %v3240_v4, 7 }
 0x325   :  { %vm3251_vm7 = vcmp.gt.f32.partialorder %v3222_v38, %v998_v6  ;;  %v4898_v29 = vmov 0  ;;  %vm3256_vm13 = vcmp.gt.f32.partialorder %v3225_v42, %v999_v61  ;;  %v4901_v39 = vmov 0 }
 0x326   :  { %v4899_v29 = vsel %vm3251_vm7, 4294967295, %v4898_v29  ;;  %v4902_v39 = vsel %vm3256_vm13, 4294967295, %v4901_v39  ;;  %vm3261_vm0 = vcmp.gt.f32.partialorder %v3228_v48, %v1000_v24  ;;  %v4904_v26 = vmov 0 }
 0x327   :  { %4900 = vst [vmem:[#allocation10_spill] sm:$0xff] %v4899_v29  ;;  %v4905_v26 = vsel %vm3261_vm0, 4294967295, %v4904_v26  ;;  %vm3266_vm1 = vcmp.gt.f32.partialorder %v3231_v59, %v1001_v8  ;;  %vm3271_vm2 = vcmp.gt.f32.partialorder %v3234_v21, %v1002_v57  ;;  %vm3276_vm3 = vcmp.gt.f32.partialorder %v3236_v25, %v1003_v53 }
 0x328   :  { %4903 = vst [vmem:[#allocation11_spill] sm:$0xff] %v4902_v39  ;;  %v4908_v62 = vsel %vm3266_vm1, 4294967295, %v4907_v62  ;;  %v4911_v23 = vsel %vm3271_vm2, 4294967295, %v4910_v23  ;;  %v4914_v22 = vsel %vm3276_vm3, 4294967295, %v4913_v22  ;;  %vm3281_vm6 = vcmp.gt.f32.partialorder %v3238_v46, %v1004_v13 }
 0x329   :  { %4906 = vst [vmem:[#allocation12_spill] sm:$0xff] %v4905_v26  ;;  %v4917_v34 = vsel %vm3281_vm6, 4294967295, %v4916_v34  ;;  %vm3286_vm8 = vcmp.gt.f32.partialorder %v3240_v4, %v1005_v55  ;;  %v1022_v32 = vsel %vm3251_vm7, %v3222_v38, %v998_v6  ;;  %v1023_v10 = vsel %vm3256_vm13, %v3225_v42, %v999_v61 }
 0x32a   :  { %4909 = vst [vmem:[#allocation13_spill] sm:$0xff] %v4908_v62  ;;  %v4920_v16 = vsel %vm3286_vm8, 4294967295, %v4919_v16  ;;  %v1024_v18 = vsel %vm3261_vm0, %v3228_v48, %v1000_v24  ;;  %v1025_v30 = vsel %vm3266_vm1, %v3231_v59, %v1001_v8  ;;  %v1026_v12 = vsel %vm3271_vm2, %v3234_v21, %v1002_v57 }
 0x32b   :  { %4912 = vst [vmem:[#allocation14_spill] sm:$0xff] %v4911_v23  ;;  %v1027_v6 = vsel %vm3276_vm3, %v3236_v25, %v1003_v53  ;;  %v1028_v61 = vsel %vm3281_vm6, %v3238_v46, %v1004_v13  ;;  %v1029_v24 = vsel %vm3286_vm8, %v3240_v4, %v1005_v55  ;;  %v1047_v26 = vrot.slane %v1022_v32, 7 }
 0x32c   :  { %4915 = vst [vmem:[#allocation15_spill] sm:$0xff] %v4914_v22  ;;  %v1048_v39 = vrot.slane %v1023_v10, 7  ;;  %v1049_v62 = vrot.slane %v1024_v18, 7  ;;  %v1050_v8 = vrot.slane %v1025_v30, 7  ;;  %v1051_v29 = vrot.slane %v1026_v12, 7 }
 0x32d   :  { %4918 = vst [vmem:[#allocation16_spill] sm:$0xff] %v4917_v34  ;;  %v1052_v47 = vrot.slane %v1027_v6, 7  ;;  %v1053_v23 = vrot.slane %v1028_v61, 7  ;;  %v1054_v57 = vrot.slane %v1029_v24, 7  ;;  %vm3315_vm10 = vcmp.gt.f32.partialorder %v3222_v38, %v1047_v26 }
 0x32e   :  { %4921 = vst [vmem:[#allocation17_spill] sm:$0xff] %v4920_v16  ;;  %v4922_v22 = vmov 0  ;;  %vm3320_vm11 = vcmp.gt.f32.partialorder %v3225_v42, %v1048_v39  ;;  %v4925_v53 = vmov 0  ;;  %vm3325_vm5 = vcmp.gt.f32.partialorder %v3228_v48, %v1049_v62 }
 0x32f   :  { %v4923_v22 = vsel %vm3315_vm10, 4294967295, %v4922_v22  ;;  %v4926_v53 = vsel %vm3320_vm11, 4294967295, %v4925_v53  ;;  %v4928_v32 = vmov 0  ;;  %vm3330_vm8 = vcmp.gt.f32.partialorder %v3231_v59, %v1050_v8 }
 0x330   :  { %4924 = vst [vmem:[#allocation18_spill] sm:$0xff] %v4923_v22  ;;  %v4929_v32 = vsel %vm3325_vm5, 4294967295, %v4928_v32  ;;  %v4931_v10 = vmov 0  ;;  %vm3335_vm6 = vcmp.gt.f32.partialorder %v3234_v21, %v1051_v29  ;;  %v4934_v18 = vmov 0 }
 0x331   :  { %4927 = vst [vmem:[#allocation19_spill] sm:$0xff] %v4926_v53  ;;  %v4932_v10 = vsel %vm3330_vm8, 4294967295, %v4931_v10  ;;  %v4935_v18 = vsel %vm3335_vm6, 4294967295, %v4934_v18  ;;  %vm3340_vm3 = vcmp.gt.f32.partialorder %v3236_v25, %v1052_v47  ;;  %v4937_v12 = vmov 0 }
 0x332   :  { %4930 = vst [vmem:[#allocation20_spill] sm:$0xff] %v4929_v32  ;;  %v4938_v12 = vsel %vm3340_vm3, 4294967295, %v4937_v12  ;;  %vm3345_vm2 = vcmp.gt.f32.partialorder %v3238_v46, %v1053_v23  ;;  %v4940_v30 = vmov 0  ;;  %vm3350_vm1 = vcmp.gt.f32.partialorder %v3240_v4, %v1054_v57 }
 0x333   :  { %4933 = vst [vmem:[#allocation21_spill] sm:$0xff] %v4932_v10  ;;  %v4941_v30 = vsel %vm3345_vm2, 4294967295, %v4940_v30  ;;  %v4943_v13 = vmov 0  ;;  %v1071_v55 = vsel %vm3315_vm10, %v3222_v38, %v1047_v26  ;;  %v1072_v6 = vsel %vm3320_vm11, %v3225_v42, %v1048_v39 }
 0x334   :  { %4936 = vst [vmem:[#allocation22_spill] sm:$0xff] %v4935_v18  ;;  %v4944_v13 = vsel %vm3350_vm1, 4294967295, %v4943_v13  ;;  %v1073_v61 = vsel %vm3325_vm5, %v3228_v48, %v1049_v62  ;;  %v1074_v24 = vsel %vm3330_vm8, %v3231_v59, %v1050_v8  ;;  %v1075_v16 = vsel %vm3335_vm6, %v3234_v21, %v1051_v29 }
 0x335   :  { %4939 = vst [vmem:[#allocation23_spill] sm:$0xff] %v4938_v12  ;;  %v1076_v26 = vsel %vm3340_vm3, %v3236_v25, %v1052_v47  ;;  %v1077_v39 = vsel %vm3345_vm2, %v3238_v46, %v1053_v23  ;;  %v1078_v62 = vsel %vm3350_vm1, %v3240_v4, %v1054_v57  ;;  %v1103_v32 = vrot.slane %v1071_v55, 7 }
 0x336   :  { %4942 = vst [vmem:[#allocation24_spill] sm:$0xff] %v4941_v30  ;;  %v1104_v53 = vrot.slane %v1072_v6, 7  ;;  %v1105_v10 = vrot.slane %v1073_v61, 7  ;;  %v1106_v8 = vrot.slane %v1074_v24, 7  ;;  %v1107_v22 = vrot.slane %v1075_v16, 7 }
 0x337   :  { %4945 = vst [vmem:[#allocation25_spill] sm:$0xff] %v4944_v13  ;;  %v1108_v34 = vrot.slane %v1076_v26, 7  ;;  %v1109_v18 = vrot.slane %v1077_v39, 7  ;;  %v1110_v29 = vrot.slane %v1078_v62, 7  ;;  %vm3379_vm6 = vcmp.gt.f32.partialorder %v3222_v38, %v1103_v32 }
 0x338   :  { %v4946_v12 = vmov 0  ;;  %vm3384_vm3 = vcmp.gt.f32.partialorder %v3225_v42, %v1104_v53  ;;  %v4949_v47 = vmov 0  ;;  %vm3389_vm1 = vcmp.gt.f32.partialorder %v3228_v48, %v1105_v10 }
 0x339   :  { %v4947_v12 = vsel %vm3379_vm6, 4294967295, %v4946_v12  ;;  %v4950_v47 = vsel %vm3384_vm3, 4294967295, %v4949_v47  ;;  %v4952_v23 = vmov 0  ;;  %vm3394_vm2 = vcmp.gt.f32.partialorder %v3231_v59, %v1106_v8 }
 0x33a   :  { %4948 = vst [vmem:[#allocation26_spill] sm:$0xff] %v4947_v12  ;;  %v4953_v23 = vsel %vm3389_vm1, 4294967295, %v4952_v23  ;;  %v4955_v16 = vmov 0  ;;  %vm3399_vm8 = vcmp.gt.f32.partialorder %v3234_v21, %v1107_v22  ;;  %v4958_v57 = vmov 0 }
 0x33b   :  { %4951 = vst [vmem:[#allocation27_spill] sm:$0xff] %v4950_v47  ;;  %v4956_v16 = vsel %vm3394_vm2, 4294967295, %v4955_v16  ;;  %v4959_v57 = vsel %vm3399_vm8, 4294967295, %v4958_v57  ;;  %vm3404_vm5 = vcmp.gt.f32.partialorder %v3236_v25, %v1108_v34  ;;  %v4961_v55 = vmov 0 }
 0x33c   :  { %4954 = vst [vmem:[#allocation28_spill] sm:$0xff] %v4953_v23  ;;  %v4962_v55 = vsel %vm3404_vm5, 4294967295, %v4961_v55  ;;  %vm3409_vm11 = vcmp.gt.f32.partialorder %v3238_v46, %v1109_v18  ;;  %v4964_v6 = vmov 0  ;;  %vm3414_vm10 = vcmp.gt.f32.partialorder %v3240_v4, %v1110_v29 }
 0x33d   :  { %4957 = vst [vmem:[#allocation29_spill] sm:$0xff] %v4956_v16  ;;  %v4965_v6 = vsel %vm3409_vm11, 4294967295, %v4964_v6  ;;  %v4967_v61 = vmov 0  ;;  %v1127_v24 = vsel %vm3379_vm6, %v3222_v38, %v1103_v32  ;;  %v1128_v26 = vsel %vm3384_vm3, %v3225_v42, %v1104_v53 }
 0x33e   :  { %4960 = vst [vmem:[#allocation30_spill] sm:$0xff] %v4959_v57  ;;  %v4968_v61 = vsel %vm3414_vm10, 4294967295, %v4967_v61  ;;  %v1129_v39 = vsel %vm3389_vm1, %v3228_v48, %v1105_v10  ;;  %v1130_v62 = vsel %vm3394_vm2, %v3231_v59, %v1106_v8  ;;  %v1131_v32 = vsel %vm3399_vm8, %v3234_v21, %v1107_v22 }
 0x33f   :  { %4963 = vst [vmem:[#allocation31_spill] sm:$0xff] %v4962_v55  ;;  %v1132_v53 = vsel %vm3404_vm5, %v3236_v25, %v1108_v34  ;;  %v1133_v10 = vsel %vm3409_vm11, %v3238_v46, %v1109_v18  ;;  %v1134_v8 = vsel %vm3414_vm10, %v3240_v4, %v1110_v29  ;;  %v1159_v16 = vrot.slane %v1127_v24, 7 }
 0x340   :  { %4966 = vst [vmem:[#allocation32_spill] sm:$0xff] %v4965_v6  ;;  %v1160_v23 = vrot.slane %v1128_v26, 7  ;;  %v1161_v57 = vrot.slane %v1129_v39, 7  ;;  %v1162_v22 = vrot.slane %v1130_v62, 7  ;;  %v1163_v47 = vrot.slane %v1131_v32, 7 }
 0x341   :  { %4969 = vst [vmem:[#allocation33_spill] sm:$0xff] %v4968_v61  ;;  %v1164_v12 = vrot.slane %v1132_v53, 7  ;;  %v1165_v55 = vrot.slane %v1133_v10, 7  ;;  %v1166_v34 = vrot.slane %v1134_v8, 7  ;;  %vm3449_vm8 = vcmp.gt.f32.partialorder %v3222_v38, %v1159_v16 }
 0x342   :  { %v4970_v18 = vmov 0  ;;  %vm3454_vm0 = vcmp.gt.f32.partialorder %v3225_v42, %v1160_v23  ;;  %v4973_v29 = vmov 0  ;;  %vm3459_vm13 = vcmp.gt.f32.partialorder %v3228_v48, %v1161_v57 }
 0x343   :  { %v4971_v18 = vsel %vm3449_vm8, 4294967295, %v4970_v18  ;;  %v4974_v29 = vsel %vm3454_vm0, 4294967295, %v4973_v29  ;;  %v4976_v24 = vmov 0  ;;  %vm3464_vm10 = vcmp.gt.f32.partialorder %v3231_v59, %v1162_v22 }
 0x344   :  { %4972 = vst [vmem:[#allocation34_spill] sm:$0xff] %v4971_v18  ;;  %v4977_v24 = vsel %vm3459_vm13, 4294967295, %v4976_v24  ;;  %v4979_v26 = vmov 0  ;;  %v4982_v39 = vand.u32 2147483647, %v2803_v11  ;;  %vm3481_vm2 = vcmp.gt.f32.partialorder %v3234_v21, %v1163_v47 }
 0x345   :  { %4975 = vst [vmem:[#allocation35_spill] sm:$0xff] %v4974_v29  ;;  %v4980_v26 = vsel %vm3464_vm10, 4294967295, %v4979_v26  ;;  %v4985_v32 = vand.u32 2147483647, %v2801_v31  ;;  %v4988_v10 = vmov 0  ;;  %vm3486_vm1 = vcmp.gt.f32.partialorder %v3236_v25, %v1164_v12 }
 0x346   :  { %4978 = vst [vmem:[#allocation36_spill] sm:$0xff] %v4977_v24  ;;  %vm3470_vm5 = vcmp.eq.f32.partialorder %v4982_v39, 8.507059e+37  ;;  %v4989_v10 = vsel %vm3481_vm2, 4294967295, %v4988_v10  ;;  %v4991_v8 = vmov 0  ;;  %vm3491_vm3 = vcmp.gt.f32.partialorder %v3238_v46, %v1165_v55 }
 0x347   :  { %4981 = vst [vmem:[#allocation37_spill] sm:$0xff] %v4980_v26  ;;  %vm3476_vm11 = vcmp.eq.f32.partialorder %v4985_v32, 8.507059e+37  ;;  %v4992_v8 = vsel %vm3486_vm1, 4294967295, %v4991_v8  ;;  %v4994_v11 = vmov 0  ;;  %vm3496_vm6 = vcmp.gt.f32.partialorder %v3240_v4, %v1166_v34 }
 0x348   :  { %4990 = vst [vmem:[#allocation38_spill] sm:$0xff] %v4989_v10  ;;  %v4995_v11 = vsel %vm3491_vm3, 4294967295, %v4994_v11  ;;  %v4997_v31 = vmov 0  ;;  %v1183_v39 = vsel %vm3449_vm8, %v3222_v38, %v1159_v16  ;;  %v1184_v32 = vsel %vm3454_vm0, %v3225_v42, %v1160_v23 }
 0x349   :  { %4993 = vst [vmem:[#allocation39_spill] sm:$0xff] %v4992_v8  ;;  %v4998_v31 = vsel %vm3496_vm6, 4294967295, %v4997_v31  ;;  %v1185_v61 = vsel %vm3459_vm13, %v3228_v48, %v1161_v57  ;;  %v1186_v6 = vsel %vm3464_vm10, %v3231_v59, %v1162_v22  ;;  %v1187_v13 = vsel %vm3481_vm2, %v3234_v21, %v1163_v47 }
 0x34a   :  { %4996 = vst [vmem:[#allocation40_spill] sm:$0xff] %v4995_v11  ;;  %v1188_v16 = vsel %vm3486_vm1, %v3236_v25, %v1164_v12  ;;  %v1189_v23 = vsel %vm3491_vm3, %v3238_v46, %v1165_v55  ;;  %v1190_v57 = vsel %vm3496_vm6, %v3240_v4, %v1166_v34  ;;  %v5000_v24 = vand.u32 2147483647, %v2889_v27 }
 0x34b   :  { %4999 = vst [vmem:[#allocation41_spill] sm:$0xff] %v4998_v31  ;;  %v5001_v22 = vmov 0  ;;  %v5003_v47 = vand.u32 2147483647, %v2864_v56  ;;  %v5004_v10 = vmov 0  ;;  %v1215_v12 = vrot.slane %v1183_v39, 7 }
 0x34c   :  { %vm3526_vm13 = vcmp.eq.f32.partialorder %v5000_v24, 8.507059e+37  ;;  %v1216_v8 = vrot.slane %v1184_v32, 7  ;;  %v1217_v11 = vrot.slane %v1185_v61, 7  ;;  %v1218_v55 = vrot.slane %v1186_v6, 7 }
 0x34d   :  { %v5002_v22 = vsel %vm3526_vm13, 4294967295, %v5001_v22  ;;  %vm3532_vm2 = vcmp.eq.f32.partialorder %v5003_v47, 8.507059e+37  ;;  %v1219_v26 = vrot.slane %v1187_v13, 7  ;;  %v1220_v29 = vrot.slane %v1188_v16, 7 }
 0x34e   :  { %v5005_v10 = vsel %vm3532_vm2, 4294967295, %v5004_v10  ;;  %v1221_v31 = vrot.slane %v1189_v23, 7  ;;  %v1222_v34 = vrot.slane %v1190_v57, 7  ;;  %v5006_v18 = vand.u32 2147483647, %v2872_v60 }
 0x34f   :  { %v5007_v24 = vmov 0  ;;  %v5009_v30 = vand.u32 2147483647, %v2922_v0  ;;  %v5010_v47 = vmov 0  ;;  %vm3549_vm1 = vcmp.gt.f32.partialorder %v3222_v38, %v1215_v12 }
 0x350   :  { %vm3538_vm6 = vcmp.eq.f32.partialorder %v5006_v18, 8.507059e+37  ;;  %vm3554_vm10 = vcmp.gt.f32.partialorder %v3225_v42, %v1216_v8  ;;  %v5014_v13 = vmov 0  ;;  %vm3559_vm0 = vcmp.gt.f32.partialorder %v3228_v48, %v1217_v11 }
 0x351   :  { %v5008_v24 = vsel %vm3538_vm6, 4294967295, %v5007_v24  ;;  %vm3544_vm3 = vcmp.eq.f32.partialorder %v5009_v30, 8.507059e+37  ;;  %v5015_v13 = vsel %vm3554_vm10, 4294967295, %v5014_v13  ;;  %v5017_v6 = vmov 0 }
 0x352   :  { %v5011_v47 = vsel %vm3544_vm3, 4294967295, %v5010_v47  ;;  %5016 = vst [vmem:[#allocation42_spill] sm:$0xff] %v5015_v13  ;;  %v5018_v6 = vsel %vm3559_vm0, 4294967295, %v5017_v6  ;;  %vm3564_vm8 = vcmp.gt.f32.partialorder %v3231_v59, %v1218_v55  ;;  %v5020_v0 = vmov 0 }
 0x353   :  { %5019 = vst [vmem:[#allocation43_spill] sm:$0xff] %v5018_v6  ;;  %v5021_v0 = vsel %vm3564_vm8, 4294967295, %v5020_v0  ;;  %v5023_v30 = vand.u32 2147483647, %v2928_v40  ;;  %v5024_v18 = vmov 0  ;;  %v5027_v32 = vmov 0 }
 0x354   :  { %5022 = vst [vmem:[#allocation44_spill] sm:$0xff] %v5021_v0  ;;  %v5026_v39 = vand.u32 2147483647, %v2935_v43  ;;  %vm3581_vm14 = vcmp.gt.f32.partialorder %v3234_v21, %v1219_v26  ;;  %v5030_v16 = vmov 0  ;;  %vm3586_vm3 = vcmp.gt.f32.partialorder %v3236_v25, %v1220_v29 }
 0x355   :  { %vm3570_vm7 = vcmp.eq.f32.partialorder %v5023_v30, 8.507059e+37  ;;  %v5031_v16 = vsel %vm3581_vm14, 4294967295, %v5030_v16  ;;  %v5032_v23 = vmov 0  ;;  %vm3591_vm4 = vcmp.gt.f32.partialorder %v3238_v46, %v1221_v31 }
 0x356   :  { %v5025_v18 = vsel %vm3570_vm7, 4294967295, %v5024_v18  ;;  %vm3576_vm15 = vcmp.eq.f32.partialorder %v5026_v39, 8.507059e+37  ;;  %v5033_v23 = vsel %vm3586_vm3, 4294967295, %v5032_v23  ;;  %v5035_v40 = vmov 0 }
 0x357   :  { %v5028_v32 = vsel %vm3576_vm15, 4294967295, %v5027_v32  ;;  %5034 = vst [vmem:[#allocation46_spill] sm:$0xff] %v5033_v23  ;;  %v5036_v40 = vsel %vm3591_vm4, 4294967295, %v5035_v40  ;;  %vm3596_vm7 = vcmp.gt.f32.partialorder %v3240_v4, %v1222_v34  ;;  %v5038_v43 = vmov 0 }
 0x358   :  { %5029 = vst [vmem:[#allocation45_spill] sm:$0xff] %v5028_v32  ;;  %v5039_v43 = vsel %vm3596_vm7, 4294967295, %v5038_v43  ;;  %vm5040_vm15 = vweird.f32 %v2924_v36  ;;  %vm5041_vm6 = vweird.f32 %v2864_v56  ;;  %v1239_v30 = vsel %vm3549_vm1, %v3222_v38, %v1215_v12 }
 0x359   :  { %5037 = vst [vmem:[#allocation47_spill] sm:$0xff] %v5036_v40  ;;  %vm3604_vm2 = vmor %vm5041_vm6, %vm5040_vm15  ;;  %v1240_v39 = vsel %vm3554_vm10, %v3225_v42, %v1216_v8  ;;  %v1241_v32 = vsel %vm3559_vm0, %v3228_v48, %v1217_v11  ;;  %v1242_v56 = vsel %vm3564_vm8, %v3231_v59, %v1218_v55  ;;  %vm5044_vm15 = vweird.f32 %v2951_v54 }
 0x35a   :  { %vm5045_vm6 = vweird.f32 %v2889_v27  ;;  %v1243_v8 = vsel %vm3581_vm14, %v3234_v21, %v1219_v26  ;;  %v1244_v11 = vsel %vm3586_vm3, %v3236_v25, %v1220_v29  ;;  %v1245_v12 = vsel %vm3591_vm4, %v3238_v46, %v1221_v31  ;;  %v5104_v26 = vld [vmem:[#allocation18_spill] sm:$0xff] }
 0x35b   :  { %vm3624_vm13 = vmor %vm5045_vm6, %vm5044_vm15  ;;  %v1246_v27 = vsel %vm3596_vm7, %v3240_v4, %v1222_v34  ;;  %v1271_v55 = vrot.slane %v1239_v30, 7  ;;  %v1272_v0 = vrot.slane %v1240_v39, 7  ;;  %v1273_v6 = vrot.slane %v1241_v32, 7 }
 0x35c   :  { %v1274_v13 = vrot.slane %v1242_v56, 7  ;;  %vm5048_vm15 = vweird.f32 %v2930_v41  ;;  %vm5049_vm6 = vweird.f32 %v2872_v60  ;;  %v1275_v29 = vrot.slane %v1243_v8, 7 }
 0x35d   :  { %vm3644_vm14 = vmor %vm5049_vm6, %vm5048_vm15  ;;  %v1276_v23 = vrot.slane %v1244_v11, 7  ;;  %v1277_v40 = vrot.slane %v1245_v12, 7  ;;  %v1278_v31 = vrot.slane %v1246_v27, 7  ;;  %v5052_v34 = vsel %vm3137_vm9, %v2824_v2, %v2970_v9 }
 0x35e   :  { %v1443_v32 = vsel %vm3470_vm5, %v2902_v19, %v5052_v34  ;;  %v5053_v60 = vsel %vm3093_vm12, %v2820_v35, %v2919_v63  ;;  %v1468_v5 = vsel %vm3624_vm13, %v2951_v54, %v3178_v15  ;;  %v1483_v2 = vsel %vm3604_vm2, %v2924_v36, %v3067_v14 }
 0x35f   :  { %v1458_v30 = vsel %vm3476_vm11, %v2883_v20, %v5053_v60  ;;  %vm3673_vm9 = vcmp.gt.f32.partialorder %v3222_v38, %v1271_v55  ;;  %vm3678_vm12 = vcmp.gt.f32.partialorder %v3225_v42, %v1272_v0  ;;  %vm3683_vm11 = vcmp.gt.f32.partialorder %v3228_v48, %v1273_v6  ;;  %v5086_v8 = vld [vmem:[#allocation45_spill] sm:$0xff] }
 0x360   :  { %vm3688_vm13 = vcmp.gt.f32.partialorder %v3231_v59, %v1274_v13  ;;  %vm3693_vm2 = vcmp.gt.f32.partialorder %v3234_v21, %v1275_v29  ;;  %vm3698_vm5 = vcmp.gt.f32.partialorder %v3236_v25, %v1276_v23  ;;  %v5064_v54 = vmov 0 }
 0x361   :  { %v5065_v54 = vsel %vm3698_vm5, 4294967295, %v5064_v54  ;;  %v5066_v9 = vlaneseq  ;;  %v1498_v45 = vsel %vm3644_vm14, %v2930_v41, %v3073_v3  ;;  %vm3708_vm15 = vcmp.gt.f32.partialorder %v3238_v46, %v1277_v40 }
 0x362   :  { %v5067_v15 = vmov 0  ;;  %vm3713_vm6 = vcmp.gt.f32.partialorder %v3240_v4, %v1278_v31  ;;  %vm5071_vm7 = vnez %v5002_v22  ;;  %vm5072_vm4 = vnez %v5005_v10  ;;  %v827_v22 = vpop.xlane.xlu0 %826 }
 0x363   :  { %v797_v14 = vshrl.u32 %v5066_v9, 7  ;;  %v5068_v15 = vsel %vm3708_vm15, 4294967295, %v5067_v15  ;;  %v5070_v17 = vsel %vm3713_vm6, 4294967295, %v5069_v17  ;;  %v1473_v62 = vsel %vm5071_vm7, %v3035_v50, %v1468_v5 }
 0x364   :  { %v1488_v53 = vsel %vm5072_vm4, %v3024_v33, %v1483_v2  ;;  %v3726_v41 = vsel %vm3673_vm9, %v3222_v38, %v1271_v55  ;;  %v3731_v3 = vsel %vm3678_vm12, %v3225_v42, %v1272_v0  ;;  %v3736_v57 = vsel %vm3683_vm11, %v3228_v48, %v1273_v6  ;;  %v1395_v0 = vpop.xlane.xlu1 %1394 }
 0x365   :  { %v3741_v50 = vsel %vm3688_vm13, %v3231_v59, %v1274_v13  ;;  %v3746_v33 = vsel %vm3693_vm2, %v3234_v21, %v1275_v29  ;;  %v3751_v10 = vsel %vm3698_vm5, %v3236_v25, %v1276_v23  ;;  %vm5073_vm4 = vnez %v5008_v24  ;;  %v5083_v24 = vld [vmem:[#allocation7_spill] sm:$0xff] }
 0x366   :  { %v1503_v6 = vsel %vm5073_vm4, %v3069_v51, %v1498_v45  ;;  %vm5074_vm14 = vnez %v4890_v49  ;;  %vm5076_vm7 = vnez %v5011_v47  ;;  %v3767_v23 = vsel %vm3708_vm15, %v3238_v46, %v1277_v40  ;;  %v1393_v51 = vpop.xlane.xlu2 %1392  ;;  %v5080_v49 = vld [vmem:[#allocation8_spill] sm:$0xff]  ;;  %v5085_v40 = vld [vmem:[#allocation9_spill] sm:$0xff] }
 0x367   :  { %v5075_v13 = vsel %vm5074_vm14, %v3002_v7, %v3149_v44  ;;  %v3772_v56 = vsel %vm3713_vm6, %v3240_v4, %v1278_v31  ;;  %vm5077_vm4 = vnez %v4892_v58  ;;  %vm5079_vm14 = vnez %v5025_v18 }
 0x368   :  { %v1518_v39 = vsel %vm5076_vm7, %v3181_v1, %v5075_v13  ;;  %v5078_v7 = vsel %vm5077_vm4, %v3019_v37, %v3160_v52  ;;  %vm5081_vm7 = vnez %v5080_v49  ;;  %v5082_v1 = vld [vmem:[#allocation6_spill] sm:$0xff]  ;;  %vm5087_vm15 = vnez %v5086_v8  ;;  %v5090_v49 = vld [vmem:[#allocation11_spill] sm:$0xff]  ;;  %v5108_v52 = vld [vmem:[#allocation20_spill] sm:$0xff] }
 0x369   :  { %v1533_v44 = vsel %vm5079_vm14, %v3194_v28, %v5078_v7  ;;  %v5084_v47 = vsel %vm5081_vm7, %v5082_v1, %v5083_v24  ;;  %v1327_v12 = vrot.slane %v3726_v41, 7  ;;  %v1328_v58 = vrot.slane %v3731_v3, 7  ;;  %v5092_v24 = vld [vmem:[#allocation12_spill] sm:$0xff]  ;;  %v5106_v28 = vld [vmem:[#allocation19_spill] sm:$0xff]  ;;  %v5152_v41 = vld [vmem:[#allocation38_spill] sm:$0xff] }
 0x36a   :  { %v1548_v11 = vsel %vm5087_vm15, %v5085_v40, %v5084_v47  ;;  %v1329_v27 = vrot.slane %v3736_v57, 7  ;;  %v1330_v37 = vrot.slane %v3741_v50, 7  ;;  %v828_v18 = vmul.u32 1000, %v827_v22  ;;  %v5094_v40 = vld [vmem:[#allocation13_spill] sm:$0xff]  ;;  %v5154_v3 = vld [vmem:[#allocation39_spill] sm:$0xff] }
 0x36b   :  { %v1396_v55 = vmul.u32 1000, %v1395_v0  ;;  %v3798_v31 = vmul.f32 %v1443_v32, %v1393_v51  ;;  %v3800_v34 = vmul.f32 %v1458_v30, %v1393_v51  ;;  %v3806_v2 = vmul.f32 %v1473_v62, %v1393_v51 }
 0x36c   :  { %v3802_v60 = vadd.s32 %v828_v18, %v797_v14  ;;  %v3808_v9 = vmul.f32 %v1488_v53, %v1393_v51  ;;  %v3810_v45 = vmul.f32 %v1503_v6, %v1393_v51  ;;  %v3812_v22 = vmul.f32 %v1518_v39, %v1393_v51  ;;  %v5100_v39 = vld [vmem:[#allocation16_spill] sm:$0xff]  ;;  %v5102_v6 = vld [vmem:[#allocation17_spill] sm:$0xff] }
 0x36d   :  { %v3804_v5 = vadd.s32 %v1396_v55, %v797_v14  ;;  %v3814_v0 = vmul.f32 %v1533_v44, %v1393_v51  ;;  %v3816_v13 = vmul.f32 %v1548_v11, %v1393_v51  ;;  %v5088_v44 = vld [vmem:[#allocation10_spill] sm:$0xff]  ;;  %vm5091_vm4 = vnez %v5090_v49  ;;  %v5098_v55 = vld [vmem:[#allocation15_spill] sm:$0xff] }
 0x36e   :  { %v1030_v32 = vrot.slane %v3802_v60, 7  ;;  %vm5089_vm15 = vnez %v5088_v44  ;;  %vm5093_vm14 = vnez %v5092_v24  ;;  %vm5095_vm7 = vnez %v5094_v40  ;;  %v5096_v11 = vld [vmem:[#allocation14_spill] sm:$0xff] }
 0x36f   :  { %vm5097_vm6 = vnez %v5096_v11  ;;  %vm5099_vm5 = vnez %v5098_v55 }
 0x370   :  { %v1031_v51 = vsel %vm5089_vm15, %v3802_v60, %v1030_v32  ;;  %v1032_v1 = vsel %vm5091_vm4, %v3802_v60, %v1030_v32  ;;  %v1033_v47 = vsel %vm5093_vm14, %v3802_v60, %v1030_v32  ;;  %v1034_v8 = vsel %vm5095_vm7, %v3802_v60, %v1030_v32 }
 0x371   :  { %v1035_v18 = vsel %vm5097_vm6, %v3802_v60, %v1030_v32  ;;  %v1036_v44 = vsel %vm5099_vm5, %v3802_v60, %v1030_v32  ;;  %vm5101_vm15 = vnez %v5100_v39  ;;  %vm5103_vm4 = vnez %v5102_v6  ;;  %v5110_v6 = vld [vmem:[#allocation21_spill] sm:$0xff] }
 0x372   :  { %v1037_v49 = vsel %vm5101_vm15, %v3802_v60, %v1030_v32  ;;  %v1038_v24 = vsel %vm5103_vm4, %v3802_v60, %v1030_v32  ;;  %v1079_v53 = vrot.slane %v1031_v51, 7  ;;  %v1080_v62 = vrot.slane %v1032_v1, 7  ;;  %v5112_v1 = vld [vmem:[#allocation22_spill] sm:$0xff] }
 0x373   :  { %v1081_v40 = vrot.slane %v1033_v47, 7  ;;  %v1082_v14 = vrot.slane %v1034_v8, 7  ;;  %v1083_v7 = vrot.slane %v1035_v18, 7  ;;  %v1084_v30 = vrot.slane %v1036_v44, 7  ;;  %v5114_v8 = vld [vmem:[#allocation23_spill] sm:$0xff] }
 0x374   :  { %v1085_v11 = vrot.slane %v1037_v49, 7  ;;  %v1086_v29 = vrot.slane %v1038_v24, 7  ;;  %vm5105_vm6 = vnez %v5104_v26  ;;  %vm5107_vm5 = vnez %v5106_v28 }
 0x375   :  { %v1087_v55 = vsel %vm5105_vm6, %v3802_v60, %v1079_v53  ;;  %v1088_v39 = vsel %vm5107_vm5, %v3802_v60, %v1080_v62  ;;  %vm5109_vm14 = vnez %v5108_v52  ;;  %vm5111_vm7 = vnez %v5110_v6  ;;  %v5116_v53 = vld [vmem:[#allocation24_spill] sm:$0xff]  ;;  %v5118_v62 = vld [vmem:[#allocation25_spill] sm:$0xff] }
 0x376   :  { %v1089_v32 = vsel %vm5109_vm14, %v3802_v60, %v1081_v40  ;;  %v1090_v51 = vsel %vm5111_vm7, %v3802_v60, %v1082_v14  ;;  %vm5113_vm15 = vnez %v5112_v1  ;;  %vm5115_vm4 = vnez %v5114_v8  ;;  %v5120_v1 = vld [vmem:[#allocation26_spill] sm:$0xff]  ;;  %v5122_v8 = vld [vmem:[#allocation27_spill] sm:$0xff] }
 0x377   :  { %v1091_v47 = vsel %vm5113_vm15, %v3802_v60, %v1083_v7  ;;  %v1092_v26 = vsel %vm5115_vm4, %v3802_v60, %v1084_v30  ;;  %vm5117_vm6 = vnez %v5116_v53  ;;  %vm5119_vm5 = vnez %v5118_v62  ;;  %v5124_v53 = vld [vmem:[#allocation28_spill] sm:$0xff] }
 0x378   :  { %v1093_v28 = vsel %vm5117_vm6, %v3802_v60, %v1085_v11  ;;  %v1094_v52 = vsel %vm5119_vm5, %v3802_v60, %v1086_v29  ;;  %v1135_v18 = vrot.slane %v1087_v55, 7  ;;  %v1136_v44 = vrot.slane %v1088_v39, 7  ;;  %v5126_v55 = vld [vmem:[#allocation29_spill] sm:$0xff] }
 0x379   :  { %v1137_v49 = vrot.slane %v1089_v32, 7  ;;  %v1138_v14 = vrot.slane %v1090_v51, 7  ;;  %v1139_v24 = vrot.slane %v1091_v47, 7  ;;  %v1140_v40 = vrot.slane %v1092_v26, 7  ;;  %v5128_v32 = vld [vmem:[#allocation30_spill] sm:$0xff]  ;;  %v5130_v47 = vld [vmem:[#allocation31_spill] sm:$0xff] }
 0x37a   :  { %v1141_v6 = vrot.slane %v1093_v28, 7  ;;  %v1142_v7 = vrot.slane %v1094_v52, 7  ;;  %vm5121_vm14 = vnez %v5120_v1  ;;  %vm5123_vm7 = vnez %v5122_v8  ;;  %v5132_v28 = vld [vmem:[#allocation32_spill] sm:$0xff]  ;;  %v5134_v52 = vld [vmem:[#allocation33_spill] sm:$0xff] }
 0x37b   :  { %v1143_v30 = vsel %vm5121_vm14, %v3802_v60, %v1135_v18  ;;  %v1144_v11 = vsel %vm5123_vm7, %v3802_v60, %v1136_v44  ;;  %vm5125_vm15 = vnez %v5124_v53  ;;  %vm5127_vm4 = vnez %v5126_v55 }
 0x37c   :  { %v1145_v29 = vsel %vm5125_vm15, %v3802_v60, %v1137_v49  ;;  %v1146_v39 = vsel %vm5127_vm4, %v3802_v60, %v1138_v14  ;;  %vm5129_vm6 = vnez %v5128_v32  ;;  %vm5131_vm5 = vnez %v5130_v47  ;;  %v5136_v32 = vld [vmem:[#allocation34_spill] sm:$0xff]  ;;  %v5138_v47 = vld [vmem:[#allocation35_spill] sm:$0xff] }
 0x37d   :  { %v1147_v51 = vsel %vm5129_vm6, %v3802_v60, %v1139_v24  ;;  %v1148_v26 = vsel %vm5131_vm5, %v3802_v60, %v1140_v40  ;;  %vm5133_vm14 = vnez %v5132_v28  ;;  %vm5135_vm7 = vnez %v5134_v52  ;;  %v5140_v28 = vld [vmem:[#allocation36_spill] sm:$0xff] }
 0x37e   :  { %v1149_v62 = vsel %vm5133_vm14, %v3802_v60, %v1141_v6  ;;  %v1150_v18 = vsel %vm5135_vm7, %v3802_v60, %v1142_v7  ;;  %v1191_v44 = vrot.slane %v1143_v30, 7  ;;  %v1192_v49 = vrot.slane %v1144_v11, 7  ;;  %v5142_v30 = vld [vmem:[#allocation37_spill] sm:$0xff] }
 0x37f   :  { %v1193_v1 = vrot.slane %v1145_v29, 7  ;;  %v1194_v14 = vrot.slane %v1146_v39, 7  ;;  %v1195_v8 = vrot.slane %v1147_v51, 7  ;;  %v1196_v53 = vrot.slane %v1148_v26, 7 }
 0x380   :  { %v1197_v55 = vrot.slane %v1149_v62, 7  ;;  %v1198_v24 = vrot.slane %v1150_v18, 7  ;;  %vm5137_vm15 = vnez %v5136_v32  ;;  %vm5139_vm4 = vnez %v5138_v47  ;;  %v5177_v47 = vld [vmem:[#allocation47_spill] sm:$0xff] }
 0x381   :  { %v1199_v40 = vsel %vm5137_vm15, %v3802_v60, %v1191_v44  ;;  %v1200_v6 = vsel %vm5139_vm4, %v3802_v60, %v1192_v49  ;;  %vm5141_vm6 = vnez %v5140_v28  ;;  %vm5143_vm5 = vnez %v5142_v30 }
 0x382   :  { %v1201_v7 = vsel %vm5141_vm6, %v3802_v60, %v1193_v1  ;;  %v1202_v11 = vsel %vm5143_vm5, %v3802_v60, %v1194_v14  ;;  %vm3913_vm14 = vcmp.gt.f32.partialorder %v3222_v38, %v1327_v12  ;;  %vm3920_vm7 = vcmp.gt.f32.partialorder %v3225_v42, %v1328_v58  ;;  %v5158_v58 = vld [vmem:[#allocation41_spill] sm:$0xff] }
 0x383   :  { %v5146_v39 = vmov 0  ;;  %vm3927_vm15 = vcmp.gt.f32.partialorder %v3228_v48, %v1329_v27  ;;  %v5148_v51 = vmov 0  ;;  %vm3934_vm4 = vcmp.gt.f32.partialorder %v3231_v59, %v1330_v37  ;;  %v5156_v48 = vld [vmem:[#allocation40_spill] sm:$0xff] }
 0x384   :  { %v5147_v39 = vsel %vm3920_vm7, 4294967295, %v5146_v39  ;;  %v5149_v51 = vsel %vm3927_vm15, 4294967295, %v5148_v51  ;;  %v5150_v38 = vmov 0  ;;  %vm5153_vm6 = vnez %v5152_v41 }
 0x385   :  { %v5151_v38 = vsel %vm3934_vm4, 4294967295, %v5150_v38  ;;  %v1203_v42 = vsel %vm5153_vm6, %v3802_v60, %v1195_v8  ;;  %vm5155_vm5 = vnez %v5154_v3  ;;  %vm5157_vm7 = vnez %v5156_v48 }
 0x386   :  { %v1204_v57 = vsel %vm5155_vm5, %v3802_v60, %v1196_v53  ;;  %v1205_v12 = vsel %vm5157_vm7, %v3802_v60, %v1197_v55  ;;  %vm5159_vm15 = vnez %v5158_v58  ;;  %v5160_v59 = vrot.slane %v3746_v33, 7 }
 0x387   :  { %v1206_v50 = vsel %vm5159_vm15, %v3802_v60, %v1198_v24  ;;  %v5163_v37 = vrot.slane %v3751_v10, 7  ;;  %v5164_v26 = vmov 0  ;;  %v5166_v62 = vrot.slane %v3767_v23, 7 }
 0x388   :  { %vm3953_vm4 = vcmp.gt.f32.partialorder %v3234_v21, %v5160_v59  ;;  %v5167_v52 = vmov 0  ;;  %v5169_v33 = vrot.slane %v3772_v56, 7  ;;  %v5170_v21 = vmov 0 }
 0x389   :  { %vm3960_vm6 = vcmp.gt.f32.partialorder %v3236_v25, %v5163_v37  ;;  %vm3967_vm7 = vcmp.gt.f32.partialorder %v3238_v46, %v5166_v62  ;;  %v1247_v10 = vrot.slane %v1199_v40, 7  ;;  %v1248_v18 = vrot.slane %v1200_v6, 7 }
 0x38a   :  { %v5165_v26 = vsel %vm3960_vm6, 4294967295, %v5164_v26  ;;  %v5168_v52 = vsel %vm3967_vm7, 4294967295, %v5167_v52  ;;  %vm3974_vm15 = vcmp.gt.f32.partialorder %v3240_v4, %v5169_v33  ;;  %v1249_v25 = vrot.slane %v1201_v7, 7 }
 0x38b   :  { %v5171_v21 = vsel %vm3974_vm15, 4294967295, %v5170_v21  ;;  %v1250_v44 = vrot.slane %v1202_v11, 7  ;;  %v1251_v49 = vrot.slane %v1203_v42, 7  ;;  %v1252_v1 = vrot.slane %v1204_v57, 7 }
 0x38c   :  { %v1253_v14 = vrot.slane %v1205_v12, 7  ;;  %v1254_v23 = vrot.slane %v1206_v50, 7  ;;  %v1255_v46 = vsel %vm3549_vm1, %v3802_v60, %v1247_v10  ;;  %v1256_v56 = vsel %vm3554_vm10, %v3802_v60, %v1248_v18 }
 0x38d   :  { %v1257_v53 = vsel %vm3559_vm0, %v3802_v60, %v1249_v25  ;;  %v1258_v24 = vsel %vm3564_vm8, %v3802_v60, %v1250_v44  ;;  %vm5175_vm5 = vnez %v5031_v16  ;;  %v1260_v61 = vsel %vm3586_vm3, %v3802_v60, %v1252_v1 }
 0x38e   :  { %v1259_v32 = vsel %vm5175_vm5, %v3802_v60, %v1251_v49  ;;  %vm5178_vm1 = vnez %v5177_v47  ;;  %vm5179_vm10 = vnez %v5039_v43  ;;  %v1303_v7 = vrot.slane %v1255_v46, 7 }
 0x38f   :  { %v1261_v6 = vsel %vm5178_vm1, %v3802_v60, %v1253_v14  ;;  %v1262_v28 = vsel %vm5179_vm10, %v3802_v60, %v1254_v23  ;;  %v1304_v30 = vrot.slane %v1256_v56, 7  ;;  %v1305_v11 = vrot.slane %v1257_v53, 7 }
 0x390   :  { %v1306_v41 = vrot.slane %v1258_v24, 7  ;;  %v1307_v42 = vrot.slane %v1259_v32, 7  ;;  %v1308_v3 = vrot.slane %v1260_v61, 7  ;;  %v1309_v16 = vrot.slane %v1261_v6, 7 }
 0x391   :  { %v1310_v57 = vrot.slane %v1262_v28, 7  ;;  %v1311_v48 = vsel %vm3673_vm9, %v3802_v60, %v1303_v7  ;;  %v1312_v12 = vsel %vm3678_vm12, %v3802_v60, %v1304_v30  ;;  %v1313_v43 = vsel %vm3683_vm11, %v3802_v60, %v1305_v11 }
 0x392   :  { %v1314_v58 = vsel %vm3688_vm13, %v3802_v60, %v1306_v41  ;;  %v1315_v50 = vsel %vm3693_vm2, %v3802_v60, %v1307_v42  ;;  %vm5180_vm0 = vnez %v5065_v54  ;;  %vm5181_vm3 = vnez %v5068_v15 }
 0x393   :  { %v1316_v19 = vsel %vm5180_vm0, %v3802_v60, %v1308_v3  ;;  %v1317_v35 = vsel %vm5181_vm3, %v3802_v60, %v1309_v16  ;;  %vm5182_vm8 = vnez %v5070_v17  ;;  %v4026_v59 = vrot.slane %v1311_v48, 7 }
 0x394   :  { %v1318_v20 = vsel %vm5182_vm8, %v3802_v60, %v1310_v57  ;;  %v4028_v63 = vrot.slane %v1312_v12, 7  ;;  %v4030_v37 = vrot.slane %v1313_v43, 7  ;;  %v4032_v36 = vrot.slane %v1314_v58, 7 }
 0x395   :  { %v4034_v62 = vrot.slane %v1315_v50, 7  ;;  %v4036_v54 = vrot.slane %v1316_v19, 7  ;;  %v4038_v33 = vrot.slane %v1317_v35, 7  ;;  %v4040_v15 = vrot.slane %v1318_v20, 7 }
 0x396   :  { %v1359_v17 = vsel %vm3913_vm14, %v3802_v60, %v4026_v59  ;;  %vm5183_vm9 = vnez %v5147_v39  ;;  %vm5184_vm12 = vnez %v5149_v51  ;;  %vm5185_vm11 = vnez %v5151_v38 }
 0x397   :  { %v1360_v10 = vsel %vm5183_vm9, %v3802_v60, %v4028_v63  ;;  %v1361_v18 = vsel %vm5184_vm12, %v3802_v60, %v4030_v37  ;;  %v1573_v23 = vrot.slane %v3816_v13, 7  ;;  %v5186_v46 = vrot.slane %v3798_v31, 7 }
 0x398   :  { %v5189_v56 = vrot.slane %v3800_v34, 7  ;;  %v5192_v53 = vrot.slane %v3806_v2, 7  ;;  %v5195_v24 = vrot.slane %v3808_v9, 7  ;;  %v5198_v40 = vrot.slane %v3810_v45, 7 }
 0x399   :  { %vm4078_vm13 = vcmp.gt.f32.partialorder %v3798_v31, %v5186_v46  ;;  %v5201_v47 = vrot.slane %v3812_v22, 7  ;;  %v5204_v28 = vrot.slane %v3814_v0, 7  ;;  %vm4125_vm8 = vcmp.gt.f32.partialorder %v3816_v13, %v1573_v23 }
 0x39a   :  { %vm4085_vm2 = vcmp.gt.f32.partialorder %v3800_v34, %v5189_v56  ;;  %vm4092_vm5 = vcmp.gt.f32.partialorder %v3806_v2, %v5192_v53  ;;  %vm4099_vm1 = vcmp.gt.f32.partialorder %v3808_v9, %v5195_v24  ;;  %vm4106_vm10 = vcmp.gt.f32.partialorder %v3810_v45, %v5198_v40 }
 0x39b   :  { %vm4113_vm0 = vcmp.gt.f32.partialorder %v3812_v22, %v5201_v47  ;;  %vm4120_vm3 = vcmp.gt.f32.partialorder %v3814_v0, %v5204_v28  ;;  %v5209_v11 = vmov %v5186_v46  ;;  %v5210_v42 = vmov %v5189_v56 }
 0x39c   :  { %v1590_v41 = vsel %vm4078_vm13, %v3798_v31, %v5209_v11  ;;  %v1591_v3 = vsel %vm4085_vm2, %v3800_v34, %v5210_v42  ;;  %v5211_v16 = vmov %v5192_v53  ;;  %v5212_v48 = vmov %v5195_v24 }
 0x39d   :  { %v1592_v57 = vsel %vm4092_vm5, %v3806_v2, %v5211_v16  ;;  %v1593_v12 = vsel %vm4099_vm1, %v3808_v9, %v5212_v48  ;;  %v5213_v43 = vmov %v5198_v40  ;;  %v5214_v50 = vmov %v5201_v47 }
 0x39e   :  { %v1594_v58 = vsel %vm4106_vm10, %v3810_v45, %v5213_v43  ;;  %v1595_v19 = vsel %vm4113_vm0, %v3812_v22, %v5214_v50  ;;  %v5215_v35 = vmov %v5204_v28  ;;  %v1597_v46 = vsel %vm4125_vm8, %v3816_v13, %v1573_v23 }
 0x39f   :  { %v1596_v20 = vsel %vm4120_vm3, %v3814_v0, %v5215_v35  ;;  %v1598_v56 = vrot.slane %v3804_v5, 7  ;;  %v1615_v53 = vrot.slane %v1590_v41, 7  ;;  %v1616_v24 = vrot.slane %v1591_v3, 7 }
 0x3a0   :  { %v1617_v40 = vrot.slane %v1592_v57, 7  ;;  %v1618_v47 = vrot.slane %v1593_v12, 7  ;;  %v1619_v28 = vrot.slane %v1594_v58, 7  ;;  %v1620_v11 = vrot.slane %v1595_v19, 7 }
 0x3a1   :  { %v1599_v42 = vsel %vm4078_vm13, %v3804_v5, %v1598_v56  ;;  %v1600_v16 = vsel %vm4085_vm2, %v3804_v5, %v1598_v56  ;;  %v1601_v23 = vsel %vm4092_vm5, %v3804_v5, %v1598_v56  ;;  %v1602_v41 = vsel %vm4099_vm1, %v3804_v5, %v1598_v56 }
 0x3a2   :  { %v1603_v3 = vsel %vm4106_vm10, %v3804_v5, %v1598_v56  ;;  %v1604_v8 = vsel %vm4113_vm0, %v3804_v5, %v1598_v56  ;;  %v1605_v4 = vsel %vm4120_vm3, %v3804_v5, %v1598_v56  ;;  %v1606_v55 = vsel %vm4125_vm8, %v3804_v5, %v1598_v56 }
 0x3a3   :  { %v1621_v57 = vrot.slane %v1596_v20, 7  ;;  %v1622_v48 = vrot.slane %v1597_v46, 7  ;;  %vm4193_vm13 = vcmp.gt.f32.partialorder %v3798_v31, %v1615_v53  ;;  %vm4198_vm2 = vcmp.gt.f32.partialorder %v3800_v34, %v1616_v24 }
 0x3a4   :  { %vm4203_vm5 = vcmp.gt.f32.partialorder %v3806_v2, %v1617_v40  ;;  %vm4208_vm1 = vcmp.gt.f32.partialorder %v3808_v9, %v1618_v47  ;;  %vm4213_vm10 = vcmp.gt.f32.partialorder %v3810_v45, %v1619_v28  ;;  %vm4218_vm0 = vcmp.gt.f32.partialorder %v3812_v22, %v1620_v11 }
 0x3a5   :  { %vm4223_vm3 = vcmp.gt.f32.partialorder %v3814_v0, %v1621_v57  ;;  %vm4228_vm8 = vcmp.gt.f32.partialorder %v3816_v13, %v1622_v48  ;;  %v1639_v50 = vsel %vm4193_vm13, %v3798_v31, %v1615_v53  ;;  %v1640_v19 = vsel %vm4198_vm2, %v3800_v34, %v1616_v24 }
 0x3a6   :  { %v1641_v35 = vsel %vm4203_vm5, %v3806_v2, %v1617_v40  ;;  %v1642_v20 = vsel %vm4208_vm1, %v3808_v9, %v1618_v47  ;;  %v1643_v46 = vsel %vm4213_vm10, %v3810_v45, %v1619_v28  ;;  %v1644_v56 = vsel %vm4218_vm0, %v3812_v22, %v1620_v11 }
 0x3a7   :  { %v1645_v53 = vsel %vm4223_vm3, %v3814_v0, %v1621_v57  ;;  %v1646_v24 = vsel %vm4228_vm8, %v3816_v13, %v1622_v48  ;;  %v1647_v40 = vrot.slane %v1599_v42, 7  ;;  %v1648_v14 = vrot.slane %v1600_v16, 7 }
 0x3a8   :  { %v1649_v1 = vrot.slane %v1601_v23, 7  ;;  %v1650_v47 = vrot.slane %v1602_v41, 7  ;;  %v1651_v49 = vrot.slane %v1603_v3, 7  ;;  %v1652_v44 = vrot.slane %v1604_v8, 7 }
 0x3a9   :  { %v1653_v25 = vrot.slane %v1605_v4, 7  ;;  %v1654_v28 = vrot.slane %v1606_v55, 7  ;;  %v1655_v11 = vsel %vm4193_vm13, %v3804_v5, %v1647_v40  ;;  %v1656_v57 = vsel %vm4198_vm2, %v3804_v5, %v1648_v14 }
 0x3aa   :  { %v1657_v48 = vsel %vm4203_vm5, %v3804_v5, %v1649_v1  ;;  %v1658_v42 = vsel %vm4208_vm1, %v3804_v5, %v1650_v47  ;;  %v1659_v16 = vsel %vm4213_vm10, %v3804_v5, %v1651_v49  ;;  %v1660_v23 = vsel %vm4218_vm0, %v3804_v5, %v1652_v44 }
 0x3ab   :  { %v1661_v14 = vsel %vm4223_vm3, %v3804_v5, %v1653_v25  ;;  %v1662_v1 = vsel %vm4228_vm8, %v3804_v5, %v1654_v28  ;;  %v1671_v41 = vrot.slane %v1639_v50, 7  ;;  %v1672_v3 = vrot.slane %v1640_v19, 7 }
 0x3ac   :  { %v1673_v8 = vrot.slane %v1641_v35, 7  ;;  %v1674_v4 = vrot.slane %v1642_v20, 7  ;;  %v1675_v55 = vrot.slane %v1643_v46, 7  ;;  %v1676_v32 = vrot.slane %v1644_v56, 7 }
 0x3ad   :  { %v1677_v61 = vrot.slane %v1645_v53, 7  ;;  %v1678_v49 = vrot.slane %v1646_v24, 7  ;;  %vm4281_vm13 = vcmp.gt.f32.partialorder %v3798_v31, %v1671_v41  ;;  %vm4286_vm2 = vcmp.gt.f32.partialorder %v3800_v34, %v1672_v3 }
 0x3ae   :  { %vm4291_vm5 = vcmp.gt.f32.partialorder %v3806_v2, %v1673_v8  ;;  %vm4296_vm1 = vcmp.gt.f32.partialorder %v3808_v9, %v1674_v4  ;;  %vm4301_vm10 = vcmp.gt.f32.partialorder %v3810_v45, %v1675_v55  ;;  %vm4306_vm0 = vcmp.gt.f32.partialorder %v3812_v22, %v1676_v32 }
 0x3af   :  { %vm4311_vm3 = vcmp.gt.f32.partialorder %v3814_v0, %v1677_v61  ;;  %vm4316_vm8 = vcmp.gt.f32.partialorder %v3816_v13, %v1678_v49  ;;  %v1695_v50 = vsel %vm4281_vm13, %v3798_v31, %v1671_v41  ;;  %v1696_v19 = vsel %vm4286_vm2, %v3800_v34, %v1672_v3 }
 0x3b0   :  { %v1697_v35 = vsel %vm4291_vm5, %v3806_v2, %v1673_v8  ;;  %v1698_v20 = vsel %vm4296_vm1, %v3808_v9, %v1674_v4  ;;  %v1699_v46 = vsel %vm4301_vm10, %v3810_v45, %v1675_v55  ;;  %v1700_v56 = vsel %vm4306_vm0, %v3812_v22, %v1676_v32 }
 0x3b1   :  { %v1701_v53 = vsel %vm4311_vm3, %v3814_v0, %v1677_v61  ;;  %v1702_v24 = vsel %vm4316_vm8, %v3816_v13, %v1678_v49  ;;  %v1703_v40 = vrot.slane %v1655_v11, 7  ;;  %v1704_v47 = vrot.slane %v1656_v57, 7 }
 0x3b2   :  { %v1705_v28 = vrot.slane %v1657_v48, 7  ;;  %v1706_v41 = vrot.slane %v1658_v42, 7  ;;  %v1707_v3 = vrot.slane %v1659_v16, 7  ;;  %v1708_v8 = vrot.slane %v1660_v23, 7 }
 0x3b3   :  { %v1709_v4 = vrot.slane %v1661_v14, 7  ;;  %v1710_v55 = vrot.slane %v1662_v1, 7  ;;  %v1711_v32 = vsel %vm4281_vm13, %v3804_v5, %v1703_v40  ;;  %v1712_v61 = vsel %vm4286_vm2, %v3804_v5, %v1704_v47 }
 0x3b4   :  { %v1713_v49 = vsel %vm4291_vm5, %v3804_v5, %v1705_v28  ;;  %v1714_v11 = vsel %vm4296_vm1, %v3804_v5, %v1706_v41  ;;  %v1715_v57 = vsel %vm4301_vm10, %v3804_v5, %v1707_v3  ;;  %v1716_v48 = vsel %vm4306_vm0, %v3804_v5, %v1708_v8 }
 0x3b5   :  { %v1717_v42 = vsel %vm4311_vm3, %v3804_v5, %v1709_v4  ;;  %v1718_v16 = vsel %vm4316_vm8, %v3804_v5, %v1710_v55  ;;  %v1727_v23 = vrot.slane %v1695_v50, 7  ;;  %v1728_v14 = vrot.slane %v1696_v19, 7 }
 0x3b6   :  { %v1729_v1 = vrot.slane %v1697_v35, 7  ;;  %v1730_v6 = vrot.slane %v1698_v20, 7  ;;  %v1731_v25 = vrot.slane %v1699_v46, 7  ;;  %v1732_v44 = vrot.slane %v1700_v56, 7 }
 0x3b7   :  { %v1733_v7 = vrot.slane %v1701_v53, 7  ;;  %v1734_v30 = vrot.slane %v1702_v24, 7  ;;  %vm4369_vm13 = vcmp.gt.f32.partialorder %v3798_v31, %v1727_v23  ;;  %vm4374_vm2 = vcmp.gt.f32.partialorder %v3800_v34, %v1728_v14 }
 0x3b8   :  { %vm4379_vm5 = vcmp.gt.f32.partialorder %v3806_v2, %v1729_v1  ;;  %vm4384_vm1 = vcmp.gt.f32.partialorder %v3808_v9, %v1730_v6  ;;  %vm4389_vm10 = vcmp.gt.f32.partialorder %v3810_v45, %v1731_v25  ;;  %vm4394_vm0 = vcmp.gt.f32.partialorder %v3812_v22, %v1732_v44 }
 0x3b9   :  { %vm4399_vm3 = vcmp.gt.f32.partialorder %v3814_v0, %v1733_v7  ;;  %vm4404_vm8 = vcmp.gt.f32.partialorder %v3816_v13, %v1734_v30  ;;  %v1751_v56 = vsel %vm4369_vm13, %v3798_v31, %v1727_v23  ;;  %v1752_v53 = vsel %vm4374_vm2, %v3800_v34, %v1728_v14 }
 0x3ba   :  { %v1753_v24 = vsel %vm4379_vm5, %v3806_v2, %v1729_v1  ;;  %v1754_v40 = vsel %vm4384_vm1, %v3808_v9, %v1730_v6  ;;  %v1755_v47 = vsel %vm4389_vm10, %v3810_v45, %v1731_v25  ;;  %v1756_v28 = vsel %vm4394_vm0, %v3812_v22, %v1732_v44 }
 0x3bb   :  { %v1757_v41 = vsel %vm4399_vm3, %v3814_v0, %v1733_v7  ;;  %v1758_v3 = vsel %vm4404_vm8, %v3816_v13, %v1734_v30  ;;  %v1759_v8 = vrot.slane %v1711_v32, 7  ;;  %v1760_v4 = vrot.slane %v1712_v61, 7 }
 0x3bc   :  { %v1761_v55 = vrot.slane %v1713_v49, 7  ;;  %v1762_v23 = vrot.slane %v1714_v11, 7  ;;  %v1763_v14 = vrot.slane %v1715_v57, 7  ;;  %v1764_v1 = vrot.slane %v1716_v48, 7 }
 0x3bd   :  { %v1765_v6 = vrot.slane %v1717_v42, 7  ;;  %v1766_v25 = vrot.slane %v1718_v16, 7  ;;  %v1767_v44 = vsel %vm4369_vm13, %v3804_v5, %v1759_v8  ;;  %v1768_v7 = vsel %vm4374_vm2, %v3804_v5, %v1760_v4 }
 0x3be   :  { %v1769_v30 = vsel %vm4379_vm5, %v3804_v5, %v1761_v55  ;;  %v1770_v32 = vsel %vm4384_vm1, %v3804_v5, %v1762_v23  ;;  %v1771_v61 = vsel %vm4389_vm10, %v3804_v5, %v1763_v14  ;;  %v1772_v49 = vsel %vm4394_vm0, %v3804_v5, %v1764_v1 }
 0x3bf   :  { %v1773_v11 = vsel %vm4399_vm3, %v3804_v5, %v1765_v6  ;;  %v1774_v57 = vsel %vm4404_vm8, %v3804_v5, %v1766_v25  ;;  %v1783_v48 = vrot.slane %v1751_v56, 7  ;;  %v1784_v42 = vrot.slane %v1752_v53, 7 }
 0x3c0   :  { %v1785_v16 = vrot.slane %v1753_v24, 7  ;;  %v1786_v12 = vrot.slane %v1754_v40, 7  ;;  %v1787_v43 = vrot.slane %v1755_v47, 7  ;;  %v1788_v58 = vrot.slane %v1756_v28, 7 }
 0x3c1   :  { %v1789_v50 = vrot.slane %v1757_v41, 7  ;;  %v1790_v19 = vrot.slane %v1758_v3, 7  ;;  %vm4457_vm13 = vcmp.gt.f32.partialorder %v3798_v31, %v1783_v48  ;;  %vm4462_vm2 = vcmp.gt.f32.partialorder %v3800_v34, %v1784_v42 }
 0x3c2   :  { %vm4467_vm5 = vcmp.gt.f32.partialorder %v3806_v2, %v1785_v16  ;;  %vm4472_vm1 = vcmp.gt.f32.partialorder %v3808_v9, %v1786_v12  ;;  %vm4477_vm10 = vcmp.gt.f32.partialorder %v3810_v45, %v1787_v43  ;;  %vm4482_vm0 = vcmp.gt.f32.partialorder %v3812_v22, %v1788_v58 }
 0x3c3   :  { %vm4487_vm3 = vcmp.gt.f32.partialorder %v3814_v0, %v1789_v50  ;;  %vm4492_vm8 = vcmp.gt.f32.partialorder %v3816_v13, %v1790_v19  ;;  %v1807_v28 = vsel %vm4457_vm13, %v3798_v31, %v1783_v48  ;;  %v1808_v41 = vsel %vm4462_vm2, %v3800_v34, %v1784_v42 }
 0x3c4   :  { %v1809_v3 = vsel %vm4467_vm5, %v3806_v2, %v1785_v16  ;;  %v1810_v8 = vsel %vm4472_vm1, %v3808_v9, %v1786_v12  ;;  %v1811_v4 = vsel %vm4477_vm10, %v3810_v45, %v1787_v43  ;;  %v1812_v55 = vsel %vm4482_vm0, %v3812_v22, %v1788_v58 }
 0x3c5   :  { %v1813_v23 = vsel %vm4487_vm3, %v3814_v0, %v1789_v50  ;;  %v1814_v14 = vsel %vm4492_vm8, %v3816_v13, %v1790_v19  ;;  %v1815_v1 = vrot.slane %v1767_v44, 7  ;;  %v1816_v6 = vrot.slane %v1768_v7, 7 }
 0x3c6   :  { %v1817_v25 = vrot.slane %v1769_v30, 7  ;;  %v1818_v48 = vrot.slane %v1770_v32, 7  ;;  %v1819_v42 = vrot.slane %v1771_v61, 7  ;;  %v1820_v16 = vrot.slane %v1772_v49, 7 }
 0x3c7   :  { %v1821_v12 = vrot.slane %v1773_v11, 7  ;;  %v1822_v43 = vrot.slane %v1774_v57, 7  ;;  %v1823_v58 = vsel %vm4457_vm13, %v3804_v5, %v1815_v1  ;;  %v1824_v50 = vsel %vm4462_vm2, %v3804_v5, %v1816_v6 }
 0x3c8   :  { %v1825_v19 = vsel %vm4467_vm5, %v3804_v5, %v1817_v25  ;;  %v1826_v44 = vsel %vm4472_vm1, %v3804_v5, %v1818_v48  ;;  %v1827_v7 = vsel %vm4477_vm10, %v3804_v5, %v1819_v42  ;;  %v1828_v30 = vsel %vm4482_vm0, %v3804_v5, %v1820_v16 }
 0x3c9   :  { %v1829_v32 = vsel %vm4487_vm3, %v3804_v5, %v1821_v12  ;;  %v1830_v61 = vsel %vm4492_vm8, %v3804_v5, %v1822_v43  ;;  %v1839_v49 = vrot.slane %v1807_v28, 7  ;;  %v1840_v11 = vrot.slane %v1808_v41, 7 }
 0x3ca   :  { %v1841_v57 = vrot.slane %v1809_v3, 7  ;;  %v1842_v35 = vrot.slane %v1810_v8, 7  ;;  %v1843_v20 = vrot.slane %v1811_v4, 7  ;;  %v1844_v46 = vrot.slane %v1812_v55, 7 }
 0x3cb   :  { %v1845_v56 = vrot.slane %v1813_v23, 7  ;;  %v1846_v53 = vrot.slane %v1814_v14, 7  ;;  %vm4545_vm13 = vcmp.gt.f32.partialorder %v3798_v31, %v1839_v49  ;;  %vm4550_vm2 = vcmp.gt.f32.partialorder %v3800_v34, %v1840_v11 }
 0x3cc   :  { %vm4555_vm5 = vcmp.gt.f32.partialorder %v3806_v2, %v1841_v57  ;;  %vm4560_vm1 = vcmp.gt.f32.partialorder %v3808_v9, %v1842_v35  ;;  %vm4565_vm10 = vcmp.gt.f32.partialorder %v3810_v45, %v1843_v20  ;;  %vm4570_vm0 = vcmp.gt.f32.partialorder %v3812_v22, %v1844_v46 }
 0x3cd   :  { %vm4575_vm3 = vcmp.gt.f32.partialorder %v3814_v0, %v1845_v56  ;;  %vm4580_vm8 = vcmp.gt.f32.partialorder %v3816_v13, %v1846_v53  ;;  %v1863_v55 = vsel %vm4545_vm13, %v3798_v31, %v1839_v49  ;;  %v1864_v23 = vsel %vm4550_vm2, %v3800_v34, %v1840_v11 }
 0x3ce   :  { %v1865_v14 = vsel %vm4555_vm5, %v3806_v2, %v1841_v57  ;;  %v1866_v1 = vsel %vm4560_vm1, %v3808_v9, %v1842_v35  ;;  %v1867_v6 = vsel %vm4565_vm10, %v3810_v45, %v1843_v20  ;;  %v1868_v25 = vsel %vm4570_vm0, %v3812_v22, %v1844_v46 }
 0x3cf   :  { %v1869_v48 = vsel %vm4575_vm3, %v3814_v0, %v1845_v56  ;;  %v1870_v42 = vsel %vm4580_vm8, %v3816_v13, %v1846_v53  ;;  %v1871_v16 = vrot.slane %v1823_v58, 7  ;;  %v1872_v12 = vrot.slane %v1824_v50, 7 }
 0x3d0   :  { %v1873_v43 = vrot.slane %v1825_v19, 7  ;;  %v1874_v49 = vrot.slane %v1826_v44, 7  ;;  %v1875_v11 = vrot.slane %v1827_v7, 7  ;;  %v1876_v57 = vrot.slane %v1828_v30, 7 }
 0x3d1   :  { %v1877_v35 = vrot.slane %v1829_v32, 7  ;;  %v1878_v20 = vrot.slane %v1830_v61, 7  ;;  %v1879_v46 = vsel %vm4545_vm13, %v3804_v5, %v1871_v16  ;;  %v1880_v56 = vsel %vm4550_vm2, %v3804_v5, %v1872_v12 }
 0x3d2   :  { %v1881_v53 = vsel %vm4555_vm5, %v3804_v5, %v1873_v43  ;;  %v1882_v58 = vsel %vm4560_vm1, %v3804_v5, %v1874_v49  ;;  %v1883_v50 = vsel %vm4565_vm10, %v3804_v5, %v1875_v11  ;;  %v1884_v19 = vsel %vm4570_vm0, %v3804_v5, %v1876_v57 }
 0x3d3   :  { %v1885_v44 = vsel %vm4575_vm3, %v3804_v5, %v1877_v35  ;;  %v1886_v7 = vsel %vm4580_vm8, %v3804_v5, %v1878_v20  ;;  %v1895_v30 = vrot.slane %v1863_v55, 7  ;;  %v1896_v32 = vrot.slane %v1864_v23, 7 }
 0x3d4   :  { %v1897_v61 = vrot.slane %v1865_v14, 7  ;;  %v1898_v24 = vrot.slane %v1866_v1, 7  ;;  %v1899_v40 = vrot.slane %v1867_v6, 7  ;;  %v1900_v47 = vrot.slane %v1868_v25, 7 }
 0x3d5   :  { %v1901_v28 = vrot.slane %v1869_v48, 7  ;;  %v1902_v41 = vrot.slane %v1870_v42, 7  ;;  %vm4633_vm2 = vcmp.gt.f32.partialorder %v3798_v31, %v1895_v30  ;;  %vm4638_vm5 = vcmp.gt.f32.partialorder %v3800_v34, %v1896_v32 }
 0x3d6   :  { %vm4643_vm1 = vcmp.gt.f32.partialorder %v3806_v2, %v1897_v61  ;;  %vm4648_vm10 = vcmp.gt.f32.partialorder %v3808_v9, %v1898_v24  ;;  %vm4653_vm0 = vcmp.gt.f32.partialorder %v3810_v45, %v1899_v40  ;;  %vm4658_vm3 = vcmp.gt.f32.partialorder %v3812_v22, %v1900_v47 }
 0x3d7   :  { %vm4663_vm8 = vcmp.gt.f32.partialorder %v3814_v0, %v1901_v28  ;;  %vm4668_vm13 = vcmp.gt.f32.partialorder %v3816_v13, %v1902_v41  ;;  %v1919_v23 = vrot.slane %v1879_v46, 7  ;;  %v1920_v45 = vrot.slane %v1880_v56, 7 }
 0x3d8   :  { %vm1966_vm15 = vcmask 1041408   ;;  %v1921_v14 = vrot.slane %v1881_v53, 7  ;;  %v1922_v1 = vrot.slane %v1882_v58, 7  ;;  %v1923_v6 = vrot.slane %v1883_v50, 7 }
 0x3d9   :  { %v1924_v22 = vrot.slane %v1884_v19, 7  ;;  %vm1968_vm7 = vcmask 1045508   ;;  %v1925_v25 = vrot.slane %v1885_v44, 7  ;;  %v1926_v48 = vrot.slane %v1886_v7, 7 }
 0x3da   :  { %v1927_v0 = vsel %vm4633_vm2, %v3804_v5, %v1919_v23  ;;  %v1928_v13 = vsel %vm4638_vm5, %v3804_v5, %v1920_v45  ;;  %vm1970_vm6 = vcmask 1043456   ;;  %v1929_v42 = vsel %vm4643_vm1, %v3804_v5, %v1921_v14 }
 0x3db   :  { %v1930_v16 = vsel %vm4648_vm10, %v3804_v5, %v1922_v1  ;;  %v1931_v12 = vsel %vm4653_vm0, %v3804_v5, %v1923_v6  ;;  %v1932_v43 = vsel %vm4658_vm3, %v3804_v5, %v1924_v22  ;;  %v1933_v49 = vsel %vm4663_vm8, %v3804_v5, %v1925_v25 }
 0x3dc   :  { %v1934_v11 = vsel %vm4668_vm13, %v3804_v5, %v1926_v48  ;;  %v1935_v57 = vrot.slane %v1359_v17, 7  ;;  %v1936_v35 = vrot.slane %v1360_v10, 7  ;;  %v1937_v20 = vrot.slane %v1361_v18, 7 }
 0x3dd   :  { %v5312_v5 = vsel %vm5185_vm11, %v3802_v60, %v4032_v36  ;;  %v5313_v39 = vsel %vm3953_vm4, %v3802_v60, %v4034_v62  ;;  %vm5314_vm14 = vnez %v5165_v26  ;;  %vm5316_vm9 = vnez %v5168_v52 }
 0x3de   :  { %v1938_v29 = vrot.slane %v5312_v5, 7  ;;  %v1939_v59 = vrot.slane %v5313_v39, 7  ;;  %v5315_v51 = vsel %vm5314_vm14, %v3802_v60, %v4036_v54  ;;  %v5317_v38 = vsel %vm5316_vm9, %v3802_v60, %v4038_v33 }
 0x3df   :  { %v1940_v63 = vrot.slane %v5315_v51, 7  ;;  %v1941_v37 = vrot.slane %v5317_v38, 7  ;;  %vm5318_vm12 = vnez %v5171_v21  ;;  %v1943_v62 = vrot.slane %v1927_v0, 6 }
 0x3e0   :  { %v5319_v27 = vsel %vm5318_vm12, %v3802_v60, %v4040_v15  ;;  %v1944_v17 = vrot.slane %v1928_v13, 6  ;;  %v1945_v10 = vrot.slane %v1929_v42, 6  ;;  %v1946_v26 = vrot.slane %v1930_v16, 6 }
 0x3e1   :  { %v1942_v36 = vrot.slane %v5319_v27, 7  ;;  %v1947_v18 = vrot.slane %v1931_v12, 6  ;;  %v1948_v46 = vrot.slane %v1932_v43, 6  ;;  %v1949_v54 = vrot.slane %v1933_v49, 6 }
 0x3e2   :  { %v1950_v56 = vrot.slane %v1934_v11, 6  ;;  %vm5320_vm4 = vcmask 1040384  }
 0x3e3   :  { %v1952_v52 = vsel %vm5320_vm4, %v1935_v57, %v1943_v62  ;;  %vm5321_vm11 = vmmov %vm5320_vm4 }
 0x3e4   :  { %v1953_v53 = vsel %vm5321_vm11, %v1936_v35, %v1944_v17  ;;  %vm5322_vm13 = vmmov %vm5320_vm4 }
 0x3e5   :  { %v1954_v33 = vsel %vm5322_vm13, %v1937_v20, %v1945_v10  ;;  %vm5323_vm2 = vmmov %vm5320_vm4  ;;  %v1960_v19 = vrot.slane %v1953_v53, 6 }
 0x3e6   :  { %v1955_v21 = vsel %vm5323_vm2, %v1938_v29, %v1946_v26  ;;  %vm5324_vm5 = vmmov %vm5323_vm2  ;;  %v1961_v44 = vrot.slane %v1954_v33, 4 }
 0x3e7   :  { %v1956_v58 = vsel %vm5324_vm5, %v1939_v59, %v1947_v18  ;;  %vm5325_vm1 = vmmov %vm5323_vm2  ;;  %v1962_v7 = vrot.slane %v1955_v21, 2  ;;  %v1967_v24 = vsel %vm1966_vm15, %v1952_v52, %v1960_v19 }
 0x3e8   :  { %v1957_v60 = vsel %vm5325_vm1, %v1940_v63, %v1948_v46  ;;  %vm5326_vm10 = vmmov %vm5325_vm1 }
 0x3e9   :  { %v1958_v15 = vsel %vm5326_vm10, %v1941_v37, %v1949_v54  ;;  %vm5327_vm0 = vmmov %vm5325_vm1  ;;  %v1963_v30 = vrot.slane %v1957_v60, 6  ;;  %v1969_v40 = vsel %vm1968_vm7, %v1961_v44, %v1962_v7 }
 0x3ea   :  { %v1959_v50 = vsel %vm5327_vm0, %v1942_v36, %v1950_v56  ;;  %v1964_v32 = vrot.slane %v1958_v15, 4  ;;  %v1971_v41 = vsel %vm1970_vm6, %v1967_v24, %v1969_v40 }
 0x3eb   :  { %v1965_v61 = vrot.slane %v1959_v50, 2  ;;  %v1972_v47 = vsel %vm1966_vm15, %v1956_v58, %v1963_v30  ;;  %1975 = vst [vmem:[%s4765_s9] sm:$0xff] %v1971_v41 }
 0x3ed   :  { %v1973_v28 = vsel %vm1968_vm7, %v1964_v32, %v1965_v61 }
 0x3ee   :  { %v1974_v3 = vsel %vm1970_vm6, %v1972_v47, %v1973_v28 }
 0x3ef   :  { %1976 = vst [vmem:[%s4765_s9 + $0x8] sm:$0xff] %v1974_v3 }
 0x3f0   :  { %1989 = vsyncmov [#allocation3] }
 0x3f3   :  { %s1990_s1 = vpop.sfrf %1989 }
 0x3f4   :  { %p2187_p0 = scmp.ne.s32.totalorder %s1990_s1, 0 }
 0x3f6   :  { %1994 = shalt.err (%p2187_p0)  }

</bundles_post_ra>
